<compile_context>
chip_gen: v7x
topology: tpu7x:2x2x1
jax: 0.10.0
libtpu: 0.0.40
codegen_flags: <defaults>
</compile_context>

<pallas_src>
import math

import jax
import jax.numpy as jnp
from jax.experimental import pallas as pl
from jax.experimental.pallas import tpu as pltpu

# ----------------------------- model dimensions -----------------------------
BATCH = 2
SEQ = 8
HIDDEN = 32
HEADS = 2
HEAD_DIM = HIDDEN // HEADS
INTER = 64
LAYERS = 2
VOCAB = 100          # len_tokenizer
MAX_POS = 16
LN_EPS = 1e-12
TEMPERATURE = 0.07
BASE_TEMPERATURE = 0.07
PER_LAYER_REFS = 12


# ----------------------------- kernel-side helpers --------------------------
def _layer_norm(x, g, b):
    mu = jnp.mean(x, axis=-1, keepdims=True)
    var = jnp.mean((x - mu) ** 2, axis=-1, keepdims=True)
    return (x - mu) * jax.lax.rsqrt(var + LN_EPS) * g + b


def _gelu(x):
    # TODO(synk): HF BERT uses the exact erf GELU; tanh approximation (~1e-3 rel drift)
    # is used here since erf has no guaranteed Mosaic lowering.
    c = 0.7978845608028654
    return 0.5 * x * (1.0 + jnp.tanh(c * (x + 0.044715 * x * x * x)))


# ----------------------------- the single fused kernel ----------------------
def fused_forward_kernel(*refs):
    (emb_ref, mask_ref, labc_ref, labr_ref, embg_ref, embb_ref) = refs[:6]
    layer_refs = refs[6:6 + LAYERS * PER_LAYER_REFS]
    loss_ref = refs[-1]

    N, S, H = emb_ref.shape                              # N = 2*BATCH (left;right stacked)
    mask = mask_ref[...]                                 # (N, S) f32
    neg = (1.0 - mask) * -10000.0                        # BERT-style additive attention bias
    scale = 1.0 / math.sqrt(HEAD_DIM)

    # ---- embedding LayerNorm ----
    x = _layer_norm(emb_ref[...], embg_ref[...], embb_ref[...])        # (N, S, H) f32

    # ---- transformer encoder layers (statically unrolled) ----
    for l in range(LAYERS):
        (wqkv, bqkv, wo, bo, ln1g, ln1b,
         w1, b1, w2, b2, ln2g, ln2b) = layer_refs[l * PER_LAYER_REFS:(l + 1) * PER_LAYER_REFS]

        x2 = x.reshape(N * S, H)                                       # f32
        # fused Q|K|V projection: one (N*S, H) @ (H, 3H) matmul (bf16 in, f32 acc)
        qkv = (jnp.dot(x2.astype(jnp.bfloat16), wqkv[...],
                       preferred_element_type=jnp.float32)
               + bqkv[...])                                            # (N*S, 3H)
        qkv = qkv.reshape(N, S, 3 * H)

        wo_all = wo[...]                                               # (H, H) bf16
        attn = jnp.zeros((N * S, H), jnp.float32)
        for h in range(HEADS):                                         # HEADS=2, unrolled
            lo = h * HEAD_DIM
            qh = qkv[:, :, lo:lo + HEAD_DIM].astype(jnp.bfloat16)
            kh = qkv[:, :, H + lo:H + lo + HEAD_DIM].astype(jnp.bfloat16)
            vh = qkv[:, :, 2 * H + lo:2 * H + lo + HEAD_DIM].astype(jnp.bfloat16)

            s = jnp.einsum('bqd,bkd->bqk', qh, kh,
                           preferred_element_type=jnp.float32) * scale
            s = s + neg[:, None, :]
            s = s - jnp.max(s, axis=-1, keepdims=True)
            p = jnp.exp(s)
            p = p * pl.reciprocal(jnp.sum(p, axis=-1, keepdims=True), approx=True)

            ctx = jnp.einsum('bqk,bkd->bqd', p.astype(jnp.bfloat16), vh,
                             preferred_element_type=jnp.float32)       # (N, S, D)
            # per-head slab of the output projection (avoids a lane concatenate)
            attn = attn + jnp.dot(ctx.reshape(N * S, HEAD_DIM).astype(jnp.bfloat16),
                                  wo_all[lo:lo + HEAD_DIM, :],
                                  preferred_element_type=jnp.float32)
        attn = attn + bo[...]
        h1 = _layer_norm(x2 + attn, ln1g[...], ln1b[...])              # (N*S, H)

        inter = _gelu(jnp.dot(h1.astype(jnp.bfloat16), w1[...],
                              preferred_element_type=jnp.float32) + b1[...])
        ffn = jnp.dot(inter.astype(jnp.bfloat16), w2[...],
                      preferred_element_type=jnp.float32) + b2[...]
        x = _layer_norm(h1 + ffn, ln2g[...], ln2b[...]).reshape(N, S, H)

    # ---- masked mean pooling (torch.clamp(min=1e-9) on the mask sum) ----
    m = mask[:, :, None]                                               # (N, S, 1)
    num = jnp.sum(x * m, axis=1)                                       # (N, H)
    den = jnp.maximum(jnp.sum(mask, axis=1, keepdims=True), 1e-9)      # (N, 1)
    pooled = num * pl.reciprocal(den, approx=True)                     # (N, H)

    # ---- F.normalize(dim=-1, eps=1e-12): x / max(||x||, eps) ----
    sq = jnp.sum(pooled * pooled, axis=-1, keepdims=True)
    feat = pooled * jax.lax.rsqrt(jnp.maximum(sq, 1e-24))              # rows = [left; right]

    # ---- SupConLoss (contrast_mode='all', anchor_count = contrast_count = 2) ----
    # similarity as a VPU multiply + lane reduce (tiny N -> skip the MXU)
    sim = jnp.sum(feat[:, None, :] * feat[None, :, :], axis=-1) * (1.0 / TEMPERATURE)
    sim = sim - jnp.max(sim, axis=1, keepdims=True)                    # numerical stability

    pos = (labc_ref[...] == labr_ref[...]).astype(jnp.float32)         # (N, N) label-equality
    ri = jax.lax.broadcasted_iota(jnp.int32, (N, N), 0)
    ci = jax.lax.broadcasted_iota(jnp.int32, (N, N), 1)
    logits_mask = (ri != ci).astype(jnp.float32)                       # mask out self-contrast
    pos = pos * logits_mask

    exp_logits = jnp.exp(sim) * logits_mask
    log_prob = sim - jnp.log(jnp.sum(exp_logits, axis=1, keepdims=True))
    # every anchor has >= 1 positive (its paired view), so the denominator is never zero
    mean_log_prob_pos = (jnp.sum(pos * log_prob, axis=1, keepdims=True)
                         / jnp.sum(pos, axis=1, keepdims=True))        # (N, 1)
    loss_vec = -(TEMPERATURE / BASE_TEMPERATURE) * mean_log_prob_pos
    loss_ref[...] = jnp.mean(loss_vec, keepdims=True)                  # (1, 1)


# ----------------------------- wrapper ---------------------------------------
def _flatten_params(params):
    flat = [params['emb_ln_g'], params['emb_ln_b']]
    for lp in params['layers']:
        flat += [lp['wqkv'], lp['bqkv'], lp['wo'], lp['bo'],
                 lp['ln1_g'], lp['ln1_b'],
                 lp['w1'], lp['b1'], lp['w2'], lp['b2'],
                 lp['ln2_g'], lp['ln2_b']]
    return flat


@jax.jit
def forward(params, input_ids, attention_mask, labels,
            input_ids_right, attention_mask_right):
    # shared-weight towers -> stack along batch, encode once (rows: [left; right])
    ids = jnp.concatenate([input_ids, input_ids_right], axis=0)              # (2B, S)
    am = jnp.concatenate([attention_mask, attention_mask_right],
                         axis=0).astype(jnp.float32)                         # (2B, S)
    # TODO(synk): embedding token-id gather kept in plain JAX glue (data-dependent indices,
    # synthetic weights stand in for the pretrained TinyBERT checkpoint).
    emb = (params['word_emb'][ids]
           + params['pos_emb'][jnp.arange(ids.shape[1])][None, :, :]
           + params['type_emb'][0][None, None, :]).astype(jnp.float32)       # (2B, S, H)

    lab2 = jnp.concatenate([labels, labels], axis=0).astype(jnp.float32)     # (2B,)
    lab_col = lab2.reshape(-1, 1)                                            # (2B, 1)
    lab_row = lab2.reshape(1, -1)                                            # (1, 2B)

    args = [emb, am, lab_col, lab_row] + _flatten_params(params)
    vmem_specs = [pl.BlockSpec(memory_space=pltpu.MemorySpace.VMEM) for _ in args]
    loss = pl.pallas_call(
        fused_forward_kernel,
        out_shape=jax.ShapeDtypeStruct((1, 1), jnp.float32),
        in_specs=vmem_specs,
        out_specs=pl.BlockSpec(memory_space=pltpu.MemorySpace.VMEM),
    )(*args)
    return (loss[0, 0],)     # module returns (loss,)


# ----------------------------- deterministic params --------------------------
def init_params(key):
    keys = iter(jax.random.split(key, 64))

    def nrm(shape, scale=0.02):
        return (scale * jax.random.normal(next(keys), shape)).astype(jnp.float32)

    p = {
        'word_emb': nrm((VOCAB, HIDDEN)),
        'pos_emb': nrm((MAX_POS, HIDDEN)),
        'type_emb': nrm((2, HIDDEN)),
        'emb_ln_g': jnp.ones((1, HIDDEN), jnp.float32),
        'emb_ln_b': jnp.zeros((1, HIDDEN), jnp.float32),
        'layers': [],
    }
    for _ in range(LAYERS):
        wq, wk, wv = nrm((HIDDEN, HIDDEN)), nrm((HIDDEN, HIDDEN)), nrm((HIDDEN, HIDDEN))
        lp = {
            # fused QKV projection; matmul weights stored in bf16 (f32 accumulation in-kernel)
            'wqkv': jnp.concatenate([wq, wk, wv], axis=1).astype(jnp.bfloat16),
            'bqkv': jnp.zeros((1, 3 * HIDDEN), jnp.float32),
            'wo': nrm((HIDDEN, HIDDEN)).astype(jnp.bfloat16),
            'bo': jnp.zeros((1, HIDDEN), jnp.float32),
            'ln1_g': jnp.ones((1, HIDDEN), jnp.float32),
            'ln1_b': jnp.zeros((1, HIDDEN), jnp.float32),
            'w1': nrm((HIDDEN, INTER)).astype(jnp.bfloat16),
            'b1': jnp.zeros((1, INTER), jnp.float32),
            'w2': nrm((INTER, HIDDEN)).astype(jnp.bfloat16),
            'b2': jnp.zeros((1, HIDDEN), jnp.float32),
            'ln2_g': jnp.ones((1, HIDDEN), jnp.float32),
            'ln2_b': jnp.zeros((1, HIDDEN), jnp.float32),
        }
        p['layers'].append(lp)
    return p


# ----------------------------- main ------------------------------------------
if __name__ == "__main__":
    key = jax.random.PRNGKey(0)
    kp, k1, k2, k3 = jax.random.split(key, 4)
    params = init_params(kp)

    input_ids = jax.random.randint(k1, (BATCH, SEQ), 0, VOCAB, dtype=jnp.int32)
    input_ids_right = jax.random.randint(k2, (BATCH, SEQ), 0, VOCAB, dtype=jnp.int32)
    attention_mask = jnp.array([[1, 1, 1, 1, 1, 1, 0, 0],
                                [1, 1, 1, 1, 1, 1, 1, 1]], dtype=jnp.int32)
    attention_mask_right = jnp.array([[1, 1, 1, 1, 1, 1, 1, 0],
                                      [1, 1, 1, 1, 0, 0, 0, 0]], dtype=jnp.int32)
    # contrastive labels = entity/cluster ids (left & right views of sample i share labels[i])
    labels = jax.random.randint(k3, (BATCH,), 0, 2).astype(jnp.float32)

    (loss,) = forward(params, input_ids, attention_mask, labels,
                      input_ids_right, attention_mask_right)
    jax.block_until_ready(loss)
    assert loss.shape == ()
    assert bool(jnp.isfinite(loss))
    print("KERNEL_OK")
</pallas_src>

<mosaic_0001>
module attributes {stable_mosaic.version = 11 : i64} {
  func.func @fused_forward_kernel(%arg0: memref<4x8x32xf32, #tpu.memory_space<vmem>>, %arg1: memref<4x8xf32, #tpu.memory_space<vmem>>, %arg2: memref<4x1xf32, #tpu.memory_space<vmem>>, %arg3: memref<1x4xf32, #tpu.memory_space<vmem>>, %arg4: memref<1x32xf32, #tpu.memory_space<vmem>>, %arg5: memref<1x32xf32, #tpu.memory_space<vmem>>, %arg6: memref<32x96xbf16, #tpu.memory_space<vmem>>, %arg7: memref<1x96xf32, #tpu.memory_space<vmem>>, %arg8: memref<32x32xbf16, #tpu.memory_space<vmem>>, %arg9: memref<1x32xf32, #tpu.memory_space<vmem>>, %arg10: memref<1x32xf32, #tpu.memory_space<vmem>>, %arg11: memref<1x32xf32, #tpu.memory_space<vmem>>, %arg12: memref<32x64xbf16, #tpu.memory_space<vmem>>, %arg13: memref<1x64xf32, #tpu.memory_space<vmem>>, %arg14: memref<64x32xbf16, #tpu.memory_space<vmem>>, %arg15: memref<1x32xf32, #tpu.memory_space<vmem>>, %arg16: memref<1x32xf32, #tpu.memory_space<vmem>>, %arg17: memref<1x32xf32, #tpu.memory_space<vmem>>, %arg18: memref<32x96xbf16, #tpu.memory_space<vmem>>, %arg19: memref<1x96xf32, #tpu.memory_space<vmem>>, %arg20: memref<32x32xbf16, #tpu.memory_space<vmem>>, %arg21: memref<1x32xf32, #tpu.memory_space<vmem>>, %arg22: memref<1x32xf32, #tpu.memory_space<vmem>>, %arg23: memref<1x32xf32, #tpu.memory_space<vmem>>, %arg24: memref<32x64xbf16, #tpu.memory_space<vmem>>, %arg25: memref<1x64xf32, #tpu.memory_space<vmem>>, %arg26: memref<64x32xbf16, #tpu.memory_space<vmem>>, %arg27: memref<1x32xf32, #tpu.memory_space<vmem>>, %arg28: memref<1x32xf32, #tpu.memory_space<vmem>>, %arg29: memref<1x32xf32, #tpu.memory_space<vmem>>, %arg30: memref<1x1xf32, #tpu.memory_space<vmem>>) attributes {dimension_semantics = [], scalar_prefetch = 0 : i64, scratch_operands = 0 : i64, tpu.core_type = #tpu.core_type<tc>} {
    %c0 = arith.constant 0 : index
    %c0_0 = arith.constant 0 : index
    %0 = vector.load %arg1[%c0, %c0_0] : memref<4x8xf32, #tpu.memory_space<vmem>>, vector<4x8xf32>
    %cst = arith.constant 1.000000e+00 : f32
    %1 = vector.broadcast %cst : f32 to vector<4x8xf32>
    %2 = arith.subf %1, %0 : vector<4x8xf32>
    %cst_1 = arith.constant -1.000000e+04 : f32
    %3 = vector.broadcast %cst_1 : f32 to vector<4x8xf32>
    %4 = arith.mulf %2, %3 : vector<4x8xf32>
    %c0_2 = arith.constant 0 : index
    %c0_3 = arith.constant 0 : index
    %c0_4 = arith.constant 0 : index
    %5 = vector.load %arg0[%c0_2, %c0_3, %c0_4] : memref<4x8x32xf32, #tpu.memory_space<vmem>>, vector<4x8x32xf32>
    %c0_5 = arith.constant 0 : index
    %c0_6 = arith.constant 0 : index
    %6 = vector.load %arg4[%c0_5, %c0_6] : memref<1x32xf32, #tpu.memory_space<vmem>>, vector<1x32xf32>
    %c0_7 = arith.constant 0 : index
    %c0_8 = arith.constant 0 : index
    %7 = vector.load %arg5[%c0_7, %c0_8] : memref<1x32xf32, #tpu.memory_space<vmem>>, vector<1x32xf32>
    %cst_9 = arith.constant dense<0.000000e+00> : vector<4x8xf32>
    %8 = vector.multi_reduction <add>, %5, %cst_9 [2] : vector<4x8x32xf32> to vector<4x8xf32>
    %9 = vector.shape_cast %8 : vector<4x8xf32> to vector<4x8x1xf32>
    %cst_10 = arith.constant 3.200000e+01 : f32
    %10 = vector.broadcast %cst_10 : f32 to vector<4x8x1xf32>
    %11 = arith.divf %9, %10 : vector<4x8x1xf32>
    %12 = vector.broadcast %11 : vector<4x8x1xf32> to vector<4x8x32xf32>
    %13 = arith.subf %5, %12 : vector<4x8x32xf32>
    %14 = arith.mulf %13, %13 : vector<4x8x32xf32>
    %cst_11 = arith.constant dense<0.000000e+00> : vector<4x8xf32>
    %15 = vector.multi_reduction <add>, %14, %cst_11 [2] : vector<4x8x32xf32> to vector<4x8xf32>
    %16 = vector.shape_cast %15 : vector<4x8xf32> to vector<4x8x1xf32>
    %cst_12 = arith.constant 3.200000e+01 : f32
    %17 = vector.broadcast %cst_12 : f32 to vector<4x8x1xf32>
    %18 = arith.divf %16, %17 : vector<4x8x1xf32>
    %19 = vector.broadcast %11 : vector<4x8x1xf32> to vector<4x8x32xf32>
    %20 = arith.subf %5, %19 : vector<4x8x32xf32>
    %cst_13 = arith.constant 9.99999996E-13 : f32
    %21 = vector.broadcast %cst_13 : f32 to vector<4x8x1xf32>
    %22 = arith.addf %18, %21 : vector<4x8x1xf32>
    %23 = math.rsqrt %22 : vector<4x8x1xf32>
    %24 = vector.broadcast %23 : vector<4x8x1xf32> to vector<4x8x32xf32>
    %25 = arith.mulf %20, %24 : vector<4x8x32xf32>
    %26 = vector.shape_cast %6 : vector<1x32xf32> to vector<1x1x32xf32>
    %27 = vector.broadcast %26 : vector<1x1x32xf32> to vector<4x8x32xf32>
    %28 = arith.mulf %25, %27 : vector<4x8x32xf32>
    %29 = vector.shape_cast %7 : vector<1x32xf32> to vector<1x1x32xf32>
    %30 = vector.broadcast %29 : vector<1x1x32xf32> to vector<4x8x32xf32>
    %31 = arith.addf %28, %30 : vector<4x8x32xf32>
    %32 = vector.shape_cast %31 : vector<4x8x32xf32> to vector<32x32xf32>
    %33 = arith.truncf %32 : vector<32x32xf32> to vector<32x32xbf16>
    %c0_14 = arith.constant 0 : index
    %c0_15 = arith.constant 0 : index
    %34 = vector.load %arg6[%c0_14, %c0_15] : memref<32x96xbf16, #tpu.memory_space<vmem>>, vector<32x96xbf16>
    %cst_16 = arith.constant dense<0.000000e+00> : vector<32x96xf32>
    %35 = tpu.matmul %33, %34, %cst_16 {dimension_numbers = #tpu.dot_dimension_numbers<[1], [0], [0], [1], [0, 0, 1, 1], [], []>} : vector<32x32xbf16>, vector<32x96xbf16>, vector<32x96xf32> -> vector<32x96xf32>
    %c0_17 = arith.constant 0 : index
    %c0_18 = arith.constant 0 : index
    %36 = vector.load %arg7[%c0_17, %c0_18] : memref<1x96xf32, #tpu.memory_space<vmem>>, vector<1x96xf32>
    %37 = vector.broadcast %36 : vector<1x96xf32> to vector<32x96xf32>
    %38 = arith.addf %35, %37 : vector<32x96xf32>
    %39 = vector.shape_cast %38 : vector<32x96xf32> to vector<4x8x96xf32>
    %c0_19 = arith.constant 0 : index
    %c0_20 = arith.constant 0 : index
    %40 = vector.load %arg8[%c0_19, %c0_20] : memref<32x32xbf16, #tpu.memory_space<vmem>>, vector<32x32xbf16>
    %cst_21 = arith.constant 0.000000e+00 : f32
    %41 = vector.broadcast %cst_21 : f32 to vector<32x32xf32>
    %42 = vector.extract_strided_slice %39 {offsets = [0, 0, 0], sizes = [4, 8, 16], strides = [1, 1, 1]} : vector<4x8x96xf32> to vector<4x8x16xf32>
    %43 = arith.truncf %42 : vector<4x8x16xf32> to vector<4x8x16xbf16>
    %44 = vector.extract_strided_slice %39 {offsets = [0, 0, 32], sizes = [4, 8, 16], strides = [1, 1, 1]} : vector<4x8x96xf32> to vector<4x8x16xf32>
    %45 = arith.truncf %44 : vector<4x8x16xf32> to vector<4x8x16xbf16>
    %46 = vector.extract_strided_slice %39 {offsets = [0, 0, 64], sizes = [4, 8, 16], strides = [1, 1, 1]} : vector<4x8x96xf32> to vector<4x8x16xf32>
    %47 = arith.truncf %46 : vector<4x8x16xf32> to vector<4x8x16xbf16>
    "tpu.trace_start"() <{level = 10 : i32, message = "bqd,bkd->bqk"}> : () -> ()
    %cst_22 = arith.constant dense<0.000000e+00> : vector<4x8x8xf32>
    %48 = tpu.matmul %43, %45, %cst_22 {dimension_numbers = #tpu.dot_dimension_numbers<[2], [2], [1], [1], [0, 0, 0, 1, 1, 1], [0], [0]>} : vector<4x8x16xbf16>, vector<4x8x16xbf16>, vector<4x8x8xf32> -> vector<4x8x8xf32>
    "tpu.trace_stop"() : () -> ()
    %cst_23 = arith.constant 2.500000e-01 : f32
    %49 = vector.broadcast %cst_23 : f32 to vector<4x8x8xf32>
    %50 = arith.mulf %48, %49 : vector<4x8x8xf32>
    %51 = vector.shape_cast %4 : vector<4x8xf32> to vector<4x1x8xf32>
    %52 = vector.broadcast %51 : vector<4x1x8xf32> to vector<4x8x8xf32>
    %53 = arith.addf %50, %52 : vector<4x8x8xf32>
    %cst_24 = arith.constant dense<0xFF800000> : vector<4x8xf32>
    %54 = vector.multi_reduction <maximumf>, %53, %cst_24 [2] : vector<4x8x8xf32> to vector<4x8xf32>
    %55 = vector.shape_cast %54 : vector<4x8xf32> to vector<4x8x1xf32>
    %56 = vector.broadcast %55 : vector<4x8x1xf32> to vector<4x8x8xf32>
    %57 = arith.subf %53, %56 : vector<4x8x8xf32>
    %58 = math.exp %57 : vector<4x8x8xf32>
    %cst_25 = arith.constant dense<0.000000e+00> : vector<4x8xf32>
    %59 = vector.multi_reduction <add>, %58, %cst_25 [2] : vector<4x8x8xf32> to vector<4x8xf32>
    %60 = vector.shape_cast %59 : vector<4x8xf32> to vector<4x8x1xf32>
    %61 = tpu.reciprocal %60 {approx = true} : vector<4x8x1xf32> -> vector<4x8x1xf32>
    %62 = vector.broadcast %61 : vector<4x8x1xf32> to vector<4x8x8xf32>
    %63 = arith.mulf %58, %62 : vector<4x8x8xf32>
    %64 = arith.truncf %63 : vector<4x8x8xf32> to vector<4x8x8xbf16>
    "tpu.trace_start"() <{level = 10 : i32, message = "bqk,bkd->bqd"}> : () -> ()
    %cst_26 = arith.constant dense<0.000000e+00> : vector<4x8x16xf32>
    %65 = tpu.matmul %64, %47, %cst_26 {dimension_numbers = #tpu.dot_dimension_numbers<[2], [1], [1], [2], [0, 0, 0, 1, 1, 2], [0], [0]>} : vector<4x8x8xbf16>, vector<4x8x16xbf16>, vector<4x8x16xf32> -> vector<4x8x16xf32>
    "tpu.trace_stop"() : () -> ()
    %66 = vector.shape_cast %65 : vector<4x8x16xf32> to vector<32x16xf32>
    %67 = arith.truncf %66 : vector<32x16xf32> to vector<32x16xbf16>
    %68 = vector.extract_strided_slice %40 {offsets = [0, 0], sizes = [16, 32], strides = [1, 1]} : vector<32x32xbf16> to vector<16x32xbf16>
    %cst_27 = arith.constant dense<0.000000e+00> : vector<32x32xf32>
    %69 = tpu.matmul %67, %68, %cst_27 {dimension_numbers = #tpu.dot_dimension_numbers<[1], [0], [0], [1], [0, 0, 1, 1], [], []>} : vector<32x16xbf16>, vector<16x32xbf16>, vector<32x32xf32> -> vector<32x32xf32>
    %70 = arith.addf %41, %69 : vector<32x32xf32>
    %71 = vector.extract_strided_slice %39 {offsets = [0, 0, 16], sizes = [4, 8, 16], strides = [1, 1, 1]} : vector<4x8x96xf32> to vector<4x8x16xf32>
    %72 = arith.truncf %71 : vector<4x8x16xf32> to vector<4x8x16xbf16>
    %73 = vector.extract_strided_slice %39 {offsets = [0, 0, 48], sizes = [4, 8, 16], strides = [1, 1, 1]} : vector<4x8x96xf32> to vector<4x8x16xf32>
    %74 = arith.truncf %73 : vector<4x8x16xf32> to vector<4x8x16xbf16>
    %75 = vector.extract_strided_slice %39 {offsets = [0, 0, 80], sizes = [4, 8, 16], strides = [1, 1, 1]} : vector<4x8x96xf32> to vector<4x8x16xf32>
    %76 = arith.truncf %75 : vector<4x8x16xf32> to vector<4x8x16xbf16>
    "tpu.trace_start"() <{level = 10 : i32, message = "bqd,bkd->bqk"}> : () -> ()
    %cst_28 = arith.constant dense<0.000000e+00> : vector<4x8x8xf32>
    %77 = tpu.matmul %72, %74, %cst_28 {dimension_numbers = #tpu.dot_dimension_numbers<[2], [2], [1], [1], [0, 0, 0, 1, 1, 1], [0], [0]>} : vector<4x8x16xbf16>, vector<4x8x16xbf16>, vector<4x8x8xf32> -> vector<4x8x8xf32>
    "tpu.trace_stop"() : () -> ()
    %cst_29 = arith.constant 2.500000e-01 : f32
    %78 = vector.broadcast %cst_29 : f32 to vector<4x8x8xf32>
    %79 = arith.mulf %77, %78 : vector<4x8x8xf32>
    %80 = vector.shape_cast %4 : vector<4x8xf32> to vector<4x1x8xf32>
    %81 = vector.broadcast %80 : vector<4x1x8xf32> to vector<4x8x8xf32>
    %82 = arith.addf %79, %81 : vector<4x8x8xf32>
    %cst_30 = arith.constant dense<0xFF800000> : vector<4x8xf32>
    %83 = vector.multi_reduction <maximumf>, %82, %cst_30 [2] : vector<4x8x8xf32> to vector<4x8xf32>
    %84 = vector.shape_cast %83 : vector<4x8xf32> to vector<4x8x1xf32>
    %85 = vector.broadcast %84 : vector<4x8x1xf32> to vector<4x8x8xf32>
    %86 = arith.subf %82, %85 : vector<4x8x8xf32>
    %87 = math.exp %86 : vector<4x8x8xf32>
    %cst_31 = arith.constant dense<0.000000e+00> : vector<4x8xf32>
    %88 = vector.multi_reduction <add>, %87, %cst_31 [2] : vector<4x8x8xf32> to vector<4x8xf32>
    %89 = vector.shape_cast %88 : vector<4x8xf32> to vector<4x8x1xf32>
    %90 = tpu.reciprocal %89 {approx = true} : vector<4x8x1xf32> -> vector<4x8x1xf32>
    %91 = vector.broadcast %90 : vector<4x8x1xf32> to vector<4x8x8xf32>
    %92 = arith.mulf %87, %91 : vector<4x8x8xf32>
    %93 = arith.truncf %92 : vector<4x8x8xf32> to vector<4x8x8xbf16>
    "tpu.trace_start"() <{level = 10 : i32, message = "bqk,bkd->bqd"}> : () -> ()
    %cst_32 = arith.constant dense<0.000000e+00> : vector<4x8x16xf32>
    %94 = tpu.matmul %93, %76, %cst_32 {dimension_numbers = #tpu.dot_dimension_numbers<[2], [1], [1], [2], [0, 0, 0, 1, 1, 2], [0], [0]>} : vector<4x8x8xbf16>, vector<4x8x16xbf16>, vector<4x8x16xf32> -> vector<4x8x16xf32>
    "tpu.trace_stop"() : () -> ()
    %95 = vector.shape_cast %94 : vector<4x8x16xf32> to vector<32x16xf32>
    %96 = arith.truncf %95 : vector<32x16xf32> to vector<32x16xbf16>
    %97 = vector.extract_strided_slice %40 {offsets = [16, 0], sizes = [16, 32], strides = [1, 1]} : vector<32x32xbf16> to vector<16x32xbf16>
    %cst_33 = arith.constant dense<0.000000e+00> : vector<32x32xf32>
    %98 = tpu.matmul %96, %97, %cst_33 {dimension_numbers = #tpu.dot_dimension_numbers<[1], [0], [0], [1], [0, 0, 1, 1], [], []>} : vector<32x16xbf16>, vector<16x32xbf16>, vector<32x32xf32> -> vector<32x32xf32>
    %99 = arith.addf %70, %98 : vector<32x32xf32>
    %c0_34 = arith.constant 0 : index
    %c0_35 = arith.constant 0 : index
    %100 = vector.load %arg9[%c0_34, %c0_35] : memref<1x32xf32, #tpu.memory_space<vmem>>, vector<1x32xf32>
    %101 = vector.broadcast %100 : vector<1x32xf32> to vector<32x32xf32>
    %102 = arith.addf %99, %101 : vector<32x32xf32>
    %103 = arith.addf %32, %102 : vector<32x32xf32>
    %c0_36 = arith.constant 0 : index
    %c0_37 = arith.constant 0 : index
    %104 = vector.load %arg10[%c0_36, %c0_37] : memref<1x32xf32, #tpu.memory_space<vmem>>, vector<1x32xf32>
    %c0_38 = arith.constant 0 : index
    %c0_39 = arith.constant 0 : index
    %105 = vector.load %arg11[%c0_38, %c0_39] : memref<1x32xf32, #tpu.memory_space<vmem>>, vector<1x32xf32>
    %cst_40 = arith.constant dense<0.000000e+00> : vector<32xf32>
    %106 = vector.multi_reduction <add>, %103, %cst_40 [1] : vector<32x32xf32> to vector<32xf32>
    %107 = vector.shape_cast %106 : vector<32xf32> to vector<32x1xf32>
    %cst_41 = arith.constant 3.200000e+01 : f32
    %108 = vector.broadcast %cst_41 : f32 to vector<32x1xf32>
    %109 = arith.divf %107, %108 : vector<32x1xf32>
    %110 = vector.broadcast %109 : vector<32x1xf32> to vector<32x32xf32>
    %111 = arith.subf %103, %110 : vector<32x32xf32>
    %112 = arith.mulf %111, %111 : vector<32x32xf32>
    %cst_42 = arith.constant dense<0.000000e+00> : vector<32xf32>
    %113 = vector.multi_reduction <add>, %112, %cst_42 [1] : vector<32x32xf32> to vector<32xf32>
    %114 = vector.shape_cast %113 : vector<32xf32> to vector<32x1xf32>
    %cst_43 = arith.constant 3.200000e+01 : f32
    %115 = vector.broadcast %cst_43 : f32 to vector<32x1xf32>
    %116 = arith.divf %114, %115 : vector<32x1xf32>
    %117 = vector.broadcast %109 : vector<32x1xf32> to vector<32x32xf32>
    %118 = arith.subf %103, %117 : vector<32x32xf32>
    %cst_44 = arith.constant 9.99999996E-13 : f32
    %119 = vector.broadcast %cst_44 : f32 to vector<32x1xf32>
    %120 = arith.addf %116, %119 : vector<32x1xf32>
    %121 = math.rsqrt %120 : vector<32x1xf32>
    %122 = vector.broadcast %121 : vector<32x1xf32> to vector<32x32xf32>
    %123 = arith.mulf %118, %122 : vector<32x32xf32>
    %124 = vector.broadcast %104 : vector<1x32xf32> to vector<32x32xf32>
    %125 = arith.mulf %123, %124 : vector<32x32xf32>
    %126 = vector.broadcast %105 : vector<1x32xf32> to vector<32x32xf32>
    %127 = arith.addf %125, %126 : vector<32x32xf32>
    %128 = arith.truncf %127 : vector<32x32xf32> to vector<32x32xbf16>
    %c0_45 = arith.constant 0 : index
    %c0_46 = arith.constant 0 : index
    %129 = vector.load %arg12[%c0_45, %c0_46] : memref<32x64xbf16, #tpu.memory_space<vmem>>, vector<32x64xbf16>
    %cst_47 = arith.constant dense<0.000000e+00> : vector<32x64xf32>
    %130 = tpu.matmul %128, %129, %cst_47 {dimension_numbers = #tpu.dot_dimension_numbers<[1], [0], [0], [1], [0, 0, 1, 1], [], []>} : vector<32x32xbf16>, vector<32x64xbf16>, vector<32x64xf32> -> vector<32x64xf32>
    %c0_48 = arith.constant 0 : index
    %c0_49 = arith.constant 0 : index
    %131 = vector.load %arg13[%c0_48, %c0_49] : memref<1x64xf32, #tpu.memory_space<vmem>>, vector<1x64xf32>
    %132 = vector.broadcast %131 : vector<1x64xf32> to vector<32x64xf32>
    %133 = arith.addf %130, %132 : vector<32x64xf32>
    %cst_50 = arith.constant 5.000000e-01 : f32
    %134 = vector.broadcast %cst_50 : f32 to vector<32x64xf32>
    %135 = arith.mulf %134, %133 : vector<32x64xf32>
    %cst_51 = arith.constant 4.471500e-02 : f32
    %136 = vector.broadcast %cst_51 : f32 to vector<32x64xf32>
    %137 = arith.mulf %136, %133 : vector<32x64xf32>
    %138 = arith.mulf %137, %133 : vector<32x64xf32>
    %139 = arith.mulf %138, %133 : vector<32x64xf32>
    %140 = arith.addf %133, %139 : vector<32x64xf32>
    %cst_52 = arith.constant 0.797884583 : f32
    %141 = vector.broadcast %cst_52 : f32 to vector<32x64xf32>
    %142 = arith.mulf %141, %140 : vector<32x64xf32>
    %143 = math.tanh %142 : vector<32x64xf32>
    %cst_53 = arith.constant 1.000000e+00 : f32
    %144 = vector.broadcast %cst_53 : f32 to vector<32x64xf32>
    %145 = arith.addf %144, %143 : vector<32x64xf32>
    %146 = arith.mulf %135, %145 : vector<32x64xf32>
    %147 = arith.truncf %146 : vector<32x64xf32> to vector<32x64xbf16>
    %c0_54 = arith.constant 0 : index
    %c0_55 = arith.constant 0 : index
    %148 = vector.load %arg14[%c0_54, %c0_55] : memref<64x32xbf16, #tpu.memory_space<vmem>>, vector<64x32xbf16>
    %cst_56 = arith.constant dense<0.000000e+00> : vector<32x32xf32>
    %149 = tpu.matmul %147, %148, %cst_56 {dimension_numbers = #tpu.dot_dimension_numbers<[1], [0], [0], [1], [0, 0, 1, 1], [], []>} : vector<32x64xbf16>, vector<64x32xbf16>, vector<32x32xf32> -> vector<32x32xf32>
    %c0_57 = arith.constant 0 : index
    %c0_58 = arith.constant 0 : index
    %150 = vector.load %arg15[%c0_57, %c0_58] : memref<1x32xf32, #tpu.memory_space<vmem>>, vector<1x32xf32>
    %151 = vector.broadcast %150 : vector<1x32xf32> to vector<32x32xf32>
    %152 = arith.addf %149, %151 : vector<32x32xf32>
    %153 = arith.addf %127, %152 : vector<32x32xf32>
    %c0_59 = arith.constant 0 : index
    %c0_60 = arith.constant 0 : index
    %154 = vector.load %arg16[%c0_59, %c0_60] : memref<1x32xf32, #tpu.memory_space<vmem>>, vector<1x32xf32>
    %c0_61 = arith.constant 0 : index
    %c0_62 = arith.constant 0 : index
    %155 = vector.load %arg17[%c0_61, %c0_62] : memref<1x32xf32, #tpu.memory_space<vmem>>, vector<1x32xf32>
    %cst_63 = arith.constant dense<0.000000e+00> : vector<32xf32>
    %156 = vector.multi_reduction <add>, %153, %cst_63 [1] : vector<32x32xf32> to vector<32xf32>
    %157 = vector.shape_cast %156 : vector<32xf32> to vector<32x1xf32>
    %cst_64 = arith.constant 3.200000e+01 : f32
    %158 = vector.broadcast %cst_64 : f32 to vector<32x1xf32>
    %159 = arith.divf %157, %158 : vector<32x1xf32>
    %160 = vector.broadcast %159 : vector<32x1xf32> to vector<32x32xf32>
    %161 = arith.subf %153, %160 : vector<32x32xf32>
    %162 = arith.mulf %161, %161 : vector<32x32xf32>
    %cst_65 = arith.constant dense<0.000000e+00> : vector<32xf32>
    %163 = vector.multi_reduction <add>, %162, %cst_65 [1] : vector<32x32xf32> to vector<32xf32>
    %164 = vector.shape_cast %163 : vector<32xf32> to vector<32x1xf32>
    %cst_66 = arith.constant 3.200000e+01 : f32
    %165 = vector.broadcast %cst_66 : f32 to vector<32x1xf32>
    %166 = arith.divf %164, %165 : vector<32x1xf32>
    %167 = vector.broadcast %159 : vector<32x1xf32> to vector<32x32xf32>
    %168 = arith.subf %153, %167 : vector<32x32xf32>
    %cst_67 = arith.constant 9.99999996E-13 : f32
    %169 = vector.broadcast %cst_67 : f32 to vector<32x1xf32>
    %170 = arith.addf %166, %169 : vector<32x1xf32>
    %171 = math.rsqrt %170 : vector<32x1xf32>
    %172 = vector.broadcast %171 : vector<32x1xf32> to vector<32x32xf32>
    %173 = arith.mulf %168, %172 : vector<32x32xf32>
    %174 = vector.broadcast %154 : vector<1x32xf32> to vector<32x32xf32>
    %175 = arith.mulf %173, %174 : vector<32x32xf32>
    %176 = vector.broadcast %155 : vector<1x32xf32> to vector<32x32xf32>
    %177 = arith.addf %175, %176 : vector<32x32xf32>
    %178 = vector.shape_cast %177 : vector<32x32xf32> to vector<4x8x32xf32>
    %179 = vector.shape_cast %178 : vector<4x8x32xf32> to vector<32x32xf32>
    %180 = arith.truncf %179 : vector<32x32xf32> to vector<32x32xbf16>
    %c0_68 = arith.constant 0 : index
    %c0_69 = arith.constant 0 : index
    %181 = vector.load %arg18[%c0_68, %c0_69] : memref<32x96xbf16, #tpu.memory_space<vmem>>, vector<32x96xbf16>
    %cst_70 = arith.constant dense<0.000000e+00> : vector<32x96xf32>
    %182 = tpu.matmul %180, %181, %cst_70 {dimension_numbers = #tpu.dot_dimension_numbers<[1], [0], [0], [1], [0, 0, 1, 1], [], []>} : vector<32x32xbf16>, vector<32x96xbf16>, vector<32x96xf32> -> vector<32x96xf32>
    %c0_71 = arith.constant 0 : index
    %c0_72 = arith.constant 0 : index
    %183 = vector.load %arg19[%c0_71, %c0_72] : memref<1x96xf32, #tpu.memory_space<vmem>>, vector<1x96xf32>
    %184 = vector.broadcast %183 : vector<1x96xf32> to vector<32x96xf32>
    %185 = arith.addf %182, %184 : vector<32x96xf32>
    %186 = vector.shape_cast %185 : vector<32x96xf32> to vector<4x8x96xf32>
    %c0_73 = arith.constant 0 : index
    %c0_74 = arith.constant 0 : index
    %187 = vector.load %arg20[%c0_73, %c0_74] : memref<32x32xbf16, #tpu.memory_space<vmem>>, vector<32x32xbf16>
    %cst_75 = arith.constant 0.000000e+00 : f32
    %188 = vector.broadcast %cst_75 : f32 to vector<32x32xf32>
    %189 = vector.extract_strided_slice %186 {offsets = [0, 0, 0], sizes = [4, 8, 16], strides = [1, 1, 1]} : vector<4x8x96xf32> to vector<4x8x16xf32>
    %190 = arith.truncf %189 : vector<4x8x16xf32> to vector<4x8x16xbf16>
    %191 = vector.extract_strided_slice %186 {offsets = [0, 0, 32], sizes = [4, 8, 16], strides = [1, 1, 1]} : vector<4x8x96xf32> to vector<4x8x16xf32>
    %192 = arith.truncf %191 : vector<4x8x16xf32> to vector<4x8x16xbf16>
    %193 = vector.extract_strided_slice %186 {offsets = [0, 0, 64], sizes = [4, 8, 16], strides = [1, 1, 1]} : vector<4x8x96xf32> to vector<4x8x16xf32>
    %194 = arith.truncf %193 : vector<4x8x16xf32> to vector<4x8x16xbf16>
    "tpu.trace_start"() <{level = 10 : i32, message = "bqd,bkd->bqk"}> : () -> ()
    %cst_76 = arith.constant dense<0.000000e+00> : vector<4x8x8xf32>
    %195 = tpu.matmul %190, %192, %cst_76 {dimension_numbers = #tpu.dot_dimension_numbers<[2], [2], [1], [1], [0, 0, 0, 1, 1, 1], [0], [0]>} : vector<4x8x16xbf16>, vector<4x8x16xbf16>, vector<4x8x8xf32> -> vector<4x8x8xf32>
    "tpu.trace_stop"() : () -> ()
    %cst_77 = arith.constant 2.500000e-01 : f32
    %196 = vector.broadcast %cst_77 : f32 to vector<4x8x8xf32>
    %197 = arith.mulf %195, %196 : vector<4x8x8xf32>
    %198 = vector.shape_cast %4 : vector<4x8xf32> to vector<4x1x8xf32>
    %199 = vector.broadcast %198 : vector<4x1x8xf32> to vector<4x8x8xf32>
    %200 = arith.addf %197, %199 : vector<4x8x8xf32>
    %cst_78 = arith.constant dense<0xFF800000> : vector<4x8xf32>
    %201 = vector.multi_reduction <maximumf>, %200, %cst_78 [2] : vector<4x8x8xf32> to vector<4x8xf32>
    %202 = vector.shape_cast %201 : vector<4x8xf32> to vector<4x8x1xf32>
    %203 = vector.broadcast %202 : vector<4x8x1xf32> to vector<4x8x8xf32>
    %204 = arith.subf %200, %203 : vector<4x8x8xf32>
    %205 = math.exp %204 : vector<4x8x8xf32>
    %cst_79 = arith.constant dense<0.000000e+00> : vector<4x8xf32>
    %206 = vector.multi_reduction <add>, %205, %cst_79 [2] : vector<4x8x8xf32> to vector<4x8xf32>
    %207 = vector.shape_cast %206 : vector<4x8xf32> to vector<4x8x1xf32>
    %208 = tpu.reciprocal %207 {approx = true} : vector<4x8x1xf32> -> vector<4x8x1xf32>
    %209 = vector.broadcast %208 : vector<4x8x1xf32> to vector<4x8x8xf32>
    %210 = arith.mulf %205, %209 : vector<4x8x8xf32>
    %211 = arith.truncf %210 : vector<4x8x8xf32> to vector<4x8x8xbf16>
    "tpu.trace_start"() <{level = 10 : i32, message = "bqk,bkd->bqd"}> : () -> ()
    %cst_80 = arith.constant dense<0.000000e+00> : vector<4x8x16xf32>
    %212 = tpu.matmul %211, %194, %cst_80 {dimension_numbers = #tpu.dot_dimension_numbers<[2], [1], [1], [2], [0, 0, 0, 1, 1, 2], [0], [0]>} : vector<4x8x8xbf16>, vector<4x8x16xbf16>, vector<4x8x16xf32> -> vector<4x8x16xf32>
    "tpu.trace_stop"() : () -> ()
    %213 = vector.shape_cast %212 : vector<4x8x16xf32> to vector<32x16xf32>
    %214 = arith.truncf %213 : vector<32x16xf32> to vector<32x16xbf16>
    %215 = vector.extract_strided_slice %187 {offsets = [0, 0], sizes = [16, 32], strides = [1, 1]} : vector<32x32xbf16> to vector<16x32xbf16>
    %cst_81 = arith.constant dense<0.000000e+00> : vector<32x32xf32>
    %216 = tpu.matmul %214, %215, %cst_81 {dimension_numbers = #tpu.dot_dimension_numbers<[1], [0], [0], [1], [0, 0, 1, 1], [], []>} : vector<32x16xbf16>, vector<16x32xbf16>, vector<32x32xf32> -> vector<32x32xf32>
    %217 = arith.addf %188, %216 : vector<32x32xf32>
    %218 = vector.extract_strided_slice %186 {offsets = [0, 0, 16], sizes = [4, 8, 16], strides = [1, 1, 1]} : vector<4x8x96xf32> to vector<4x8x16xf32>
    %219 = arith.truncf %218 : vector<4x8x16xf32> to vector<4x8x16xbf16>
    %220 = vector.extract_strided_slice %186 {offsets = [0, 0, 48], sizes = [4, 8, 16], strides = [1, 1, 1]} : vector<4x8x96xf32> to vector<4x8x16xf32>
    %221 = arith.truncf %220 : vector<4x8x16xf32> to vector<4x8x16xbf16>
    %222 = vector.extract_strided_slice %186 {offsets = [0, 0, 80], sizes = [4, 8, 16], strides = [1, 1, 1]} : vector<4x8x96xf32> to vector<4x8x16xf32>
    %223 = arith.truncf %222 : vector<4x8x16xf32> to vector<4x8x16xbf16>
    "tpu.trace_start"() <{level = 10 : i32, message = "bqd,bkd->bqk"}> : () -> ()
    %cst_82 = arith.constant dense<0.000000e+00> : vector<4x8x8xf32>
    %224 = tpu.matmul %219, %221, %cst_82 {dimension_numbers = #tpu.dot_dimension_numbers<[2], [2], [1], [1], [0, 0, 0, 1, 1, 1], [0], [0]>} : vector<4x8x16xbf16>, vector<4x8x16xbf16>, vector<4x8x8xf32> -> vector<4x8x8xf32>
    "tpu.trace_stop"() : () -> ()
    %cst_83 = arith.constant 2.500000e-01 : f32
    %225 = vector.broadcast %cst_83 : f32 to vector<4x8x8xf32>
    %226 = arith.mulf %224, %225 : vector<4x8x8xf32>
    %227 = vector.shape_cast %4 : vector<4x8xf32> to vector<4x1x8xf32>
    %228 = vector.broadcast %227 : vector<4x1x8xf32> to vector<4x8x8xf32>
    %229 = arith.addf %226, %228 : vector<4x8x8xf32>
    %cst_84 = arith.constant dense<0xFF800000> : vector<4x8xf32>
    %230 = vector.multi_reduction <maximumf>, %229, %cst_84 [2] : vector<4x8x8xf32> to vector<4x8xf32>
    %231 = vector.shape_cast %230 : vector<4x8xf32> to vector<4x8x1xf32>
    %232 = vector.broadcast %231 : vector<4x8x1xf32> to vector<4x8x8xf32>
    %233 = arith.subf %229, %232 : vector<4x8x8xf32>
    %234 = math.exp %233 : vector<4x8x8xf32>
    %cst_85 = arith.constant dense<0.000000e+00> : vector<4x8xf32>
    %235 = vector.multi_reduction <add>, %234, %cst_85 [2] : vector<4x8x8xf32> to vector<4x8xf32>
    %236 = vector.shape_cast %235 : vector<4x8xf32> to vector<4x8x1xf32>
    %237 = tpu.reciprocal %236 {approx = true} : vector<4x8x1xf32> -> vector<4x8x1xf32>
    %238 = vector.broadcast %237 : vector<4x8x1xf32> to vector<4x8x8xf32>
    %239 = arith.mulf %234, %238 : vector<4x8x8xf32>
    %240 = arith.truncf %239 : vector<4x8x8xf32> to vector<4x8x8xbf16>
    "tpu.trace_start"() <{level = 10 : i32, message = "bqk,bkd->bqd"}> : () -> ()
    %cst_86 = arith.constant dense<0.000000e+00> : vector<4x8x16xf32>
    %241 = tpu.matmul %240, %223, %cst_86 {dimension_numbers = #tpu.dot_dimension_numbers<[2], [1], [1], [2], [0, 0, 0, 1, 1, 2], [0], [0]>} : vector<4x8x8xbf16>, vector<4x8x16xbf16>, vector<4x8x16xf32> -> vector<4x8x16xf32>
    "tpu.trace_stop"() : () -> ()
    %242 = vector.shape_cast %241 : vector<4x8x16xf32> to vector<32x16xf32>
    %243 = arith.truncf %242 : vector<32x16xf32> to vector<32x16xbf16>
    %244 = vector.extract_strided_slice %187 {offsets = [16, 0], sizes = [16, 32], strides = [1, 1]} : vector<32x32xbf16> to vector<16x32xbf16>
    %cst_87 = arith.constant dense<0.000000e+00> : vector<32x32xf32>
    %245 = tpu.matmul %243, %244, %cst_87 {dimension_numbers = #tpu.dot_dimension_numbers<[1], [0], [0], [1], [0, 0, 1, 1], [], []>} : vector<32x16xbf16>, vector<16x32xbf16>, vector<32x32xf32> -> vector<32x32xf32>
    %246 = arith.addf %217, %245 : vector<32x32xf32>
    %c0_88 = arith.constant 0 : index
    %c0_89 = arith.constant 0 : index
    %247 = vector.load %arg21[%c0_88, %c0_89] : memref<1x32xf32, #tpu.memory_space<vmem>>, vector<1x32xf32>
    %248 = vector.broadcast %247 : vector<1x32xf32> to vector<32x32xf32>
    %249 = arith.addf %246, %248 : vector<32x32xf32>
    %250 = arith.addf %179, %249 : vector<32x32xf32>
    %c0_90 = arith.constant 0 : index
    %c0_91 = arith.constant 0 : index
    %251 = vector.load %arg22[%c0_90, %c0_91] : memref<1x32xf32, #tpu.memory_space<vmem>>, vector<1x32xf32>
    %c0_92 = arith.constant 0 : index
    %c0_93 = arith.constant 0 : index
    %252 = vector.load %arg23[%c0_92, %c0_93] : memref<1x32xf32, #tpu.memory_space<vmem>>, vector<1x32xf32>
    %cst_94 = arith.constant dense<0.000000e+00> : vector<32xf32>
    %253 = vector.multi_reduction <add>, %250, %cst_94 [1] : vector<32x32xf32> to vector<32xf32>
    %254 = vector.shape_cast %253 : vector<32xf32> to vector<32x1xf32>
    %cst_95 = arith.constant 3.200000e+01 : f32
    %255 = vector.broadcast %cst_95 : f32 to vector<32x1xf32>
    %256 = arith.divf %254, %255 : vector<32x1xf32>
    %257 = vector.broadcast %256 : vector<32x1xf32> to vector<32x32xf32>
    %258 = arith.subf %250, %257 : vector<32x32xf32>
    %259 = arith.mulf %258, %258 : vector<32x32xf32>
    %cst_96 = arith.constant dense<0.000000e+00> : vector<32xf32>
    %260 = vector.multi_reduction <add>, %259, %cst_96 [1] : vector<32x32xf32> to vector<32xf32>
    %261 = vector.shape_cast %260 : vector<32xf32> to vector<32x1xf32>
    %cst_97 = arith.constant 3.200000e+01 : f32
    %262 = vector.broadcast %cst_97 : f32 to vector<32x1xf32>
    %263 = arith.divf %261, %262 : vector<32x1xf32>
    %264 = vector.broadcast %256 : vector<32x1xf32> to vector<32x32xf32>
    %265 = arith.subf %250, %264 : vector<32x32xf32>
    %cst_98 = arith.constant 9.99999996E-13 : f32
    %266 = vector.broadcast %cst_98 : f32 to vector<32x1xf32>
    %267 = arith.addf %263, %266 : vector<32x1xf32>
    %268 = math.rsqrt %267 : vector<32x1xf32>
    %269 = vector.broadcast %268 : vector<32x1xf32> to vector<32x32xf32>
    %270 = arith.mulf %265, %269 : vector<32x32xf32>
    %271 = vector.broadcast %251 : vector<1x32xf32> to vector<32x32xf32>
    %272 = arith.mulf %270, %271 : vector<32x32xf32>
    %273 = vector.broadcast %252 : vector<1x32xf32> to vector<32x32xf32>
    %274 = arith.addf %272, %273 : vector<32x32xf32>
    %275 = arith.truncf %274 : vector<32x32xf32> to vector<32x32xbf16>
    %c0_99 = arith.constant 0 : index
    %c0_100 = arith.constant 0 : index
    %276 = vector.load %arg24[%c0_99, %c0_100] : memref<32x64xbf16, #tpu.memory_space<vmem>>, vector<32x64xbf16>
    %cst_101 = arith.constant dense<0.000000e+00> : vector<32x64xf32>
    %277 = tpu.matmul %275, %276, %cst_101 {dimension_numbers = #tpu.dot_dimension_numbers<[1], [0], [0], [1], [0, 0, 1, 1], [], []>} : vector<32x32xbf16>, vector<32x64xbf16>, vector<32x64xf32> -> vector<32x64xf32>
    %c0_102 = arith.constant 0 : index
    %c0_103 = arith.constant 0 : index
    %278 = vector.load %arg25[%c0_102, %c0_103] : memref<1x64xf32, #tpu.memory_space<vmem>>, vector<1x64xf32>
    %279 = vector.broadcast %278 : vector<1x64xf32> to vector<32x64xf32>
    %280 = arith.addf %277, %279 : vector<32x64xf32>
    %cst_104 = arith.constant 5.000000e-01 : f32
    %281 = vector.broadcast %cst_104 : f32 to vector<32x64xf32>
    %282 = arith.mulf %281, %280 : vector<32x64xf32>
    %cst_105 = arith.constant 4.471500e-02 : f32
    %283 = vector.broadcast %cst_105 : f32 to vector<32x64xf32>
    %284 = arith.mulf %283, %280 : vector<32x64xf32>
    %285 = arith.mulf %284, %280 : vector<32x64xf32>
    %286 = arith.mulf %285, %280 : vector<32x64xf32>
    %287 = arith.addf %280, %286 : vector<32x64xf32>
    %cst_106 = arith.constant 0.797884583 : f32
    %288 = vector.broadcast %cst_106 : f32 to vector<32x64xf32>
    %289 = arith.mulf %288, %287 : vector<32x64xf32>
    %290 = math.tanh %289 : vector<32x64xf32>
    %cst_107 = arith.constant 1.000000e+00 : f32
    %291 = vector.broadcast %cst_107 : f32 to vector<32x64xf32>
    %292 = arith.addf %291, %290 : vector<32x64xf32>
    %293 = arith.mulf %282, %292 : vector<32x64xf32>
    %294 = arith.truncf %293 : vector<32x64xf32> to vector<32x64xbf16>
    %c0_108 = arith.constant 0 : index
    %c0_109 = arith.constant 0 : index
    %295 = vector.load %arg26[%c0_108, %c0_109] : memref<64x32xbf16, #tpu.memory_space<vmem>>, vector<64x32xbf16>
    %cst_110 = arith.constant dense<0.000000e+00> : vector<32x32xf32>
    %296 = tpu.matmul %294, %295, %cst_110 {dimension_numbers = #tpu.dot_dimension_numbers<[1], [0], [0], [1], [0, 0, 1, 1], [], []>} : vector<32x64xbf16>, vector<64x32xbf16>, vector<32x32xf32> -> vector<32x32xf32>
    %c0_111 = arith.constant 0 : index
    %c0_112 = arith.constant 0 : index
    %297 = vector.load %arg27[%c0_111, %c0_112] : memref<1x32xf32, #tpu.memory_space<vmem>>, vector<1x32xf32>
    %298 = vector.broadcast %297 : vector<1x32xf32> to vector<32x32xf32>
    %299 = arith.addf %296, %298 : vector<32x32xf32>
    %300 = arith.addf %274, %299 : vector<32x32xf32>
    %c0_113 = arith.constant 0 : index
    %c0_114 = arith.constant 0 : index
    %301 = vector.load %arg28[%c0_113, %c0_114] : memref<1x32xf32, #tpu.memory_space<vmem>>, vector<1x32xf32>
    %c0_115 = arith.constant 0 : index
    %c0_116 = arith.constant 0 : index
    %302 = vector.load %arg29[%c0_115, %c0_116] : memref<1x32xf32, #tpu.memory_space<vmem>>, vector<1x32xf32>
    %cst_117 = arith.constant dense<0.000000e+00> : vector<32xf32>
    %303 = vector.multi_reduction <add>, %300, %cst_117 [1] : vector<32x32xf32> to vector<32xf32>
    %304 = vector.shape_cast %303 : vector<32xf32> to vector<32x1xf32>
    %cst_118 = arith.constant 3.200000e+01 : f32
    %305 = vector.broadcast %cst_118 : f32 to vector<32x1xf32>
    %306 = arith.divf %304, %305 : vector<32x1xf32>
    %307 = vector.broadcast %306 : vector<32x1xf32> to vector<32x32xf32>
    %308 = arith.subf %300, %307 : vector<32x32xf32>
    %309 = arith.mulf %308, %308 : vector<32x32xf32>
    %cst_119 = arith.constant dense<0.000000e+00> : vector<32xf32>
    %310 = vector.multi_reduction <add>, %309, %cst_119 [1] : vector<32x32xf32> to vector<32xf32>
    %311 = vector.shape_cast %310 : vector<32xf32> to vector<32x1xf32>
    %cst_120 = arith.constant 3.200000e+01 : f32
    %312 = vector.broadcast %cst_120 : f32 to vector<32x1xf32>
    %313 = arith.divf %311, %312 : vector<32x1xf32>
    %314 = vector.broadcast %306 : vector<32x1xf32> to vector<32x32xf32>
    %315 = arith.subf %300, %314 : vector<32x32xf32>
    %cst_121 = arith.constant 9.99999996E-13 : f32
    %316 = vector.broadcast %cst_121 : f32 to vector<32x1xf32>
    %317 = arith.addf %313, %316 : vector<32x1xf32>
    %318 = math.rsqrt %317 : vector<32x1xf32>
    %319 = vector.broadcast %318 : vector<32x1xf32> to vector<32x32xf32>
    %320 = arith.mulf %315, %319 : vector<32x32xf32>
    %321 = vector.broadcast %301 : vector<1x32xf32> to vector<32x32xf32>
    %322 = arith.mulf %320, %321 : vector<32x32xf32>
    %323 = vector.broadcast %302 : vector<1x32xf32> to vector<32x32xf32>
    %324 = arith.addf %322, %323 : vector<32x32xf32>
    %325 = vector.shape_cast %324 : vector<32x32xf32> to vector<4x8x32xf32>
    %326 = vector.shape_cast %0 : vector<4x8xf32> to vector<4x8x1xf32>
    %327 = vector.broadcast %326 : vector<4x8x1xf32> to vector<4x8x32xf32>
    %328 = arith.mulf %325, %327 : vector<4x8x32xf32>
    %cst_122 = arith.constant dense<0.000000e+00> : vector<4x32xf32>
    %329 = vector.multi_reduction <add>, %328, %cst_122 [1] : vector<4x8x32xf32> to vector<4x32xf32>
    %cst_123 = arith.constant dense<0.000000e+00> : vector<4xf32>
    %330 = vector.multi_reduction <add>, %0, %cst_123 [1] : vector<4x8xf32> to vector<4xf32>
    %331 = vector.shape_cast %330 : vector<4xf32> to vector<4x1xf32>
    %cst_124 = arith.constant 9.99999971E-10 : f32
    %332 = vector.broadcast %cst_124 : f32 to vector<4x1xf32>
    %333 = arith.maximumf %331, %332 : vector<4x1xf32>
    %334 = tpu.reciprocal %333 {approx = true} : vector<4x1xf32> -> vector<4x1xf32>
    %335 = vector.broadcast %334 : vector<4x1xf32> to vector<4x32xf32>
    %336 = arith.mulf %329, %335 : vector<4x32xf32>
    %337 = arith.mulf %336, %336 : vector<4x32xf32>
    %cst_125 = arith.constant dense<0.000000e+00> : vector<4xf32>
    %338 = vector.multi_reduction <add>, %337, %cst_125 [1] : vector<4x32xf32> to vector<4xf32>
    %339 = vector.shape_cast %338 : vector<4xf32> to vector<4x1xf32>
    %cst_126 = arith.constant 1.000000e-24 : f32
    %340 = vector.broadcast %cst_126 : f32 to vector<4x1xf32>
    %341 = arith.maximumf %339, %340 : vector<4x1xf32>
    %342 = math.rsqrt %341 : vector<4x1xf32>
    %343 = vector.broadcast %342 : vector<4x1xf32> to vector<4x32xf32>
    %344 = arith.mulf %336, %343 : vector<4x32xf32>
    %345 = vector.shape_cast %344 : vector<4x32xf32> to vector<4x1x32xf32>
    %346 = vector.shape_cast %344 : vector<4x32xf32> to vector<1x4x32xf32>
    %347 = vector.broadcast %345 : vector<4x1x32xf32> to vector<4x4x32xf32>
    %348 = vector.broadcast %346 : vector<1x4x32xf32> to vector<4x4x32xf32>
    %349 = arith.mulf %347, %348 : vector<4x4x32xf32>
    %cst_127 = arith.constant dense<0.000000e+00> : vector<4x4xf32>
    %350 = vector.multi_reduction <add>, %349, %cst_127 [2] : vector<4x4x32xf32> to vector<4x4xf32>
    %cst_128 = arith.constant 14.2857141 : f32
    %351 = vector.broadcast %cst_128 : f32 to vector<4x4xf32>
    %352 = arith.mulf %350, %351 : vector<4x4xf32>
    %cst_129 = arith.constant dense<0xFF800000> : vector<4xf32>
    %353 = vector.multi_reduction <maximumf>, %352, %cst_129 [1] : vector<4x4xf32> to vector<4xf32>
    %354 = vector.shape_cast %353 : vector<4xf32> to vector<4x1xf32>
    %355 = vector.broadcast %354 : vector<4x1xf32> to vector<4x4xf32>
    %356 = arith.subf %352, %355 : vector<4x4xf32>
    %c0_130 = arith.constant 0 : index
    %c0_131 = arith.constant 0 : index
    %357 = vector.load %arg2[%c0_130, %c0_131] : memref<4x1xf32, #tpu.memory_space<vmem>>, vector<4x1xf32>
    %c0_132 = arith.constant 0 : index
    %c0_133 = arith.constant 0 : index
    %358 = vector.load %arg3[%c0_132, %c0_133] : memref<1x4xf32, #tpu.memory_space<vmem>>, vector<1x4xf32>
    %359 = vector.broadcast %357 : vector<4x1xf32> to vector<4x4xf32>
    %360 = vector.broadcast %358 : vector<1x4xf32> to vector<4x4xf32>
    %361 = arith.cmpf oeq, %359, %360 : vector<4x4xf32>
    %362 = arith.extui %361 : vector<4x4xi1> to vector<4x4xi32>
    %363 = arith.sitofp %362 : vector<4x4xi32> to vector<4x4xf32>
    %364 = tpu.iota {dimensions = array<i32: 0>} : vector<4x4xi32>
    %365 = tpu.iota {dimensions = array<i32: 1>} : vector<4x4xi32>
    %366 = arith.cmpi ne, %364, %365 : vector<4x4xi32>
    %367 = arith.extui %366 : vector<4x4xi1> to vector<4x4xi32>
    %368 = arith.sitofp %367 : vector<4x4xi32> to vector<4x4xf32>
    %369 = arith.mulf %363, %368 : vector<4x4xf32>
    %370 = math.exp %356 : vector<4x4xf32>
    %371 = arith.mulf %370, %368 : vector<4x4xf32>
    %cst_134 = arith.constant dense<0.000000e+00> : vector<4xf32>
    %372 = vector.multi_reduction <add>, %371, %cst_134 [1] : vector<4x4xf32> to vector<4xf32>
    %373 = vector.shape_cast %372 : vector<4xf32> to vector<4x1xf32>
    %374 = math.log %373 : vector<4x1xf32>
    %375 = vector.broadcast %374 : vector<4x1xf32> to vector<4x4xf32>
    %376 = arith.subf %356, %375 : vector<4x4xf32>
    %377 = arith.mulf %369, %376 : vector<4x4xf32>
    %cst_135 = arith.constant dense<0.000000e+00> : vector<4xf32>
    %378 = vector.multi_reduction <add>, %377, %cst_135 [1] : vector<4x4xf32> to vector<4xf32>
    %379 = vector.shape_cast %378 : vector<4xf32> to vector<4x1xf32>
    %cst_136 = arith.constant dense<0.000000e+00> : vector<4xf32>
    %380 = vector.multi_reduction <add>, %369, %cst_136 [1] : vector<4x4xf32> to vector<4xf32>
    %381 = vector.shape_cast %380 : vector<4xf32> to vector<4x1xf32>
    %382 = arith.divf %379, %381 : vector<4x1xf32>
    %cst_137 = arith.constant -1.000000e+00 : f32
    %383 = vector.broadcast %cst_137 : f32 to vector<4x1xf32>
    %384 = arith.mulf %383, %382 : vector<4x1xf32>
    %385 = vector.shape_cast %384 : vector<4x1xf32> to vector<1x4x1xf32>
    %cst_138 = arith.constant dense<0.000000e+00> : vector<1xf32>
    %386 = vector.multi_reduction <add>, %385, %cst_138 [1, 2] : vector<1x4x1xf32> to vector<1xf32>
    %387 = vector.shape_cast %386 : vector<1xf32> to vector<1x1x1xf32>
    %388 = vector.extract %387[0, 0, 0] : f32 from vector<1x1x1xf32>
    %389 = vector.broadcast %388 : f32 to vector<1x1xf32>
    %cst_139 = arith.constant 4.000000e+00 : f32
    %390 = vector.broadcast %cst_139 : f32 to vector<1x1xf32>
    %391 = arith.divf %389, %390 : vector<1x1xf32>
    %c0_140 = arith.constant 0 : index
    %c0_141 = arith.constant 0 : index
    %392 = vector.load %arg30[%c0_140, %c0_141] : memref<1x1xf32, #tpu.memory_space<vmem>>, vector<1x1xf32>
    tpu.vector_store %arg30[%c0_140, %c0_141], %391 {strides = array<i32>} : memref<1x1xf32, #tpu.memory_space<vmem>>, vector<1x1xf32>,
    return
  }
}

</mosaic_0001>

<bundles_post_ra>
// kernel: forward.1
= control target key start
LH: loop header
LB: loop body
LE: loop exit
PB: predicated region body
PF: predicated region fallthrough
CT: control target
= control target key end

     0   :  { %s4387_s6 = smov 1   ;;  %s4388_s10 = smov 2   ;;  %s5211_s0 = inlined_call_operand.smem [shape: u32[31], index: -1, kind: input, shape index: {}] }
   0x1   :  { %s4435_s5 = sld [smem:[%s5211_s0]]   ;;  %s4389_s14 = smov 3  }
   0x2   :  { %s4440_s9 = sld [smem:[%s5211_s0 + %s4387_s6]]   ;;  %s4390_s18 = smov 4  }
   0x3   :  { %s4445_s13 = sld [smem:[%s5211_s0 + %s4388_s10]]   ;;  %s4391_s22 = smov 5  }
   0x4   :  { %s4450_s17 = sld [smem:[%s5211_s0 + %s4389_s14]]   ;;  %s4392_s26 = smov 6  }
   0x5   :  { %s4455_s21 = sld [smem:[%s5211_s0 + %s4390_s18]]   ;;  %s4393_s30 = smov 7  }
   0x6   :  { %s4460_s25 = sld [smem:[%s5211_s0 + %s4391_s22]]   ;;  %s4394_s4 = smov 8  }
   0x7   :  { %s4465_s29 = sld [smem:[%s5211_s0 + %s4392_s26]]   ;;  %s4395_s10 = smov 9  }
   0x8   :  { %s4470_s3 = sld [smem:[%s5211_s0 + %s4393_s30]]   ;;  %s4396_s15 = smov 10  }
   0x9   :  { %5216 = sst [smem:[#allocation5_spill]] %s4445_s13  ;;  %s4397_s20 = smov 11  }
   0xa   :  { %5217 = sst [smem:[#allocation6_spill]] %s4450_s17  ;;  %s4398_s26 = smov 12  }
   0xb   :  { %s4475_s8 = sld [smem:[%s5211_s0 + %s4394_s4]]   ;;  %s4399_s1 = smov 13  }
   0xc   :  { %s4480_s14 = sld [smem:[%s5211_s0 + %s4395_s10]]   ;;  %s4400_s7 = smov 14  }
   0xd   :  { %s4485_s19 = sld [smem:[%s5211_s0 + %s4396_s15]]   ;;  %s4401_s15 = smov 15  }
   0xe   :  { %s4490_s24 = sld [smem:[%s5211_s0 + %s4397_s20]]   ;;  %s4402_s22 = smov 16  }
   0xf   :  { %s4495_s30 = sld [smem:[%s5211_s0 + %s4398_s26]]   ;;  %s4403_s28 = smov 17  }
  0x10   :  { %s4500_s6 = sld [smem:[%s5211_s0 + %s4399_s1]]  }
  0x11   :  { %s4505_s12 = sld [smem:[%s5211_s0 + %s4400_s7]]   ;;  %s4404_s7 = smov 18  }
  0x12   :  { %s4510_s20 = sld [smem:[%s5211_s0 + %s4401_s15]]   ;;  %s4405_s15 = smov 19  }
  0x13   :  { %s4515_s27 = sld [smem:[%s5211_s0 + %s4402_s22]]   ;;  %s4406_s22 = smov 20  }
  0x14   :  { %s4520_s4 = sld [smem:[%s5211_s0 + %s4403_s28]]   ;;  %s4407_s28 = smov 21  }
  0x15   :  { %s4525_s17 = sld [smem:[%s5211_s0 + %s4404_s7]]   ;;  %s4408_s7 = smov 22  }
  0x16   :  { %s4530_s13 = sld [smem:[%s5211_s0 + %s4405_s15]]   ;;  %s4409_s15 = smov 23  }
  0x19   :  { %5218 = sst [smem:[#allocation7_spill]] %s4515_s27 }
  0x1a   :  { %5219 = sst [smem:[#allocation8_spill]] %s4520_s4 }
  0x1b   :  { %5220 = sst [smem:[#allocation9_spill]] %s4525_s17 }
  0x1c   :  { %5221 = sst [smem:[#allocation10_spill]] %s4530_s13 }
  0x1d   :  { %s4535_s27 = sld [smem:[%s5211_s0 + %s4406_s22]]   ;;  %s4410_s22 = smov 24  }
  0x1e   :  { %s4540_s4 = sld [smem:[%s5211_s0 + %s4407_s28]]   ;;  %s4411_s28 = smov 25  }
  0x1f   :  { %s4545_s17 = sld [smem:[%s5211_s0 + %s4408_s7]]   ;;  %s4412_s7 = smov 26  }
  0x20   :  { %s4550_s13 = sld [smem:[%s5211_s0 + %s4409_s15]]   ;;  %s4413_s15 = smov 27  }
  0x23   :  { %5222 = sst [smem:[#allocation11_spill]] %s4535_s27 }
  0x24   :  { %5223 = sst [smem:[#allocation12_spill]] %s4540_s4 }
  0x25   :  { %5224 = sst [smem:[#allocation13_spill]] %s4545_s17 }
  0x26   :  { %5225 = sst [smem:[#allocation14_spill]] %s4550_s13 }
  0x27   :  { %s4555_s27 = sld [smem:[%s5211_s0 + %s4410_s22]]   ;;  %s4414_s22 = smov 28  }
  0x28   :  { %s4560_s4 = sld [smem:[%s5211_s0 + %s4411_s28]]   ;;  %s4415_s28 = smov 29  }
  0x29   :  { %s4565_s17 = sld [smem:[%s5211_s0 + %s4412_s7]]   ;;  %s4416_s7 = smov 30  }
  0x2a   :  { %s4570_s13 = sld [smem:[%s5211_s0 + %s4413_s15]]  }
  0x2d   :  { %5226 = sst [smem:[#allocation15_spill]] %s4555_s27 }
  0x2e   :  { %5227 = sst [smem:[#allocation16_spill]] %s4560_s4 }
  0x2f   :  { %5228 = sst [smem:[#allocation17_spill]] %s4565_s17 }
  0x30   :  { %s4575_s27 = sld [smem:[%s5211_s0 + %s4414_s22]]  }
  0x31   :  { %s4580_s4 = sld [smem:[%s5211_s0 + %s4415_s28]]  }
  0x32   :  { %s4585_s17 = sld [smem:[%s5211_s0 + %s4416_s7]]  }
  0x33   :  { %v131_v0 = vld [vmem:[%s4435_s5] sm:$0xff]  ;;  %vm137_vm0 = vcmask 261120   ;;  %v133_v1 = vld [vmem:[%s4435_s5 + $0x10] sm:$0xff]  ;;  %v132_v2 = vld [vmem:[%s4435_s5 + $0x8] sm:$0xff] }
  0x34   :  { %v138_v3 = vsel %vm137_vm0, %v131_v0, 0.0  ;;  %v144_v4 = vsel %vm137_vm0, %v133_v1, 0.0  ;;  %v134_v5 = vld [vmem:[%s4435_s5 + $0x18] sm:$0xff]  ;;  %v141_v6 = vsel %vm137_vm0, %v132_v2, 0.0 }
  0x35   :  { %139 = vadd.xlane.f32.xlu0 %v138_v3  ;;  %145 = vadd.xlane.f32.xlu1 %v144_v4  ;;  %v147_v7 = vsel %vm137_vm0, %v134_v5, 0.0 }
  0x39   :  { %142 = vadd.xlane.f32.xlu0 %v141_v6  ;;  %148 = vadd.xlane.f32.xlu1 %v147_v7 }
  0x3a   :  { %66 = vsyncpa [#allocation3], 0  ;;  %v4206_v28 = vld [vmem:[%s4465_s29] sm:$0xff]   ;;  %v4207_v29 = vld [vmem:[%s4465_s29 + $0x8] sm:$0xff]   ;;  %v4417_v62 = vmov 0.0   ;;  %vm4418_vm1 = vmmov 0  }
  0x3b   :  { %3882 = vmatprep.subr.bf16.mxu1 %v4206_v28  ;;  %v3685_v44 = vld [vmem:[%s4455_s21] ss:$0 sm:$0xff]  ;;  %3896 = vmatprep.subr.bf16.mxu0 %v4417_v62  ;;  %s4419_s0 = smov 96   ;;  %vm302_vm2 = vcmask 130048   ;;  %vm549_vm3 = vcmask 64512   ;;  %s4421_s5 = smov 64  }
  0x3c   :  { %3883 = vmatpush3.bf16.msra.mxu1 %v4206_v28  ;;  %v3686_v49 = vld [vmem:[%s4460_s25] ss:$0 sm:$0xff]  ;;  %3898 = vmatprep.mubr.msk.bf16.mxu0 %vm4418_vm1, %v4417_v62  ;;  %vm603_vm4 = vcmask 1043456   ;;  %s4422_s21 = smov 80   ;;  %s4423_s25 = smov 112   ;;  %vm1611_vm5 = vcmask 523264  }
  0x3d   :  { %3884 = vmatprep.subr.bf16.mxu1 %v4207_v29  ;;  %v3687_v63 = vld [vmem:[%s4470_s3] ss:$0 sm:$0xff]  ;;  %s4424_s29 = smov 48   ;;  %s5229_s3 = sld [smem:[#allocation9_spill]]  ;;  %vm3290_vm6 = vcmask 60416   ;;  %vm3317_vm7 = vcmask 1041409  }
  0x3e   :  { %s5238_s15 = sld [smem:[#allocation17_spill]]  ;;  %s5239_s16 = sld [smem:[#allocation16_spill]]  ;;  %vm3320_vm8 = vcmask 1042434   ;;  %vm3323_vm9 = vcmask 1043459   ;;  %vm3326_vm10 = vcmask 257024   ;;  %vm3417_vm12 = vcmask 27648  }
  0x3f   :  { %vm3625_vm14 = vcmask 3072   ;;  %vm3639_vm15 = vcmask 0  }
  0x40   :  { %3885 = vmatpush3.bf16.msra.mxu1 %v4207_v29 }
  0x41   :  { %3890 = vmatprep.subr.bf16.mxu1 %v4417_v62 }
  0xc2   :  { %v140_v8 = vpop.xlane.xlu0 %139  ;;  %v146_v9 = vpop.xlane.xlu1 %145 }
  0xc3   :  { %v151_v10 = vmul.f32 0.03125, %v140_v8  ;;  %v153_v11 = vmul.f32 0.03125, %v146_v9 }
  0xc5   :  { %v155_v12 = vsub.f32 %v131_v0, %v151_v10  ;;  %v157_v13 = vsub.f32 %v133_v1, %v153_v11 }
  0xc6   :  { %v143_v14 = vpop.xlane.xlu0 %142  ;;  %v149_v15 = vpop.xlane.xlu1 %148 }
  0xc7   :  { %v152_v16 = vmul.f32 0.03125, %v143_v14  ;;  %v154_v17 = vmul.f32 0.03125, %v149_v15  ;;  %v159_v18 = vmul.f32 %v155_v12, %v155_v12  ;;  %v161_v19 = vmul.f32 %v157_v13, %v157_v13 }
  0xc9   :  { %v156_v20 = vsub.f32 %v132_v2, %v152_v16  ;;  %v158_v21 = vsub.f32 %v134_v5, %v154_v17  ;;  %v163_v22 = vsel %vm137_vm0, %v159_v18, 0.0  ;;  %v169_v23 = vsel %vm137_vm0, %v161_v19, 0.0 }
  0xca   :  { %164 = vadd.xlane.f32.xlu0 %v163_v22  ;;  %v504_v22 = vlaneseq }
  0xcb   :  { %v160_v24 = vmul.f32 %v156_v20, %v156_v20  ;;  %v162_v25 = vmul.f32 %v158_v21, %v158_v21 }
  0xcd   :  { %v166_v26 = vsel %vm137_vm0, %v160_v24, 0.0  ;;  %v172_v27 = vsel %vm137_vm0, %v162_v25, 0.0 }
  0xce   :  { %170 = vadd.xlane.f32.xlu0 %v169_v23  ;;  %167 = vadd.xlane.f32.xlu1 %v166_v26  ;;  %v128_v23 = vld [vmem:[%s4440_s9] sm:$0xf]  ;;  %v4666_v26 = vshrl.u32 %v504_v22, 7 }
  0xcf   :  { %v129_v24 = vsub.f32 1.0, %v128_v23 }
  0xd2   :  { %173 = vadd.xlane.f32.xlu1 %v172_v27  ;;  %v130_v27 = vmul.f32 -10000.0, %v129_v24 }
 0x157   :  { %v165_v30 = vpop.xlane.xlu0 %164 }
 0x158   :  { %v175_v31 = vmul.f32 0.03125, %v165_v30 }
 0x15a   :  { %v179_v32 = vadd.f32 1e-12, %v175_v31 }
 0x15b   :  { %v168_v33 = vpop.xlane.xlu1 %167  ;;  %v171_v34 = vpop.xlane.xlu0 %170 }
 0x15c   :  { %4226 = vrsqrt.f32 %v179_v32  ;;  %v176_v35 = vmul.f32 0.03125, %v168_v33  ;;  %v177_v36 = vmul.f32 0.03125, %v171_v34  ;;  %v4670_v32 = vsub.s32 0, %v4666_v26 }
 0x15e   :  { %v180_v37 = vadd.f32 1e-12, %v176_v35  ;;  %v181_v38 = vadd.f32 1e-12, %v177_v36 }
 0x15f   :  { %v174_v39 = vpop.xlane.xlu1 %173 }
 0x160   :  { %4228 = vrsqrt.f32 %v180_v37  ;;  %v178_v40 = vmul.f32 0.03125, %v174_v39 }
 0x161   :  { %4230 = vrsqrt.f32 %v181_v38 }
 0x162   :  { %v182_v41 = vadd.f32 1e-12, %v178_v40 }
 0x164   :  { %4232 = vrsqrt.f32 %v182_v41 }
 0x166   :  { %v4227_v42 = vpop.eup %4226 }
 0x167   :  { %v187_v43 = vmul.f32 %v4227_v42, %v155_v12 }
 0x169   :  { %v197_v48 = vmul.f32 %v3685_v44, %v187_v43 }
 0x16a   :  { %v4229_v45 = vpop.eup %4228 }
 0x16b   :  { %v4231_v46 = vpop.eup %4230  ;;  %v188_v47 = vmul.f32 %v4229_v45, %v156_v20  ;;  %v4603_v53 = vadd.f32 %v3686_v49, %v197_v48  ;;  %v4420_v20 = vmov 1966171168  }
 0x16c   :  { %v189_v50 = vmul.f32 %v4231_v46, %v157_v13 }
 0x16d   :  { %v198_v51 = vmul.f32 %v3685_v44, %v188_v47 }
 0x16e   :  { %v4233_v52 = vpop.eup %4232  ;;  %v199_v56 = vmul.f32 %v3685_v44, %v189_v50 }
 0x16f   :  { %v4605_v54 = vadd.f32 %v3686_v49, %v198_v51  ;;  %v190_v55 = vmul.f32 %v4233_v52, %v158_v21  ;;  %v502_v21 = vunpack.c.l.s4 %v4420_v20 }
 0x170   :  { %v4610_v59 = vadd.f32 %v3686_v49, %v199_v56 }
 0x171   :  { %v211_v57 = vpack.c.bf16 %v4605_v54, %v4603_v53  ;;  %v200_v58 = vmul.f32 %v3685_v44, %v190_v55  ;;  %v503_v25 = vunpack.c.0.s8 %v502_v21 }
 0x173   :  { %3886 = vmatprep.mubr.msk.bf16.mxu1 %vm137_vm0, %v211_v57  ;;  %v4612_v60 = vadd.f32 %v3686_v49, %v200_v58  ;;  %v506_v28 = vsub.s32 %v503_v25, %v4666_v26 }
 0x175   :  { %v212_v61 = vpack.c.bf16 %v4612_v60, %v4610_v59  ;;  %v507_v29 = vrot.slane %v130_v27, %v506_v28 }
 0x177   :  { %3887 = vmatmul.mubr.msk.bf16.vlgmr.msra.gmra.mrb[0].mxu1 %vm137_vm0, %v212_v61  ;;  %v508_v30 = vcombine.high %v507_v29, %v507_v29  ;;  %v515_v31 = vrot.slane %v507_v29, %v506_v28 }
 0x178   :  { %3892 = vmatprep.mubr.msk.bf16.mxu1 %vm4418_vm1, %v4417_v62 }
 0x179   :  { %v522_v33 = vrot.slane %v508_v30, %v506_v28  ;;  %v4673_v34 = vrot.slane %v515_v31, %v4670_v32  ;;  %v523_v45 = vcombine.high %v515_v31, %v515_v31 }
 0x17b   :  { %v4676_v38 = vrot.slane %v522_v33, %v4670_v32  ;;  %v524_v50 = vcombine.high %v522_v33, %v522_v33  ;;  %v4683_v52 = vrot.slane %v523_v45, %v4670_v32 }
 0x17d   :  { %v4686_v58 = vrot.slane %v524_v50, %v4670_v32 }
 0x24a   :  { %v3888_v0 = vpop.f32.mrb[0].mxu1 }
 0x24b   :  { %v276_v1 = vpop.f32.mrb[1].mxu1  ;;  %v285_v7 = vadd.f32 %v3888_v0, %v3687_v63 }
 0x24c   :  { %v277_v2 = vadd.f32 %v3687_v63, %v276_v1  ;;  %v3889_v3 = vpop.f32.mrb[2].mxu1 }
 0x24d   :  { %v279_v4 = vpop.f32.mrb[3].mxu1  ;;  %v4632_v9 = vpack.c.bf16 %v285_v7, %v285_v7  ;;  %v288_v10 = vadd.f32 %v3889_v3, %v3687_v63 }
 0x24e   :  { %v4624_v5 = vpack.c.bf16 %v277_v2, %v277_v2  ;;  %v280_v6 = vadd.f32 %v3687_v63, %v279_v4 }
 0x24f   :  { %v4636_v11 = vpack.c.bf16 %v288_v10, %v288_v10 }
 0x250   :  { %v4626_v8 = vpack.c.bf16 %v280_v6, %v280_v6  ;;  %300 = vrot.lane.b32.xlu0 %v4624_v5, %s4419_s0 }
 0x252   :  { %350 = vrot.lane.b32.xlu1 %v4626_v8, %s4419_s0 }
 0x256   :  { %399 = vrot.lane.b32.xlu1 %v4632_v9, %s4419_s0 }
 0x25a   :  { %448 = vrot.lane.b32.xlu1 %v4636_v11, %s4419_s0 }
 0x2c2   :  { %v301_v12 = vpop.permute.xlu0 %300 }
 0x2c3   :  { %v307_v13 = vsel %vm302_vm2, %v301_v12, 0 }
 0x2c4   :  { %v351_v14 = vpop.permute.xlu1 %350  ;;  %3891 = vmatpush3.bf16.xpose.msra.mxu1 %v307_v13 }
 0x2c5   :  { %v356_v15 = vsel %vm302_vm2, %v351_v14, 0  ;;  %3902 = vmatprep.subr.bf16.mxu1 %v4417_v62 }
 0x2c6   :  { %3897 = vmatpush3.bf16.xpose.msra.mxu0 %v356_v15 }
 0x2c7   :  { %3908 = vmatprep.subr.bf16.mxu0 %v4417_v62 }
 0x2c8   :  { %v400_v16 = vpop.permute.xlu1 %399 }
 0x2c9   :  { %v405_v17 = vsel %vm302_vm2, %v400_v16, 0 }
 0x2cb   :  { %3893 = vmatmul.mubr.msk.bf16.vlgmr.msra.gmra.mrb[4].mxu1 %vm302_vm2, %v4624_v5 }
 0x2cc   :  { %v449_v18 = vpop.permute.xlu1 %448  ;;  %3903 = vmatpush3.bf16.xpose.msra.mxu1 %v405_v17  ;;  %3904 = vmatprep.mubr.msk.bf16.mxu1 %vm4418_vm1, %v4417_v62 }
 0x2cd   :  { %v454_v19 = vsel %vm302_vm2, %v449_v18, 0  ;;  %3899 = vmatmul.mubr.msk.bf16.vlgmr.msra.gmra.mrb[0].mxu0 %vm302_vm2, %v4626_v8  ;;  %3914 = vmatprep.subr.bf16.mxu1 %v4417_v62 }
 0x2ce   :  { %3909 = vmatpush3.bf16.xpose.msra.mxu0 %v454_v19  ;;  %3910 = vmatprep.mubr.msk.bf16.mxu0 %vm4418_vm1, %v4417_v62 }
 0x2cf   :  { %3920 = vmatprep.subr.bf16.mxu0 %v4417_v62 }
 0x2d3   :  { %3905 = vmatmul.mubr.msk.bf16.vlgmr.msra.gmra.mrb[8].mxu1 %vm302_vm2, %v4632_v9 }
 0x2d4   :  { %3916 = vmatprep.mubr.msk.bf16.mxu1 %vm4418_vm1, %v4417_v62 }
 0x2d5   :  { %3911 = vmatmul.mubr.msk.bf16.vlgmr.msra.gmra.mrb[4].mxu0 %vm302_vm2, %v4636_v11 }
 0x2d6   :  { %3922 = vmatprep.mubr.msk.bf16.mxu0 %vm4418_vm1, %v4417_v62 }
 0x39e   :  { %v343_v35 = vpop.f32.mrb[4].mxu1 }
 0x39f   :  { %v496_v36 = vmul.f32 0.25, %v343_v35  ;;  %v3894_v37 = vpop.f32.mrb[5].mxu1 }
 0x3a0   :  { %v346_v39 = vpop.f32.mrb[6].mxu1  ;;  %v392_v40 = vpop.f32.mrb[0].mxu0 }
 0x3a1   :  { %v497_v41 = vmul.f32 0.25, %v392_v40  ;;  %v3895_v42 = vpop.f32.mrb[7].mxu1  ;;  %v3900_v43 = vpop.f32.mrb[1].mxu0  ;;  %v545_v44 = vadd.f32 %v4673_v34, %v496_v36 }
 0x3a2   :  { %v395_v46 = vpop.f32.mrb[2].mxu0 }
 0x3a3   :  { %v3901_v47 = vpop.f32.mrb[3].mxu0  ;;  %v550_v48 = vsel %vm549_vm3, %v545_v44, -inf  ;;  %v546_v49 = vadd.f32 %v4676_v38, %v497_v41 }
 0x3a4   :  { %551 = vmax.xlane.f32.xlu0 %v550_v48 }
 0x3a5   :  { %v553_v51 = vsel %vm549_vm3, %v546_v49, -inf }
 0x3a6   :  { %v441_v55 = vpop.f32.mrb[8].mxu1  ;;  %554 = vmax.xlane.f32.xlu1 %v553_v51 }
 0x3a7   :  { %v498_v56 = vmul.f32 0.25, %v441_v55  ;;  %v3906_v57 = vpop.f32.mrb[9].mxu1 }
 0x3a8   :  { %v444_v61 = vpop.f32.mrb[10].mxu1  ;;  %v490_v63 = vpop.f32.mrb[4].mxu0 }
 0x3a9   :  { %v499_v0 = vmul.f32 0.25, %v490_v63  ;;  %v3907_v1 = vpop.f32.mrb[11].mxu1  ;;  %v3912_v2 = vpop.f32.mrb[5].mxu0  ;;  %v547_v3 = vadd.f32 %v4683_v52, %v498_v56 }
 0x3aa   :  { %v493_v4 = vpop.f32.mrb[6].mxu0 }
 0x3ab   :  { %v3913_v6 = vpop.f32.mrb[7].mxu0  ;;  %v556_v7 = vsel %vm549_vm3, %v547_v3, -inf  ;;  %v548_v10 = vadd.f32 %v4686_v58, %v499_v0 }
 0x3ac   :  { %557 = vmax.xlane.f32.xlu0 %v556_v7 }
 0x3ad   :  { %v559_v12 = vsel %vm549_vm3, %v548_v10, -inf }
 0x3b0   :  { %560 = vmax.xlane.f32.xlu0 %v559_v12 }
 0x3b7   :  { %647 = vrot.lane.b32.xlu1 %v4626_v8, %s4421_s5 }
 0x3bb   :  { %695 = vrot.lane.b32.xlu1 %v4632_v9, %s4421_s5 }
 0x3bf   :  { %743 = vrot.lane.b32.xlu1 %v4636_v11, %s4421_s5 }
 0x431   :  { %v552_v13 = vpop.xlane.xlu0 %551 }
 0x432   :  { %v562_v14 = vsub.f32 %v545_v44, %v552_v13 }
 0x433   :  { %v555_v15 = vpop.xlane.xlu1 %554 }
 0x434   :  { %v566_v16 = vmul.f32 1.442695, %v562_v14  ;;  %v563_v17 = vsub.f32 %v546_v49, %v555_v15 }
 0x436   :  { %4234 = vpow2.f32 %v566_v16  ;;  %v568_v18 = vmul.f32 1.442695, %v563_v17 }
 0x437   :  { %v648_v19 = vpop.permute.xlu1 %647 }
 0x438   :  { %4236 = vpow2.f32 %v568_v18  ;;  %v653_v20 = vsel %vm603_vm4, %v648_v19, 0 }
 0x439   :  { %3921 = vmatpush3.bf16.msra.mxu0 %v653_v20  ;;  %v558_v27 = vpop.xlane.xlu0 %557 }
 0x43a   :  { %3932 = vmatprep.subr.bf16.mxu0 %v4417_v62  ;;  %v564_v29 = vsub.f32 %v547_v3, %v558_v27 }
 0x43b   :  { %v696_v40 = vpop.permute.xlu1 %695 }
 0x43c   :  { %v570_v31 = vmul.f32 1.442695, %v564_v29  ;;  %v701_v51 = vsel %vm603_vm4, %v696_v40, 0 }
 0x43d   :  { %v561_v28 = vpop.xlane.xlu0 %560 }
 0x43e   :  { %v565_v30 = vsub.f32 %v548_v10, %v561_v28  ;;  %4238 = vpow2.f32 %v570_v31 }
 0x43f   :  { %v744_v41 = vpop.permute.xlu1 %743 }
 0x440   :  { %v4235_v21 = vpop.eup %4234  ;;  %v572_v33 = vmul.f32 1.442695, %v565_v30  ;;  %v749_v56 = vsel %vm603_vm4, %v744_v41, 0 }
 0x441   :  { %v574_v23 = vsel %vm549_vm3, %v4235_v21, 0.0 }
 0x442   :  { %v4237_v24 = vpop.eup %4236  ;;  %575 = vadd.xlane.f32.xlu0 %v574_v23  ;;  %4240 = vpow2.f32 %v572_v33 }
 0x443   :  { %v577_v25 = vsel %vm549_vm3, %v4237_v24, 0.0 }
 0x444   :  { %578 = vadd.xlane.f32.xlu1 %v577_v25 }
 0x448   :  { %v4239_v35 = vpop.eup %4238 }
 0x449   :  { %v580_v37 = vsel %vm549_vm3, %v4239_v35, 0.0 }
 0x44c   :  { %v4241_v36 = vpop.eup %4240 }
 0x44d   :  { %v583_v39 = vsel %vm549_vm3, %v4241_v36, 0.0 }
 0x455   :  { %845 = vrot.lane.b32.xlu1 %v4626_v8, %s4422_s21 }
 0x458   :  { %598 = vrot.lane.b32.xlu0 %v4624_v5, %s4421_s5 }
 0x477   :  { %581 = vadd.xlane.f32.xlu0 %v580_v37 }
 0x479   :  { %584 = vadd.xlane.f32.xlu1 %v583_v39 }
 0x48a   :  { %843 = vrot.lane.b32.xlu1 %v4626_v8, %s4423_s25 }
 0x48d   :  { %795 = vrot.lane.b32.xlu0 %v4624_v5, %s4422_s21 }
 0x48e   :  { %945 = vrot.lane.b32.xlu1 %v4636_v11, %s4422_s21 }
 0x491   :  { %793 = vrot.lane.b32.xlu0 %v4624_v5, %s4423_s25 }
 0x492   :  { %943 = vrot.lane.b32.xlu1 %v4636_v11, %s4423_s25 }
 0x495   :  { %895 = vrot.lane.b32.xlu0 %v4632_v9, %s4422_s21 }
 0x499   :  { %893 = vrot.lane.b32.xlu0 %v4632_v9, %s4423_s25 }
 0x4cf   :  { %v576_v42 = vpop.xlane.xlu0 %575 }
 0x4d0   :  { %4242 = vrcp.f32 %v576_v42 }
 0x4d1   :  { %v579_v43 = vpop.xlane.xlu1 %578 }
 0x4d2   :  { %4244 = vrcp.f32 %v579_v43 }
 0x4d3   :  { %v599_v44 = vpop.permute.xlu0 %598 }
 0x4d4   :  { %v605_v45 = vsel %vm603_vm4, %v599_v44, 0 }
 0x4d5   :  { %3915 = vmatpush3.bf16.msra.mxu1 %v605_v45  ;;  %v846_v57 = vpop.permute.xlu1 %845 }
 0x4d6   :  { %3926 = vmatprep.subr.bf16.mxu1 %v4417_v62  ;;  %v851_v14 = vsel %vm302_vm2, %v846_v57, 0 }
 0x4da   :  { %v4243_v46 = vpop.eup %4242 }
 0x4db   :  { %v590_v47 = vmul.f32 %v4243_v46, %v4235_v21 }
 0x4dc   :  { %v4245_v48 = vpop.eup %4244 }
 0x4dd   :  { %v594_v49 = vpack.c.bf16 %v590_v47, %v590_v47  ;;  %v591_v50 = vmul.f32 %v4245_v48, %v4237_v24 }
 0x4df   :  { %3917 = vmatmul.mubr.msk.bf16.vlgmr.msra.gmra.mrb[12].mxu1 %vm549_vm3, %v594_v49  ;;  %v595_v55 = vpack.c.bf16 %v591_v50, %v591_v50 }
 0x4e0   :  { %3927 = vmatpush3.bf16.msra.mxu1 %v701_v51  ;;  %3928 = vmatprep.mubr.msk.bf16.mxu1 %vm4418_vm1, %v4417_v62 }
 0x4e1   :  { %3923 = vmatmul.mubr.msk.bf16.vlgmr.msra.gmra.mrb[8].mxu0 %vm549_vm3, %v595_v55  ;;  %3938 = vmatprep.subr.bf16.mxu1 %v4417_v62 }
 0x4e2   :  { %3933 = vmatpush3.bf16.msra.mxu0 %v749_v56  ;;  %3934 = vmatprep.mubr.msk.bf16.mxu0 %vm4418_vm1, %v4417_v62 }
 0x4e3   :  { %3944 = vmatprep.subr.bf16.mxu0 %v4417_v62 }
 0x504   :  { %v582_v61 = vpop.xlane.xlu0 %581 }
 0x505   :  { %4246 = vrcp.f32 %v582_v61 }
 0x506   :  { %v585_v63 = vpop.xlane.xlu1 %584 }
 0x507   :  { %4248 = vrcp.f32 %v585_v63 }
 0x508   :  { %v796_v0 = vpop.permute.xlu0 %795 }
 0x509   :  { %v801_v10 = vsel %vm302_vm2, %v796_v0, 0 }
 0x50a   :  { %v844_v13 = vpop.permute.xlu1 %843 }
 0x50c   :  { %v794_v7 = vpop.permute.xlu0 %793 }
 0x50e   :  { %v946_v16 = vpop.permute.xlu1 %945 }
 0x50f   :  { %v4247_v1 = vpop.eup %4246  ;;  %v951_v18 = vsel %vm302_vm2, %v946_v16, 0 }
 0x510   :  { %v592_v2 = vmul.f32 %v4247_v1, %v4239_v35  ;;  %v896_v15 = vpop.permute.xlu0 %895 }
 0x511   :  { %v4249_v3 = vpop.eup %4248  ;;  %v901_v17 = vsel %vm302_vm2, %v896_v15, 0 }
 0x512   :  { %v596_v4 = vpack.c.bf16 %v592_v2, %v592_v2  ;;  %v593_v6 = vmul.f32 %v4249_v3, %v4241_v36  ;;  %v944_v20 = vpop.permute.xlu1 %943 }
 0x514   :  { %3929 = vmatmul.mubr.msk.bf16.vlgmr.msra.gmra.mrb[16].mxu1 %vm549_vm3, %v596_v4  ;;  %v597_v12 = vpack.c.bf16 %v593_v6, %v593_v6  ;;  %v894_v19 = vpop.permute.xlu0 %893 }
 0x515   :  { %3939 = vmatpush3.bf16.xpose.msra.mxu1 %v801_v10  ;;  %3940 = vmatprep.mubr.msk.bf16.mxu1 %vm4418_vm1, %v4417_v62 }
 0x516   :  { %3935 = vmatmul.mubr.msk.bf16.vlgmr.msra.gmra.mrb[12].mxu0 %vm549_vm3, %v597_v12  ;;  %3950 = vmatprep.subr.bf16.mxu1 %v4417_v62 }
 0x517   :  { %3945 = vmatpush3.bf16.xpose.msra.mxu0 %v851_v14  ;;  %3946 = vmatprep.mubr.msk.bf16.mxu0 %vm4418_vm1, %v4417_v62 }
 0x518   :  { %3956 = vmatprep.subr.bf16.mxu0 %v4417_v62 }
 0x51c   :  { %3941 = vmatmul.mubr.msk.bf16.vlgmr.msra.gmra.mrb[20].mxu1 %vm302_vm2, %v794_v7 }
 0x51d   :  { %3951 = vmatpush3.bf16.xpose.msra.mxu1 %v901_v17  ;;  %3952 = vmatprep.mubr.msk.bf16.mxu1 %vm4418_vm1, %v4417_v62 }
 0x51e   :  { %3947 = vmatmul.mubr.msk.bf16.vlgmr.msra.gmra.mrb[16].mxu0 %vm302_vm2, %v844_v13  ;;  %3962 = vmatprep.subr.bf16.mxu1 %v4417_v62 }
 0x51f   :  { %3957 = vmatpush3.bf16.xpose.msra.mxu0 %v951_v18  ;;  %3958 = vmatprep.mubr.msk.bf16.mxu0 %vm4418_vm1, %v4417_v62 }
 0x520   :  { %3968 = vmatprep.subr.bf16.mxu0 %v4417_v62 }
 0x524   :  { %3953 = vmatmul.mubr.msk.bf16.vlgmr.msra.gmra.mrb[24].mxu1 %vm302_vm2, %v894_v19 }
 0x525   :  { %3964 = vmatprep.mubr.msk.bf16.mxu1 %vm4418_vm1, %v4417_v62 }
 0x526   :  { %3959 = vmatmul.mubr.msk.bf16.vlgmr.msra.gmra.mrb[20].mxu0 %vm302_vm2, %v944_v20 }
 0x527   :  { %3970 = vmatprep.mubr.msk.bf16.mxu0 %vm4418_vm1, %v4417_v62 }
 0x5b2   :  { %v4760_v21 = vpop.f32.mrb[12].mxu1 }
 0x5b3   :  { %v3918_v23 = vpop.f32.mrb[13].mxu1 }
 0x5b4   :  { %v644_v24 = vpop.f32.mrb[14].mxu1  ;;  %v4762_v25 = vpop.f32.mrb[8].mxu0 }
 0x5b5   :  { %v791_v27 = vpack.c.bf16 %v4762_v25, %v4760_v21  ;;  %v3919_v28 = vpop.f32.mrb[15].mxu1  ;;  %v3924_v29 = vpop.f32.mrb[9].mxu0 }
 0x5b6   :  { %v692_v30 = vpop.f32.mrb[10].mxu0 }
 0x5b7   :  { %v3925_v31 = vpop.f32.mrb[11].mxu0 }
 0x5e7   :  { %v4766_v33 = vpop.f32.mrb[16].mxu1 }
 0x5e8   :  { %v3930_v35 = vpop.f32.mrb[17].mxu1 }
 0x5e9   :  { %v740_v36 = vpop.f32.mrb[18].mxu1  ;;  %v4768_v37 = vpop.f32.mrb[12].mxu0 }
 0x5ea   :  { %v792_v39 = vpack.c.bf16 %v4768_v37, %v4766_v33  ;;  %v3931_v40 = vpop.f32.mrb[19].mxu1  ;;  %v3936_v41 = vpop.f32.mrb[13].mxu0 }
 0x5eb   :  { %v788_v42 = vpop.f32.mrb[14].mxu0 }
 0x5ec   :  { %v3937_v43 = vpop.f32.mrb[15].mxu0 }
 0x5ef   :  { %v837_v44 = vpop.f32.mrb[20].mxu1 }
 0x5f0   :  { %v993_v45 = vmul.f32 0.25, %v837_v44  ;;  %v3942_v46 = vpop.f32.mrb[21].mxu1 }
 0x5f1   :  { %v840_v47 = vpop.f32.mrb[22].mxu1  ;;  %v887_v48 = vpop.f32.mrb[16].mxu0 }
 0x5f2   :  { %v994_v49 = vmul.f32 0.25, %v887_v48  ;;  %v3943_v50 = vpop.f32.mrb[23].mxu1  ;;  %v3948_v51 = vpop.f32.mrb[17].mxu0  ;;  %v997_v55 = vadd.f32 %v993_v45, %v4673_v34 }
 0x5f3   :  { %v890_v56 = vpop.f32.mrb[18].mxu0 }
 0x5f4   :  { %v3949_v57 = vpop.f32.mrb[19].mxu0  ;;  %v1001_v61 = vsel %vm549_vm3, %v997_v55, -inf  ;;  %v998_v63 = vadd.f32 %v994_v49, %v4676_v38 }
 0x5f5   :  { %1002 = vmax.xlane.f32.xlu0 %v1001_v61 }
 0x5f6   :  { %v1004_v0 = vsel %vm549_vm3, %v998_v63, -inf }
 0x5f7   :  { %1005 = vmax.xlane.f32.xlu1 %v1004_v0  ;;  %v937_v1 = vpop.f32.mrb[24].mxu1 }
 0x5f8   :  { %v995_v2 = vmul.f32 0.25, %v937_v1  ;;  %v3954_v3 = vpop.f32.mrb[25].mxu1 }
 0x5f9   :  { %v940_v4 = vpop.f32.mrb[26].mxu1  ;;  %v987_v6 = vpop.f32.mrb[20].mxu0 }
 0x5fa   :  { %v996_v7 = vmul.f32 0.25, %v987_v6  ;;  %v3955_v10 = vpop.f32.mrb[27].mxu1  ;;  %v3960_v12 = vpop.f32.mrb[21].mxu0  ;;  %v999_v13 = vadd.f32 %v995_v2, %v4683_v52 }
 0x5fb   :  { %v990_v14 = vpop.f32.mrb[22].mxu0 }
 0x5fc   :  { %v3961_v15 = vpop.f32.mrb[23].mxu0  ;;  %v1007_v16 = vsel %vm549_vm3, %v999_v13, -inf  ;;  %v1000_v17 = vadd.f32 %v996_v7, %v4686_v58 }
 0x5fd   :  { %1008 = vmax.xlane.f32.xlu0 %v1007_v16 }
 0x5fe   :  { %v1010_v18 = vsel %vm549_vm3, %v1000_v17, -inf }
 0x601   :  { %1011 = vmax.xlane.f32.xlu0 %v1010_v18  ;;  %v4209_v18 = vld [vmem:[%s4475_s8] sm:$0xff]  }
 0x682   :  { %v1003_v19 = vpop.xlane.xlu0 %1002 }
 0x683   :  { %v1013_v20 = vsub.f32 %v997_v55, %v1003_v19 }
 0x684   :  { %v1006_v23 = vpop.xlane.xlu1 %1005 }
 0x685   :  { %v1017_v24 = vmul.f32 1.442695, %v1013_v20  ;;  %v1014_v28 = vsub.f32 %v998_v63, %v1006_v23 }
 0x687   :  { %4250 = vpow2.f32 %v1017_v24  ;;  %v1019_v29 = vmul.f32 1.442695, %v1014_v28 }
 0x689   :  { %4252 = vpow2.f32 %v1019_v29 }
 0x68a   :  { %v1009_v30 = vpop.xlane.xlu0 %1008 }
 0x68b   :  { %v1015_v31 = vsub.f32 %v999_v13, %v1009_v30 }
 0x68d   :  { %v1021_v35 = vmul.f32 1.442695, %v1015_v31 }
 0x68e   :  { %v1012_v45 = vpop.xlane.xlu0 %1011 }
 0x68f   :  { %4254 = vpow2.f32 %v1021_v35  ;;  %v1016_v46 = vsub.f32 %v1000_v17, %v1012_v45  ;;  %v4208_v17 = vld [vmem:[%s4475_s8 + $0x8] sm:$0xff]   ;;  %s5230_s8 = sld [smem:[#allocation7_spill]] }
 0x691   :  { %v4251_v36 = vpop.eup %4250  ;;  %v1023_v47 = vmul.f32 1.442695, %v1016_v46 }
 0x692   :  { %v1025_v40 = vsel %vm549_vm3, %v4251_v36, 0.0 }
 0x693   :  { %v4253_v41 = vpop.eup %4252  ;;  %1026 = vadd.xlane.f32.xlu0 %v1025_v40  ;;  %4256 = vpow2.f32 %v1023_v47 }
 0x694   :  { %v1028_v42 = vsel %vm549_vm3, %v4253_v41, 0.0 }
 0x695   :  { %1029 = vadd.xlane.f32.xlu1 %v1028_v42 }
 0x699   :  { %v4255_v43 = vpop.eup %4254 }
 0x69a   :  { %v1031_v44 = vsel %vm549_vm3, %v4255_v43, 0.0 }
 0x69b   :  { %1032 = vadd.xlane.f32.xlu0 %v1031_v44 }
 0x69d   :  { %v4257_v48 = vpop.eup %4256 }
 0x69e   :  { %v1034_v49 = vsel %vm549_vm3, %v4257_v48, 0.0 }
 0x6a6   :  { %1097 = vrot.lane.b32.xlu1 %v4626_v8, %s4424_s29 }
 0x6aa   :  { %1145 = vrot.lane.b32.xlu1 %v4632_v9, %s4424_s29 }
 0x6b1   :  { %1049 = vrot.lane.b32.xlu0 %v4624_v5, %s4424_s29 }
 0x6ce   :  { %1035 = vadd.xlane.f32.xlu1 %v1034_v49 }
 0x6df   :  { %1193 = vrot.lane.b32.xlu1 %v4636_v11, %s4424_s29 }
 0x720   :  { %v1027_v50 = vpop.xlane.xlu0 %1026 }
 0x721   :  { %4258 = vrcp.f32 %v1027_v50 }
 0x722   :  { %v1030_v8 = vpop.xlane.xlu1 %1029 }
 0x723   :  { %4260 = vrcp.f32 %v1030_v8 }
 0x726   :  { %v1098_v51 = vpop.permute.xlu1 %1097 }
 0x727   :  { %v1103_v9 = vsel %vm603_vm4, %v1098_v51, 0 }
 0x728   :  { %3969 = vmatpush3.bf16.msra.mxu0 %v1103_v9  ;;  %v1033_v5 = vpop.xlane.xlu0 %1032 }
 0x729   :  { %4262 = vrcp.f32 %v1033_v5  ;;  %3980 = vmatprep.subr.bf16.mxu0 %v4417_v62 }
 0x72a   :  { %v1146_v0 = vpop.permute.xlu1 %1145 }
 0x72b   :  { %v4259_v55 = vpop.eup %4258  ;;  %v1151_v3 = vsel %vm603_vm4, %v1146_v0, 0 }
 0x72c   :  { %v1041_v56 = vmul.f32 %v4259_v55, %v4251_v36  ;;  %v1050_v57 = vpop.permute.xlu0 %1049 }
 0x72d   :  { %v4261_v61 = vpop.eup %4260  ;;  %v1055_v63 = vsel %vm603_vm4, %v1050_v57, 0 }
 0x72e   :  { %3963 = vmatpush3.bf16.msra.mxu1 %v1055_v63  ;;  %v1045_v11 = vpack.c.bf16 %v1041_v56, %v1041_v56  ;;  %v1042_v1 = vmul.f32 %v4261_v61, %v4253_v41 }
 0x72f   :  { %3974 = vmatprep.subr.bf16.mxu1 %v4417_v62 }
 0x730   :  { %v1046_v2 = vpack.c.bf16 %v1042_v1, %v1042_v1 }
 0x731   :  { %3965 = vmatmul.mubr.msk.bf16.vlgmr.msra.gmra.mrb[28].mxu1 %vm549_vm3, %v1045_v11 }
 0x732   :  { %3971 = vmatmul.mubr.msk.bf16.vlgmr.msra.gmra.mrb[24].mxu0 %vm549_vm3, %v1046_v2  ;;  %3975 = vmatpush3.bf16.msra.mxu1 %v1151_v3 }
 0x733   :  { %v4263_v4 = vpop.eup %4262  ;;  %3976 = vmatprep.mubr.msk.bf16.mxu1 %vm4418_vm1, %v4417_v62  ;;  %3982 = vmatprep.mubr.msk.bf16.mxu0 %vm4418_vm1, %v4417_v62 }
 0x734   :  { %v1043_v6 = vmul.f32 %v4263_v4, %v4255_v43  ;;  %3986 = vmatprep.subr.bf16.mxu1 %v4208_v17 }
 0x736   :  { %v1047_v7 = vpack.c.bf16 %v1043_v6, %v1043_v6 }
 0x739   :  { %3977 = vmatmul.mubr.msk.bf16.vlgmr.msra.gmra.mrb[32].mxu1 %vm549_vm3, %v1047_v7 }
 0x73a   :  { %3987 = vmatpush3.bf16.msra.mxu1 %v4208_v17 }
 0x73b   :  { %3992 = vmatprep.subr.bf16.mxu1 %v4209_v18 }
 0x75b   :  { %v1036_v10 = vpop.xlane.xlu1 %1035 }
 0x75c   :  { %4264 = vrcp.f32 %v1036_v10 }
 0x75f   :  { %v1194_v12 = vpop.permute.xlu1 %1193 }
 0x760   :  { %v1199_v13 = vsel %vm603_vm4, %v1194_v12, 0 }
 0x761   :  { %3981 = vmatpush3.bf16.msra.mxu0 %v1199_v13 }
 0x766   :  { %v4265_v14 = vpop.eup %4264 }
 0x767   :  { %v1044_v15 = vmul.f32 %v4265_v14, %v4257_v48  ;;  %v3714_v48 = vld [vmem:[%s4480_s14] ss:$0 sm:$0xff]  ;;  %s5231_s14 = sld [smem:[#allocation8_spill]] }
 0x769   :  { %v1048_v16 = vpack.c.bf16 %v1044_v15, %v1044_v15 }
 0x76b   :  { %3983 = vmatmul.mubr.msk.bf16.vlgmr.msra.gmra.mrb[28].mxu0 %vm549_vm3, %v1048_v16 }
 0x804   :  { %v1091_v19 = vpop.f32.mrb[28].mxu1 }
 0x805   :  { %v3966_v20 = vpop.f32.mrb[29].mxu1  ;;  %v1139_v23 = vpop.f32.mrb[24].mxu0 }
 0x806   :  { %v1241_v24 = vpack.c.bf16 %v1139_v23, %v1091_v19  ;;  %v1094_v28 = vpop.f32.mrb[30].mxu1  ;;  %v3972_v29 = vpop.f32.mrb[25].mxu0  ;;  %v4211_v19 = vld [vmem:[%s4495_s30 + $0x8] sm:$0xff]  }
 0x807   :  { %v3967_v30 = vpop.f32.mrb[31].mxu1  ;;  %v1142_v31 = vpop.f32.mrb[26].mxu0 }
 0x808   :  { %v3973_v35 = vpop.f32.mrb[27].mxu0  ;;  %3988 = vmatprep.mubr.msk.bf16.mxu1 %vm302_vm2, %v1241_v24 }
 0x80c   :  { %v1187_v36 = vpop.f32.mrb[32].mxu1 }
 0x80d   :  { %v3978_v40 = vpop.f32.mrb[33].mxu1 }
 0x80e   :  { %v1190_v41 = vpop.f32.mrb[34].mxu1 }
 0x80f   :  { %v3979_v42 = vpop.f32.mrb[35].mxu1 }
 0x83e   :  { %v1235_v43 = vpop.f32.mrb[28].mxu0 }
 0x83f   :  { %v1242_v44 = vpack.c.bf16 %v1235_v43, %v1187_v36  ;;  %v3984_v45 = vpop.f32.mrb[29].mxu0 }
 0x840   :  { %v1238_v46 = vpop.f32.mrb[30].mxu0 }
 0x841   :  { %v3985_v47 = vpop.f32.mrb[31].mxu0  ;;  %3989 = vmatmul.mubr.msk.bf16.vlgmr.msra.gmra.mrb[36].mxu1 %vm302_vm2, %v1242_v44  ;;  %v3715_v44 = vld [vmem:[%s4485_s19] ss:$0 sm:$0xff]  ;;  %s5232_s19 = sld [smem:[#allocation10_spill]] }
 0x842   :  { %3993 = vmatpush3.bf16.msra.mxu1 %v4209_v18  ;;  %3994 = vmatprep.mubr.msk.bf16.mxu1 %vm302_vm2, %v791_v27  ;;  %v4210_v18 = vld [vmem:[%s4495_s30] sm:$0xff]   ;;  %s5234_s30 = sld [smem:[#allocation12_spill]] }
 0x843   :  { %3998 = vmatprep.subr.bf16.mxu0 %v4210_v18 }
 0x844   :  { %3999 = vmatpush3.bf16.msra.mxu0 %v4210_v18 }
 0x845   :  { %4000 = vmatprep.subr.bf16.mxu0 %v4211_v19 }
 0x848   :  { %4001 = vmatpush3.bf16.msra.mxu0 %v4211_v19 }
 0x84d   :  { %3995 = vmatmul.mubr.msk.bf16.vlgmr.msra.gmra.mrb[36].mxu1 %vm302_vm2, %v792_v39 }
 0x920   :  { %v3996_v49 = vpop.f32.mrb[36].mxu1 }
 0x921   :  { %v1350_v50 = vpop.f32.mrb[37].mxu1  ;;  %v1374_v8 = vadd.f32 %v3996_v49, %v3714_v48 }
 0x922   :  { %v1372_v51 = vadd.f32 %v3714_v48, %v1350_v50  ;;  %v3997_v9 = vpop.f32.mrb[38].mxu1  ;;  %v3716_v50 = vld [vmem:[%s4490_s24] ss:$0 sm:$0xff]  ;;  %s5233_s24 = sld [smem:[#allocation11_spill]] }
 0x923   :  { %v1353_v5 = vpop.f32.mrb[39].mxu1  ;;  %v1375_v57 = vadd.f32 %v3997_v9, %v3714_v48  ;;  %v1378_v27 = vadd.f32 %v1374_v8, %v4610_v59 }
 0x924   :  { %v1373_v55 = vadd.f32 %v3714_v48, %v1353_v5  ;;  %v1376_v56 = vadd.f32 %v1372_v51, %v4603_v53 }
 0x925   :  { %v1388_v37 = vsel %vm137_vm0, %v1378_v27, 0.0  ;;  %v1379_v39 = vadd.f32 %v1375_v57, %v4612_v60 }
 0x926   :  { %v1382_v21 = vsel %vm137_vm0, %v1376_v56, 0.0  ;;  %v1377_v25 = vadd.f32 %v1373_v55, %v4605_v54 }
 0x927   :  { %1383 = vadd.xlane.f32.xlu0 %v1382_v21  ;;  %v1391_v61 = vsel %vm137_vm0, %v1379_v39, 0.0 }
 0x928   :  { %v1385_v33 = vsel %vm137_vm0, %v1377_v25, 0.0 }
 0x929   :  { %1386 = vadd.xlane.f32.xlu1 %v1385_v33 }
 0x92b   :  { %1389 = vadd.xlane.f32.xlu0 %v1388_v37 }
 0x92f   :  { %1392 = vadd.xlane.f32.xlu0 %v1391_v61  ;;  %v4213_v61 = vld [vmem:[%s4505_s12 + $0x8] sm:$0xff]  }
 0x9b4   :  { %v1384_v53 = vpop.xlane.xlu0 %1383 }
 0x9b5   :  { %v1394_v63 = vmul.f32 0.03125, %v1384_v53  ;;  %v4214_v53 = vld [vmem:[%s4505_s12 + $0x10] sm:$0xff]  }
 0x9b6   :  { %v1387_v0 = vpop.xlane.xlu1 %1386 }
 0x9b7   :  { %v1398_v11 = vsub.f32 %v1376_v56, %v1394_v63  ;;  %v1395_v1 = vmul.f32 0.03125, %v1387_v0  ;;  %v4215_v63 = vld [vmem:[%s4505_s12 + $0x18] sm:$0xff]   ;;  %v3717_v0 = vld [vmem:[%s4500_s6] ss:$0 sm:$0xff]  ;;  %s5235_s6 = sld [smem:[#allocation15_spill]] }
 0x9b8   :  { %v1390_v54 = vpop.xlane.xlu0 %1389 }
 0x9b9   :  { %v1399_v2 = vsub.f32 %v1377_v25, %v1395_v1  ;;  %v1396_v59 = vmul.f32 0.03125, %v1390_v54  ;;  %v1402_v3 = vmul.f32 %v1398_v11, %v1398_v11 }
 0x9bb   :  { %v1400_v4 = vsub.f32 %v1378_v27, %v1396_v59  ;;  %v1406_v6 = vsel %vm137_vm0, %v1402_v3, 0.0  ;;  %v1403_v7 = vmul.f32 %v1399_v2, %v1399_v2 }
 0x9bc   :  { %1407 = vadd.xlane.f32.xlu0 %v1406_v6  ;;  %v1393_v60 = vpop.xlane.xlu0 %1392 }
 0x9bd   :  { %v1397_v10 = vmul.f32 0.03125, %v1393_v60  ;;  %v1409_v12 = vsel %vm137_vm0, %v1403_v7, 0.0  ;;  %v1404_v13 = vmul.f32 %v1400_v4, %v1400_v4 }
 0x9be   :  { %1410 = vadd.xlane.f32.xlu1 %v1409_v12 }
 0x9bf   :  { %v1401_v14 = vsub.f32 %v1379_v39, %v1397_v10  ;;  %v1412_v15 = vsel %vm137_vm0, %v1404_v13, 0.0  ;;  %v4212_v39 = vld [vmem:[%s4505_s12] sm:$0xff]   ;;  %s5236_s12 = sld [smem:[#allocation13_spill]] }
 0x9c0   :  { %1413 = vadd.xlane.f32.xlu0 %v1412_v15  ;;  %4006 = vmatprep.subr.bf16.mxu0 %v4212_v39 }
 0x9c1   :  { %v1405_v16 = vmul.f32 %v1401_v14, %v1401_v14 }
 0x9c3   :  { %v1415_v17 = vsel %vm137_vm0, %v1405_v16, 0.0 }
 0x9c4   :  { %1416 = vadd.xlane.f32.xlu1 %v1415_v17 }
 0xa49   :  { %v1408_v20 = vpop.xlane.xlu0 %1407 }
 0xa4a   :  { %v1418_v23 = vmul.f32 0.03125, %v1408_v20 }
 0xa4b   :  { %v1411_v24 = vpop.xlane.xlu1 %1410 }
 0xa4c   :  { %v1422_v28 = vadd.f32 1e-12, %v1418_v23  ;;  %v1419_v29 = vmul.f32 0.03125, %v1411_v24 }
 0xa4d   :  { %v1414_v30 = vpop.xlane.xlu0 %1413 }
 0xa4e   :  { %4266 = vrsqrt.f32 %v1422_v28  ;;  %v1423_v31 = vadd.f32 1e-12, %v1419_v29  ;;  %v1420_v35 = vmul.f32 0.03125, %v1414_v30 }
 0xa50   :  { %4268 = vrsqrt.f32 %v1423_v31  ;;  %v1424_v36 = vadd.f32 1e-12, %v1420_v35 }
 0xa51   :  { %v1417_v40 = vpop.xlane.xlu1 %1416 }
 0xa52   :  { %4270 = vrsqrt.f32 %v1424_v36  ;;  %v1421_v41 = vmul.f32 0.03125, %v1417_v40 }
 0xa54   :  { %v1425_v42 = vadd.f32 1e-12, %v1421_v41 }
 0xa56   :  { %4272 = vrsqrt.f32 %v1425_v42 }
 0xa58   :  { %v4267_v43 = vpop.eup %4266 }
 0xa59   :  { %v1430_v45 = vmul.f32 %v4267_v43, %v1398_v11 }
 0xa5a   :  { %v4269_v46 = vpop.eup %4268 }
 0xa5b   :  { %v1431_v47 = vmul.f32 %v4269_v46, %v1399_v2  ;;  %v1440_v48 = vmul.f32 %v3715_v44, %v1430_v45 }
 0xa5c   :  { %v4271_v49 = vpop.eup %4270 }
 0xa5d   :  { %v1432_v8 = vmul.f32 %v4271_v49, %v1400_v4  ;;  %v1441_v51 = vmul.f32 %v3715_v44, %v1431_v47  ;;  %v4835_v9 = vadd.f32 %v3716_v50, %v1440_v48 }
 0xa5f   :  { %v4837_v5 = vadd.f32 %v3716_v50, %v1441_v51  ;;  %v1442_v56 = vmul.f32 %v3715_v44, %v1432_v8 }
 0xa60   :  { %v4273_v55 = vpop.eup %4272 }
 0xa61   :  { %v1433_v57 = vmul.f32 %v4273_v55, %v1401_v14  ;;  %v1454_v21 = vpack.c.bf16 %v4837_v5, %v4835_v9  ;;  %v4842_v27 = vadd.f32 %v3716_v50, %v1442_v56 }
 0xa63   :  { %v1443_v25 = vmul.f32 %v3715_v44, %v1433_v57  ;;  %4002 = vmatprep.mubr.msk.bf16.mxu0 %vm137_vm0, %v1454_v21 }
 0xa65   :  { %v4844_v33 = vadd.f32 %v3716_v50, %v1443_v25 }
 0xa67   :  { %v1455_v37 = vpack.c.bf16 %v4844_v33, %v4842_v27 }
 0xa69   :  { %4003 = vmatmul.mubr.msk.bf16.vlgmr.msra.gmra.mrb[32].mxu0 %vm137_vm0, %v1455_v37  ;;  %v3722_v37 = vld [vmem:[%s4510_s20] ss:$0 sm:$0xff]  ;;  %s5237_s20 = sld [smem:[#allocation14_spill]] }
 0xa6a   :  { %4007 = vmatpush3.bf16.msra.mxu0 %v4212_v39 }
 0xa6b   :  { %4008 = vmatprep.subr.bf16.mxu0 %v4213_v61 }
 0xa6e   :  { %4009 = vmatpush3.bf16.msra.mxu0 %v4213_v61 }
 0xa6f   :  { %4010 = vmatprep.subr.bf16.mxu0 %v4214_v53 }
 0xa72   :  { %4011 = vmatpush3.bf16.msra.mxu0 %v4214_v53 }
 0xa73   :  { %4012 = vmatprep.subr.bf16.mxu0 %v4215_v63 }
 0xa76   :  { %4013 = vmatpush3.bf16.msra.mxu0 %v4215_v63 }
 0xa77   :  { %4032 = vmatprep.subr.bf16.mxu0 %v4417_v62 }
 0xb3c   :  { %v4004_v11 = vpop.f32.mrb[32].mxu0 }
 0xb3d   :  { %v1528_v1 = vadd.f32 %v4004_v11, %v3717_v0  ;;  %v1519_v54 = vpop.f32.mrb[33].mxu0 }
 0xb3e   :  { %v1520_v2 = vadd.f32 %v3717_v0, %v1519_v54  ;;  %v4005_v59 = vpop.f32.mrb[34].mxu0 }
 0xb3f   :  { %v1540_v3 = vmul.f32 0.044715, %v1528_v1  ;;  %v1531_v4 = vadd.f32 %v4005_v59, %v3717_v0  ;;  %v1522_v6 = vpop.f32.mrb[35].mxu0  ;;  %v1536_v46 = vmul.f32 0.5, %v1528_v1 }
 0xb40   :  { %v1538_v7 = vmul.f32 0.044715, %v1520_v2  ;;  %v1523_v60 = vadd.f32 %v3717_v0, %v1522_v6  ;;  %v1534_v49 = vmul.f32 0.5, %v1520_v2 }
 0xb41   :  { %v1544_v10 = vmul.f32 %v1540_v3, %v1528_v1  ;;  %v1541_v12 = vmul.f32 0.044715, %v1531_v4  ;;  %v1537_v47 = vmul.f32 0.5, %v1531_v4 }
 0xb42   :  { %v1542_v13 = vmul.f32 %v1538_v7, %v1520_v2  ;;  %v1539_v14 = vmul.f32 0.044715, %v1523_v60  ;;  %v1535_v50 = vmul.f32 0.5, %v1523_v60 }
 0xb43   :  { %v1548_v15 = vmul.f32 %v1544_v10, %v1528_v1  ;;  %v1545_v16 = vmul.f32 %v1541_v12, %v1531_v4 }
 0xb44   :  { %v1546_v17 = vmul.f32 %v1542_v13, %v1520_v2  ;;  %v1543_v18 = vmul.f32 %v1539_v14, %v1523_v60 }
 0xb45   :  { %v1552_v19 = vadd.f32 %v1548_v15, %v1528_v1  ;;  %v1549_v20 = vmul.f32 %v1545_v16, %v1531_v4 }
 0xb46   :  { %v1550_v23 = vadd.f32 %v1546_v17, %v1520_v2  ;;  %v1547_v24 = vmul.f32 %v1543_v18, %v1523_v60 }
 0xb47   :  { %v1556_v28 = vmul.f32 0.7978846, %v1552_v19  ;;  %v1553_v29 = vadd.f32 %v1549_v20, %v1531_v4 }
 0xb48   :  { %v1554_v30 = vmul.f32 0.7978846, %v1550_v23  ;;  %v1551_v31 = vadd.f32 %v1547_v24, %v1523_v60 }
 0xb49   :  { %4274 = vtanh.f32 %v1556_v28  ;;  %v1557_v35 = vmul.f32 0.7978846, %v1553_v29 }
 0xb4a   :  { %4276 = vtanh.f32 %v1554_v30  ;;  %v1555_v36 = vmul.f32 0.7978846, %v1551_v31 }
 0xb4b   :  { %4278 = vtanh.f32 %v1557_v35 }
 0xb4c   :  { %4280 = vtanh.f32 %v1555_v36  ;;  %v4216_v36 = vld [vmem:[%s5229_s3] sm:$0xff]  }
 0xb4d   :  { %4018 = vmatprep.subr.bf16.mxu1 %v4216_v36 }
 0xb4e   :  { %4019 = vmatpush3.bf16.msra.mxu1 %v4216_v36 }
 0xb53   :  { %v4275_v40 = vpop.eup %4274 }
 0xb54   :  { %v4277_v41 = vpop.eup %4276  ;;  %v1564_v42 = vadd.f32 1.0, %v4275_v40  ;;  %v4217_v40 = vld [vmem:[%s5229_s3 + $0x8] sm:$0xff]  }
 0xb55   :  { %v4279_v43 = vpop.eup %4278  ;;  %v1562_v44 = vadd.f32 1.0, %v4277_v41  ;;  %4020 = vmatprep.subr.bf16.mxu1 %v4217_v40 }
 0xb56   :  { %v4281_v45 = vpop.eup %4280  ;;  %v1565_v48 = vadd.f32 1.0, %v4279_v43  ;;  %v1568_v51 = vmul.f32 %v1564_v42, %v1536_v46  ;;  %4021 = vmatpush3.bf16.msra.mxu1 %v4217_v40 }
 0xb57   :  { %v1563_v8 = vadd.f32 1.0, %v4281_v45  ;;  %v1566_v56 = vmul.f32 %v1562_v44, %v1534_v49  ;;  %4026 = vmatprep.subr.bf16.mxu1 %v4417_v62 }
 0xb58   :  { %v1569_v55 = vmul.f32 %v1565_v48, %v1537_v47 }
 0xb59   :  { %v1567_v57 = vmul.f32 %v1563_v8, %v1535_v50 }
 0xb5a   :  { %v1571_v21 = vpack.c.bf16 %v1569_v55, %v1568_v51 }
 0xb5b   :  { %v1570_v25 = vpack.c.bf16 %v1567_v57, %v1566_v56  ;;  %v3729_v56 = vld [vmem:[%s5230_s8] ss:$0 sm:$0xff] }
 0xb5d   :  { %4014 = vmatprep.mubr.msk.bf16.mxu0 %vm1611_vm5, %v1570_v25 }
 0xb5e   :  { %4015 = vmatmul.mubr.msk.bf16.vlgmr.msra.gmra.mrb[36].mxu0 %vm1611_vm5, %v1571_v21 }
 0xb5f   :  { %4034 = vmatprep.mubr.msk.bf16.mxu0 %vm4418_vm1, %v4417_v62 }
 0xc31   :  { %v4016_v39 = vpop.f32.mrb[36].mxu0 }
 0xc32   :  { %v1652_v61 = vpop.f32.mrb[37].mxu0  ;;  %v1661_v53 = vadd.f32 %v4016_v39, %v3722_v37 }
 0xc33   :  { %v1653_v63 = vadd.f32 %v3722_v37, %v1652_v61  ;;  %v4017_v0 = vpop.f32.mrb[38].mxu0  ;;  %v3730_v61 = vld [vmem:[%s5231_s14] ss:$0 sm:$0xff] }
 0xc34   :  { %v1655_v11 = vpop.f32.mrb[39].mxu0  ;;  %v1664_v1 = vadd.f32 %v4017_v0, %v3722_v37  ;;  %v1669_v4 = vadd.f32 %v1661_v53, %v4842_v27 }
 0xc35   :  { %v1656_v54 = vadd.f32 %v3722_v37, %v1655_v11  ;;  %v1667_v2 = vadd.f32 %v1653_v63, %v4835_v9 }
 0xc36   :  { %v1670_v7 = vadd.f32 %v1664_v1, %v4844_v33  ;;  %v1679_v60 = vsel %vm137_vm0, %v1669_v4, 0.0 }
 0xc37   :  { %v1673_v59 = vsel %vm137_vm0, %v1667_v2, 0.0  ;;  %v1668_v3 = vadd.f32 %v1656_v54, %v4837_v5 }
 0xc38   :  { %1674 = vadd.xlane.f32.xlu0 %v1673_v59  ;;  %v1682_v10 = vsel %vm137_vm0, %v1670_v7, 0.0 }
 0xc39   :  { %v1676_v6 = vsel %vm137_vm0, %v1668_v3, 0.0 }
 0xc3a   :  { %1677 = vadd.xlane.f32.xlu1 %v1676_v6 }
 0xc3c   :  { %1680 = vadd.xlane.f32.xlu0 %v1679_v60  ;;  %v3731_v60 = vld [vmem:[%s5232_s19] ss:$0 sm:$0xff] }
 0xc3e   :  { %1683 = vadd.xlane.f32.xlu1 %v1682_v10 }
 0xcc5   :  { %v1675_v12 = vpop.xlane.xlu0 %1674 }
 0xcc6   :  { %v1685_v9 = vmul.f32 0.03125, %v1675_v12 }
 0xcc7   :  { %v1678_v13 = vpop.xlane.xlu1 %1677 }
 0xcc8   :  { %v1689_v14 = vsub.f32 %v1667_v2, %v1685_v9  ;;  %v1686_v15 = vmul.f32 0.03125, %v1678_v13 }
 0xcc9   :  { %v1681_v5 = vpop.xlane.xlu0 %1680 }
 0xcca   :  { %v1690_v16 = vsub.f32 %v1668_v3, %v1686_v15  ;;  %v1687_v27 = vmul.f32 0.03125, %v1681_v5  ;;  %v1693_v17 = vmul.f32 %v1689_v14, %v1689_v14 }
 0xccb   :  { %v1684_v18 = vpop.xlane.xlu1 %1683 }
 0xccc   :  { %v1691_v19 = vsub.f32 %v1669_v4, %v1687_v27  ;;  %v1688_v33 = vmul.f32 0.03125, %v1684_v18  ;;  %v1697_v20 = vsel %vm137_vm0, %v1693_v17, 0.0  ;;  %v1694_v23 = vmul.f32 %v1690_v16, %v1690_v16 }
 0xccd   :  { %1698 = vadd.xlane.f32.xlu0 %v1697_v20 }
 0xcce   :  { %v1692_v24 = vsub.f32 %v1670_v7, %v1688_v33  ;;  %v1700_v28 = vsel %vm137_vm0, %v1694_v23, 0.0  ;;  %v1695_v29 = vmul.f32 %v1691_v19, %v1691_v19 }
 0xccf   :  { %1701 = vadd.xlane.f32.xlu1 %v1700_v28 }
 0xcd0   :  { %v1703_v30 = vsel %vm137_vm0, %v1695_v29, 0.0  ;;  %v1696_v31 = vmul.f32 %v1692_v24, %v1692_v24 }
 0xcd1   :  { %1704 = vadd.xlane.f32.xlu0 %v1703_v30 }
 0xcd2   :  { %v1706_v35 = vsel %vm137_vm0, %v1696_v31, 0.0 }
 0xcd3   :  { %1707 = vadd.xlane.f32.xlu1 %v1706_v35 }
 0xd5a   :  { %v1699_v41 = vpop.xlane.xlu0 %1698 }
 0xd5b   :  { %v1709_v42 = vmul.f32 0.03125, %v1699_v41 }
 0xd5c   :  { %v1702_v43 = vpop.xlane.xlu1 %1701 }
 0xd5d   :  { %v1713_v44 = vadd.f32 1e-12, %v1709_v42  ;;  %v1710_v45 = vmul.f32 0.03125, %v1702_v43 }
 0xd5e   :  { %v1705_v46 = vpop.xlane.xlu0 %1704 }
 0xd5f   :  { %4282 = vrsqrt.f32 %v1713_v44  ;;  %v1714_v47 = vadd.f32 1e-12, %v1710_v45  ;;  %v1711_v48 = vmul.f32 0.03125, %v1705_v46 }
 0xd60   :  { %v1708_v49 = vpop.xlane.xlu1 %1707 }
 0xd61   :  { %4284 = vrsqrt.f32 %v1714_v47  ;;  %v1715_v50 = vadd.f32 1e-12, %v1711_v48  ;;  %v1712_v8 = vmul.f32 0.03125, %v1708_v49 }
 0xd63   :  { %4286 = vrsqrt.f32 %v1715_v50  ;;  %v1716_v51 = vadd.f32 1e-12, %v1712_v8 }
 0xd65   :  { %4288 = vrsqrt.f32 %v1716_v51 }
 0xd69   :  { %v4283_v55 = vpop.eup %4282 }
 0xd6a   :  { %v1721_v57 = vmul.f32 %v4283_v55, %v1689_v14 }
 0xd6b   :  { %v4285_v21 = vpop.eup %4284 }
 0xd6c   :  { %v1722_v25 = vmul.f32 %v4285_v21, %v1690_v16  ;;  %v1731_v37 = vmul.f32 %v3729_v56, %v1721_v57 }
 0xd6d   :  { %v4287_v39 = vpop.eup %4286 }
 0xd6e   :  { %v1723_v53 = vmul.f32 %v4287_v39, %v1691_v19  ;;  %v1732_v63 = vmul.f32 %v3729_v56, %v1722_v25  ;;  %v4877_v54 = vadd.f32 %v3730_v61, %v1731_v37 }
 0xd6f   :  { %v4289_v0 = vpop.eup %4288 }
 0xd70   :  { %v1733_v11 = vmul.f32 %v3729_v56, %v1723_v53  ;;  %v1724_v1 = vmul.f32 %v4289_v0, %v1692_v24  ;;  %v4879_v2 = vadd.f32 %v3730_v61, %v1732_v63 }
 0xd72   :  { %v1734_v59 = vmul.f32 %v3729_v56, %v1724_v1  ;;  %v1745_v3 = vpack.c.bf16 %v4879_v2, %v4877_v54  ;;  %v4884_v4 = vadd.f32 %v3730_v61, %v1733_v11 }
 0xd74   :  { %4022 = vmatprep.mubr.msk.bf16.mxu1 %vm137_vm0, %v1745_v3  ;;  %v4886_v6 = vadd.f32 %v3730_v61, %v1734_v59 }
 0xd76   :  { %v1746_v7 = vpack.c.bf16 %v4886_v6, %v4884_v4 }
 0xd78   :  { %4023 = vmatmul.mubr.msk.bf16.vlgmr.msra.gmra.mrb[40].mxu1 %vm137_vm0, %v1746_v7 }
 0xd79   :  { %4028 = vmatprep.mubr.msk.bf16.mxu1 %vm4418_vm1, %v4417_v62 }
 0xe4b   :  { %v4024_v10 = vpop.f32.mrb[40].mxu1 }
 0xe4c   :  { %v1810_v12 = vpop.f32.mrb[41].mxu1  ;;  %v1819_v16 = vadd.f32 %v4024_v10, %v3731_v60 }
 0xe4d   :  { %v1811_v9 = vadd.f32 %v3731_v60, %v1810_v12  ;;  %v4025_v13 = vpop.f32.mrb[42].mxu1 }
 0xe4e   :  { %v1813_v14 = vpop.f32.mrb[43].mxu1  ;;  %v4902_v17 = vpack.c.bf16 %v1819_v16, %v1819_v16  ;;  %v1822_v18 = vadd.f32 %v4025_v13, %v3731_v60 }
 0xe4f   :  { %v4894_v15 = vpack.c.bf16 %v1811_v9, %v1811_v9  ;;  %v1814_v5 = vadd.f32 %v3731_v60, %v1813_v14 }
 0xe50   :  { %v4906_v19 = vpack.c.bf16 %v1822_v18, %v1822_v18 }
 0xe51   :  { %v4896_v27 = vpack.c.bf16 %v1814_v5, %v1814_v5  ;;  %1834 = vrot.lane.b32.xlu0 %v4894_v15, %s4419_s0 }
 0xe53   :  { %1883 = vrot.lane.b32.xlu1 %v4896_v27, %s4419_s0 }
 0xe57   :  { %1932 = vrot.lane.b32.xlu1 %v4902_v17, %s4419_s0 }
 0xe5b   :  { %1981 = vrot.lane.b32.xlu1 %v4906_v19, %s4419_s0 }
 0xec3   :  { %v1835_v33 = vpop.permute.xlu0 %1834 }
 0xec4   :  { %v1840_v20 = vsel %vm302_vm2, %v1835_v33, 0 }
 0xec5   :  { %v1884_v23 = vpop.permute.xlu1 %1883  ;;  %4027 = vmatpush3.bf16.xpose.msra.mxu1 %v1840_v20 }
 0xec6   :  { %v1889_v24 = vsel %vm302_vm2, %v1884_v23, 0  ;;  %4038 = vmatprep.subr.bf16.mxu1 %v4417_v62 }
 0xec7   :  { %4033 = vmatpush3.bf16.xpose.msra.mxu0 %v1889_v24 }
 0xec8   :  { %4044 = vmatprep.subr.bf16.mxu0 %v4417_v62 }
 0xec9   :  { %v1933_v28 = vpop.permute.xlu1 %1932 }
 0xeca   :  { %v1938_v29 = vsel %vm302_vm2, %v1933_v28, 0 }
 0xecc   :  { %4029 = vmatmul.mubr.msk.bf16.vlgmr.msra.gmra.mrb[44].mxu1 %vm302_vm2, %v4894_v15 }
 0xecd   :  { %v1982_v30 = vpop.permute.xlu1 %1981  ;;  %4039 = vmatpush3.bf16.xpose.msra.mxu1 %v1938_v29  ;;  %4040 = vmatprep.mubr.msk.bf16.mxu1 %vm4418_vm1, %v4417_v62 }
 0xece   :  { %v1987_v31 = vsel %vm302_vm2, %v1982_v30, 0  ;;  %4035 = vmatmul.mubr.msk.bf16.vlgmr.msra.gmra.mrb[40].mxu0 %vm302_vm2, %v4896_v27  ;;  %4050 = vmatprep.subr.bf16.mxu1 %v4417_v62 }
 0xecf   :  { %4045 = vmatpush3.bf16.xpose.msra.mxu0 %v1987_v31  ;;  %4046 = vmatprep.mubr.msk.bf16.mxu0 %vm4418_vm1, %v4417_v62 }
 0xed0   :  { %4056 = vmatprep.subr.bf16.mxu0 %v4417_v62 }
 0xed4   :  { %4041 = vmatmul.mubr.msk.bf16.vlgmr.msra.gmra.mrb[48].mxu1 %vm302_vm2, %v4902_v17 }
 0xed5   :  { %4052 = vmatprep.mubr.msk.bf16.mxu1 %vm4418_vm1, %v4417_v62 }
 0xed6   :  { %4047 = vmatmul.mubr.msk.bf16.vlgmr.msra.gmra.mrb[44].mxu0 %vm302_vm2, %v4906_v19 }
 0xed7   :  { %4058 = vmatprep.mubr.msk.bf16.mxu0 %vm4418_vm1, %v4417_v62 }
 0xf9f   :  { %v1876_v35 = vpop.f32.mrb[44].mxu1 }
 0xfa0   :  { %v2029_v36 = vmul.f32 0.25, %v1876_v35  ;;  %v4030_v40 = vpop.f32.mrb[45].mxu1 }
 0xfa1   :  { %v1879_v41 = vpop.f32.mrb[46].mxu1  ;;  %v1925_v42 = vpop.f32.mrb[40].mxu0 }
 0xfa2   :  { %v2030_v43 = vmul.f32 0.25, %v1925_v42  ;;  %v4031_v44 = vpop.f32.mrb[47].mxu1  ;;  %v4036_v45 = vpop.f32.mrb[41].mxu0  ;;  %v2033_v46 = vadd.f32 %v2029_v36, %v4673_v34 }
 0xfa3   :  { %v1928_v47 = vpop.f32.mrb[42].mxu0 }
 0xfa4   :  { %v4037_v48 = vpop.f32.mrb[43].mxu0  ;;  %v2037_v49 = vsel %vm549_vm3, %v2033_v46, -inf  ;;  %v2034_v50 = vadd.f32 %v2030_v43, %v4676_v38 }
 0xfa5   :  { %2038 = vmax.xlane.f32.xlu0 %v2037_v49 }
 0xfa6   :  { %v2040_v8 = vsel %vm549_vm3, %v2034_v50, -inf }
 0xfa7   :  { %2041 = vmax.xlane.f32.xlu1 %v2040_v8  ;;  %v1974_v51 = vpop.f32.mrb[48].mxu1 }
 0xfa8   :  { %v2031_v55 = vmul.f32 0.25, %v1974_v51  ;;  %v4042_v56 = vpop.f32.mrb[49].mxu1 }
 0xfa9   :  { %v1977_v57 = vpop.f32.mrb[50].mxu1  ;;  %v2023_v21 = vpop.f32.mrb[44].mxu0 }
 0xfaa   :  { %v2032_v25 = vmul.f32 0.25, %v2023_v21  ;;  %v4043_v37 = vpop.f32.mrb[51].mxu1  ;;  %v4048_v39 = vpop.f32.mrb[45].mxu0  ;;  %v2035_v61 = vadd.f32 %v2031_v55, %v4683_v52 }
 0xfab   :  { %v2026_v53 = vpop.f32.mrb[46].mxu0 }
 0xfac   :  { %v4049_v63 = vpop.f32.mrb[47].mxu0  ;;  %v2043_v0 = vsel %vm549_vm3, %v2035_v61, -inf  ;;  %v2036_v11 = vadd.f32 %v2032_v25, %v4686_v58 }
 0xfad   :  { %2044 = vmax.xlane.f32.xlu0 %v2043_v0 }
 0xfae   :  { %v2046_v1 = vsel %vm549_vm3, %v2036_v11, -inf }
 0xfb1   :  { %2047 = vmax.xlane.f32.xlu0 %v2046_v1 }
 0xfb8   :  { %2133 = vrot.lane.b32.xlu1 %v4896_v27, %s4421_s5 }
 0xfbc   :  { %2181 = vrot.lane.b32.xlu1 %v4902_v17, %s4421_s5 }
 0xfc0   :  { %2229 = vrot.lane.b32.xlu1 %v4906_v19, %s4421_s5 }
0x1032   :  { %v2039_v59 = vpop.xlane.xlu0 %2038 }
0x1033   :  { %v2049_v3 = vsub.f32 %v2033_v46, %v2039_v59 }
0x1034   :  { %v2042_v7 = vpop.xlane.xlu1 %2041 }
0x1035   :  { %v2053_v60 = vmul.f32 1.442695, %v2049_v3  ;;  %v2050_v10 = vsub.f32 %v2034_v50, %v2042_v7 }
0x1037   :  { %4290 = vpow2.f32 %v2053_v60  ;;  %v2055_v12 = vmul.f32 1.442695, %v2050_v10 }
0x1038   :  { %v2134_v9 = vpop.permute.xlu1 %2133 }
0x1039   :  { %4292 = vpow2.f32 %v2055_v12  ;;  %v2139_v13 = vsel %vm603_vm4, %v2134_v9, 0 }
0x103a   :  { %4057 = vmatpush3.bf16.msra.mxu0 %v2139_v13  ;;  %v2045_v33 = vpop.xlane.xlu0 %2044 }
0x103b   :  { %4068 = vmatprep.subr.bf16.mxu0 %v4417_v62  ;;  %v2051_v23 = vsub.f32 %v2035_v61, %v2045_v33 }
0x103c   :  { %v2182_v40 = vpop.permute.xlu1 %2181 }
0x103d   :  { %v2057_v28 = vmul.f32 1.442695, %v2051_v23  ;;  %v2187_v8 = vsel %vm603_vm4, %v2182_v40, 0 }
0x103e   :  { %v2048_v20 = vpop.xlane.xlu0 %2047 }
0x103f   :  { %v2052_v24 = vsub.f32 %v2036_v11, %v2048_v20  ;;  %4294 = vpow2.f32 %v2057_v28 }
0x1040   :  { %v2230_v41 = vpop.permute.xlu1 %2229 }
0x1041   :  { %v4291_v14 = vpop.eup %4290  ;;  %v2059_v29 = vmul.f32 1.442695, %v2052_v24  ;;  %v2235_v55 = vsel %vm603_vm4, %v2230_v41, 0 }
0x1042   :  { %v2061_v5 = vsel %vm549_vm3, %v4291_v14, 0.0 }
0x1043   :  { %v4293_v16 = vpop.eup %4292  ;;  %2062 = vadd.xlane.f32.xlu0 %v2061_v5  ;;  %4296 = vpow2.f32 %v2059_v29 }
0x1044   :  { %v2064_v18 = vsel %vm549_vm3, %v4293_v16, 0.0 }
0x1045   :  { %2065 = vadd.xlane.f32.xlu1 %v2064_v18 }
0x1049   :  { %v4295_v30 = vpop.eup %4294 }
0x104a   :  { %v2067_v35 = vsel %vm549_vm3, %v4295_v30, 0.0 }
0x104d   :  { %v4297_v31 = vpop.eup %4296 }
0x104e   :  { %v2070_v36 = vsel %vm549_vm3, %v4297_v31, 0.0 }
0x1056   :  { %2331 = vrot.lane.b32.xlu1 %v4896_v27, %s4422_s21 }
0x1059   :  { %2085 = vrot.lane.b32.xlu0 %v4894_v15, %s4421_s5 }
0x1078   :  { %2068 = vadd.xlane.f32.xlu0 %v2067_v35 }
0x107a   :  { %2071 = vadd.xlane.f32.xlu1 %v2070_v36 }
0x108b   :  { %2329 = vrot.lane.b32.xlu1 %v4896_v27, %s4423_s25 }
0x108e   :  { %2281 = vrot.lane.b32.xlu0 %v4894_v15, %s4422_s21 }
0x108f   :  { %2431 = vrot.lane.b32.xlu1 %v4906_v19, %s4422_s21 }
0x1092   :  { %2279 = vrot.lane.b32.xlu0 %v4894_v15, %s4423_s25 }
0x1093   :  { %2429 = vrot.lane.b32.xlu1 %v4906_v19, %s4423_s25 }
0x1096   :  { %2381 = vrot.lane.b32.xlu0 %v4902_v17, %s4422_s21 }
0x109a   :  { %2379 = vrot.lane.b32.xlu0 %v4902_v17, %s4423_s25 }
0x10d0   :  { %v2063_v42 = vpop.xlane.xlu0 %2062 }
0x10d1   :  { %4298 = vrcp.f32 %v2063_v42 }
0x10d2   :  { %v2066_v43 = vpop.xlane.xlu1 %2065 }
0x10d3   :  { %4300 = vrcp.f32 %v2066_v43 }
0x10d4   :  { %v2086_v44 = vpop.permute.xlu0 %2085 }
0x10d5   :  { %v2091_v45 = vsel %vm603_vm4, %v2086_v44, 0 }
0x10d6   :  { %4051 = vmatpush3.bf16.msra.mxu1 %v2091_v45  ;;  %v2332_v56 = vpop.permute.xlu1 %2331 }
0x10d7   :  { %4062 = vmatprep.subr.bf16.mxu1 %v4417_v62  ;;  %v2337_v3 = vsel %vm302_vm2, %v2332_v56, 0 }
0x10db   :  { %v4299_v46 = vpop.eup %4298 }
0x10dc   :  { %v2077_v47 = vmul.f32 %v4299_v46, %v4291_v14 }
0x10dd   :  { %v4301_v48 = vpop.eup %4300 }
0x10de   :  { %v2078_v49 = vmul.f32 %v4301_v48, %v4293_v16  ;;  %v2081_v50 = vpack.c.bf16 %v2077_v47, %v2077_v47 }
0x10e0   :  { %4053 = vmatmul.mubr.msk.bf16.vlgmr.msra.gmra.mrb[52].mxu1 %vm549_vm3, %v2081_v50  ;;  %v2082_v51 = vpack.c.bf16 %v2078_v49, %v2078_v49 }
0x10e1   :  { %4063 = vmatpush3.bf16.msra.mxu1 %v2187_v8  ;;  %4064 = vmatprep.mubr.msk.bf16.mxu1 %vm4418_vm1, %v4417_v62 }
0x10e2   :  { %4059 = vmatmul.mubr.msk.bf16.vlgmr.msra.gmra.mrb[48].mxu0 %vm549_vm3, %v2082_v51  ;;  %4074 = vmatprep.subr.bf16.mxu1 %v4417_v62 }
0x10e3   :  { %4069 = vmatpush3.bf16.msra.mxu0 %v2235_v55  ;;  %4070 = vmatprep.mubr.msk.bf16.mxu0 %vm4418_vm1, %v4417_v62 }
0x10e4   :  { %4080 = vmatprep.subr.bf16.mxu0 %v4417_v62 }
0x1105   :  { %v2069_v57 = vpop.xlane.xlu0 %2068 }
0x1106   :  { %4302 = vrcp.f32 %v2069_v57 }
0x1107   :  { %v2072_v21 = vpop.xlane.xlu1 %2071 }
0x1108   :  { %4304 = vrcp.f32 %v2072_v21 }
0x1109   :  { %v2282_v25 = vpop.permute.xlu0 %2281 }
0x110a   :  { %v2287_v11 = vsel %vm302_vm2, %v2282_v25, 0 }
0x110b   :  { %v2330_v59 = vpop.permute.xlu1 %2329 }
0x110d   :  { %v2280_v0 = vpop.permute.xlu0 %2279 }
0x110f   :  { %v2432_v60 = vpop.permute.xlu1 %2431 }
0x1110   :  { %v4303_v37 = vpop.eup %4302  ;;  %v2437_v12 = vsel %vm302_vm2, %v2432_v60, 0 }
0x1111   :  { %v2079_v39 = vmul.f32 %v4303_v37, %v4295_v30  ;;  %v2382_v7 = vpop.permute.xlu0 %2381 }
0x1112   :  { %v4305_v61 = vpop.eup %4304  ;;  %v2387_v10 = vsel %vm302_vm2, %v2382_v7, 0 }
0x1113   :  { %v2080_v53 = vmul.f32 %v4305_v61, %v4297_v31  ;;  %v2083_v63 = vpack.c.bf16 %v2079_v39, %v2079_v39  ;;  %v2430_v13 = vpop.permute.xlu1 %2429 }
0x1115   :  { %4065 = vmatmul.mubr.msk.bf16.vlgmr.msra.gmra.mrb[56].mxu1 %vm549_vm3, %v2083_v63  ;;  %v2084_v1 = vpack.c.bf16 %v2080_v53, %v2080_v53  ;;  %v2380_v9 = vpop.permute.xlu0 %2379 }
0x1116   :  { %4075 = vmatpush3.bf16.xpose.msra.mxu1 %v2287_v11  ;;  %4076 = vmatprep.mubr.msk.bf16.mxu1 %vm4418_vm1, %v4417_v62 }
0x1117   :  { %4071 = vmatmul.mubr.msk.bf16.vlgmr.msra.gmra.mrb[52].mxu0 %vm549_vm3, %v2084_v1  ;;  %4086 = vmatprep.subr.bf16.mxu1 %v4417_v62 }
0x1118   :  { %4081 = vmatpush3.bf16.xpose.msra.mxu0 %v2337_v3  ;;  %4082 = vmatprep.mubr.msk.bf16.mxu0 %vm4418_vm1, %v4417_v62 }
0x1119   :  { %4092 = vmatprep.subr.bf16.mxu0 %v4417_v62 }
0x111d   :  { %4077 = vmatmul.mubr.msk.bf16.vlgmr.msra.gmra.mrb[60].mxu1 %vm302_vm2, %v2280_v0 }
0x111e   :  { %4087 = vmatpush3.bf16.xpose.msra.mxu1 %v2387_v10  ;;  %4088 = vmatprep.mubr.msk.bf16.mxu1 %vm4418_vm1, %v4417_v62 }
0x111f   :  { %4083 = vmatmul.mubr.msk.bf16.vlgmr.msra.gmra.mrb[56].mxu0 %vm302_vm2, %v2330_v59  ;;  %4098 = vmatprep.subr.bf16.mxu1 %v4417_v62 }
0x1120   :  { %4093 = vmatpush3.bf16.xpose.msra.mxu0 %v2437_v12  ;;  %4094 = vmatprep.mubr.msk.bf16.mxu0 %vm4418_vm1, %v4417_v62 }
0x1121   :  { %4104 = vmatprep.subr.bf16.mxu0 %v4417_v62 }
0x1125   :  { %4089 = vmatmul.mubr.msk.bf16.vlgmr.msra.gmra.mrb[64].mxu1 %vm302_vm2, %v2380_v9 }
0x1126   :  { %4100 = vmatprep.mubr.msk.bf16.mxu1 %vm4418_vm1, %v4417_v62 }
0x1127   :  { %4095 = vmatmul.mubr.msk.bf16.vlgmr.msra.gmra.mrb[60].mxu0 %vm302_vm2, %v2430_v13 }
0x1128   :  { %4106 = vmatprep.mubr.msk.bf16.mxu0 %vm4418_vm1, %v4417_v62 }
0x11b3   :  { %v5010_v14 = vpop.f32.mrb[52].mxu1 }
0x11b4   :  { %v4054_v5 = vpop.f32.mrb[53].mxu1 }
0x11b5   :  { %v2130_v16 = vpop.f32.mrb[54].mxu1  ;;  %v5012_v18 = vpop.f32.mrb[48].mxu0 }
0x11b6   :  { %v2277_v33 = vpack.c.bf16 %v5012_v18, %v5010_v14  ;;  %v4055_v20 = vpop.f32.mrb[55].mxu1  ;;  %v4060_v23 = vpop.f32.mrb[49].mxu0 }
0x11b7   :  { %v2178_v24 = vpop.f32.mrb[50].mxu0 }
0x11b8   :  { %v4061_v28 = vpop.f32.mrb[51].mxu0 }
0x11e8   :  { %v5016_v29 = vpop.f32.mrb[56].mxu1 }
0x11e9   :  { %v4066_v30 = vpop.f32.mrb[57].mxu1 }
0x11ea   :  { %v2226_v31 = vpop.f32.mrb[58].mxu1  ;;  %v5018_v35 = vpop.f32.mrb[52].mxu0 }
0x11eb   :  { %v2278_v36 = vpack.c.bf16 %v5018_v35, %v5016_v29  ;;  %v4067_v40 = vpop.f32.mrb[59].mxu1  ;;  %v4072_v41 = vpop.f32.mrb[53].mxu0 }
0x11ec   :  { %v2274_v42 = vpop.f32.mrb[54].mxu0 }
0x11ed   :  { %v4073_v43 = vpop.f32.mrb[55].mxu0 }
0x11f0   :  { %v2323_v44 = vpop.f32.mrb[60].mxu1 }
0x11f1   :  { %v2479_v45 = vmul.f32 0.25, %v2323_v44  ;;  %v4078_v46 = vpop.f32.mrb[61].mxu1 }
0x11f2   :  { %v2326_v47 = vpop.f32.mrb[62].mxu1  ;;  %v2373_v48 = vpop.f32.mrb[56].mxu0 }
0x11f3   :  { %v2480_v49 = vmul.f32 0.25, %v2373_v48  ;;  %v4079_v50 = vpop.f32.mrb[63].mxu1  ;;  %v4084_v8 = vpop.f32.mrb[57].mxu0  ;;  %v2483_v51 = vadd.f32 %v2479_v45, %v4673_v34 }
0x11f4   :  { %v2376_v55 = vpop.f32.mrb[58].mxu0 }
0x11f5   :  { %v4085_v56 = vpop.f32.mrb[59].mxu0  ;;  %v2487_v57 = vsel %vm549_vm3, %v2483_v51, -inf  ;;  %v2484_v21 = vadd.f32 %v2480_v49, %v4676_v38 }
0x11f6   :  { %2488 = vmax.xlane.f32.xlu0 %v2487_v57 }
0x11f7   :  { %v2490_v25 = vsel %vm549_vm3, %v2484_v21, -inf }
0x11f8   :  { %2491 = vmax.xlane.f32.xlu1 %v2490_v25  ;;  %v2423_v37 = vpop.f32.mrb[64].mxu1 }
0x11f9   :  { %v2481_v39 = vmul.f32 0.25, %v2423_v37  ;;  %v4090_v61 = vpop.f32.mrb[65].mxu1 }
0x11fa   :  { %v2426_v53 = vpop.f32.mrb[66].mxu1  ;;  %v2473_v63 = vpop.f32.mrb[60].mxu0 }
0x11fb   :  { %v2482_v0 = vmul.f32 0.25, %v2473_v63  ;;  %v4091_v11 = vpop.f32.mrb[67].mxu1  ;;  %v4096_v1 = vpop.f32.mrb[61].mxu0  ;;  %v2485_v34 = vadd.f32 %v2481_v39, %v4683_v52 }
0x11fc   :  { %v2476_v59 = vpop.f32.mrb[62].mxu0 }
0x11fd   :  { %v4097_v3 = vpop.f32.mrb[63].mxu0  ;;  %v2493_v7 = vsel %vm549_vm3, %v2485_v34, -inf  ;;  %v2486_v38 = vadd.f32 %v2482_v0, %v4686_v58  ;;  %v4219_v59 = vld [vmem:[%s5233_s24] sm:$0xff]  }
0x11fe   :  { %2494 = vmax.xlane.f32.xlu0 %v2493_v7 }
0x11ff   :  { %v2496_v60 = vsel %vm549_vm3, %v2486_v38, -inf }
0x1202   :  { %2497 = vmax.xlane.f32.xlu0 %v2496_v60 }
0x1283   :  { %v2489_v10 = vpop.xlane.xlu0 %2488 }
0x1284   :  { %v2499_v12 = vsub.f32 %v2483_v51, %v2489_v10 }
0x1285   :  { %v2492_v9 = vpop.xlane.xlu1 %2491 }
0x1286   :  { %v2503_v13 = vmul.f32 1.442695, %v2499_v12  ;;  %v2500_v5 = vsub.f32 %v2484_v21, %v2492_v9 }
0x1288   :  { %4306 = vpow2.f32 %v2503_v13  ;;  %v2505_v16 = vmul.f32 1.442695, %v2500_v5 }
0x128a   :  { %4308 = vpow2.f32 %v2505_v16 }
0x128b   :  { %v2495_v20 = vpop.xlane.xlu0 %2494 }
0x128c   :  { %v2501_v52 = vsub.f32 %v2485_v34, %v2495_v20  ;;  %v4218_v34 = vld [vmem:[%s5233_s24 + $0x8] sm:$0xff]  }
0x128e   :  { %v2507_v23 = vmul.f32 1.442695, %v2501_v52 }
0x128f   :  { %v2498_v41 = vpop.xlane.xlu0 %2497 }
0x1290   :  { %4310 = vpow2.f32 %v2507_v23  ;;  %v2502_v42 = vsub.f32 %v2486_v38, %v2498_v41 }
0x1292   :  { %v4307_v24 = vpop.eup %4306  ;;  %v2509_v43 = vmul.f32 1.442695, %v2502_v42 }
0x1293   :  { %v2511_v28 = vsel %vm549_vm3, %v4307_v24, 0.0 }
0x1294   :  { %v4309_v58 = vpop.eup %4308  ;;  %2512 = vadd.xlane.f32.xlu0 %v2511_v28  ;;  %4312 = vpow2.f32 %v2509_v43 }
0x1295   :  { %v2514_v30 = vsel %vm549_vm3, %v4309_v58, 0.0 }
0x1296   :  { %2515 = vadd.xlane.f32.xlu1 %v2514_v30 }
0x129a   :  { %v4311_v31 = vpop.eup %4310 }
0x129b   :  { %v2517_v40 = vsel %vm549_vm3, %v4311_v31, 0.0 }
0x129c   :  { %2518 = vadd.xlane.f32.xlu0 %v2517_v40  ;;  %v3758_v40 = vld [vmem:[%s5234_s30] ss:$0 sm:$0xff] }
0x129e   :  { %v4313_v44 = vpop.eup %4312 }
0x129f   :  { %v2520_v45 = vsel %vm549_vm3, %v4313_v44, 0.0 }
0x12a7   :  { %2583 = vrot.lane.b32.xlu1 %v4896_v27, %s4424_s29 }
0x12ab   :  { %2631 = vrot.lane.b32.xlu1 %v4902_v17, %s4424_s29 }
0x12b2   :  { %2535 = vrot.lane.b32.xlu0 %v4894_v15, %s4424_s29 }
0x12cf   :  { %2521 = vadd.xlane.f32.xlu1 %v2520_v45 }
0x12e0   :  { %2679 = vrot.lane.b32.xlu1 %v4906_v19, %s4424_s29 }
0x1321   :  { %v2513_v46 = vpop.xlane.xlu0 %2512 }
0x1322   :  { %4314 = vrcp.f32 %v2513_v46 }
0x1323   :  { %v2516_v27 = vpop.xlane.xlu1 %2515 }
0x1324   :  { %4316 = vrcp.f32 %v2516_v27 }
0x1327   :  { %v2584_v47 = vpop.permute.xlu1 %2583 }
0x1328   :  { %v2589_v17 = vsel %vm603_vm4, %v2584_v47, 0 }
0x1329   :  { %4105 = vmatpush3.bf16.msra.mxu0 %v2589_v17  ;;  %v2519_v15 = vpop.xlane.xlu0 %2518 }
0x132a   :  { %4318 = vrcp.f32 %v2519_v15  ;;  %4116 = vmatprep.subr.bf16.mxu0 %v4417_v62 }
0x132b   :  { %v2632_v19 = vpop.permute.xlu1 %2631 }
0x132c   :  { %v4315_v48 = vpop.eup %4314  ;;  %v2637_v21 = vsel %vm603_vm4, %v2632_v19, 0 }
0x132d   :  { %v2527_v49 = vmul.f32 %v4315_v48, %v4307_v24  ;;  %v2536_v50 = vpop.permute.xlu0 %2535 }
0x132e   :  { %v4317_v8 = vpop.eup %4316  ;;  %v2541_v51 = vsel %vm603_vm4, %v2536_v50, 0 }
0x132f   :  { %v2528_v55 = vmul.f32 %v4317_v8, %v4309_v58  ;;  %4099 = vmatpush3.bf16.msra.mxu1 %v2541_v51  ;;  %v2531_v56 = vpack.c.bf16 %v2527_v49, %v2527_v49 }
0x1330   :  { %4110 = vmatprep.subr.bf16.mxu1 %v4417_v62 }
0x1331   :  { %v2532_v57 = vpack.c.bf16 %v2528_v55, %v2528_v55 }
0x1332   :  { %4101 = vmatmul.mubr.msk.bf16.vlgmr.msra.gmra.mrb[68].mxu1 %vm549_vm3, %v2531_v56 }
0x1333   :  { %4107 = vmatmul.mubr.msk.bf16.vlgmr.msra.gmra.mrb[64].mxu0 %vm549_vm3, %v2532_v57  ;;  %4111 = vmatpush3.bf16.msra.mxu1 %v2637_v21 }
0x1334   :  { %v4319_v25 = vpop.eup %4318  ;;  %4112 = vmatprep.mubr.msk.bf16.mxu1 %vm4418_vm1, %v4417_v62  ;;  %4118 = vmatprep.mubr.msk.bf16.mxu0 %vm4418_vm1, %v4417_v62 }
0x1335   :  { %v2529_v37 = vmul.f32 %v4319_v25, %v4311_v31  ;;  %4122 = vmatprep.subr.bf16.mxu1 %v4218_v34 }
0x1337   :  { %v2533_v39 = vpack.c.bf16 %v2529_v37, %v2529_v37 }
0x133a   :  { %4113 = vmatmul.mubr.msk.bf16.vlgmr.msra.gmra.mrb[72].mxu1 %vm549_vm3, %v2533_v39 }
0x133b   :  { %4123 = vmatpush3.bf16.msra.mxu1 %v4218_v34 }
0x133c   :  { %4128 = vmatprep.subr.bf16.mxu1 %v4219_v59 }
0x135c   :  { %v2522_v61 = vpop.xlane.xlu1 %2521 }
0x135d   :  { %4320 = vrcp.f32 %v2522_v61 }
0x1360   :  { %v2680_v53 = vpop.permute.xlu1 %2679 }
0x1361   :  { %v2685_v63 = vsel %vm603_vm4, %v2680_v53, 0 }
0x1362   :  { %4117 = vmatpush3.bf16.msra.mxu0 %v2685_v63 }
0x1367   :  { %v4321_v0 = vpop.eup %4320 }
0x1368   :  { %v2530_v11 = vmul.f32 %v4321_v0, %v4313_v44  ;;  %v4220_v0 = vld [vmem:[%s5235_s6] sm:$0xff]  }
0x1369   :  { %4134 = vmatprep.subr.bf16.mxu0 %v4220_v0 }
0x136a   :  { %v2534_v1 = vpack.c.bf16 %v2530_v11, %v2530_v11  ;;  %v4221_v11 = vld [vmem:[%s5235_s6 + $0x8] sm:$0xff]  }
0x136c   :  { %4119 = vmatmul.mubr.msk.bf16.vlgmr.msra.gmra.mrb[68].mxu0 %vm549_vm3, %v2534_v1 }
0x136d   :  { %4135 = vmatpush3.bf16.msra.mxu0 %v4220_v0 }
0x136e   :  { %4136 = vmatprep.subr.bf16.mxu0 %v4221_v11 }
0x1371   :  { %4137 = vmatpush3.bf16.msra.mxu0 %v4221_v11 }
0x1405   :  { %v2577_v3 = vpop.f32.mrb[68].mxu1 }
0x1406   :  { %v4102_v7 = vpop.f32.mrb[69].mxu1  ;;  %v2625_v38 = vpop.f32.mrb[64].mxu0 }
0x1407   :  { %v2727_v60 = vpack.c.bf16 %v2625_v38, %v2577_v3  ;;  %v2580_v10 = vpop.f32.mrb[70].mxu1  ;;  %v4108_v12 = vpop.f32.mrb[65].mxu0 }
0x1408   :  { %v4103_v9 = vpop.f32.mrb[71].mxu1  ;;  %v2628_v13 = vpop.f32.mrb[66].mxu0 }
0x1409   :  { %v4109_v5 = vpop.f32.mrb[67].mxu0  ;;  %4124 = vmatprep.mubr.msk.bf16.mxu1 %vm302_vm2, %v2727_v60 }
0x140d   :  { %v2673_v16 = vpop.f32.mrb[72].mxu1 }
0x140e   :  { %v4114_v20 = vpop.f32.mrb[73].mxu1 }
0x140f   :  { %v2676_v52 = vpop.f32.mrb[74].mxu1  ;;  %v3759_v20 = vld [vmem:[%s5236_s12] ss:$0 sm:$0xff] }
0x1410   :  { %v4115_v23 = vpop.f32.mrb[75].mxu1 }
0x143f   :  { %v2721_v24 = vpop.f32.mrb[68].mxu0 }
0x1440   :  { %v2728_v28 = vpack.c.bf16 %v2721_v24, %v2673_v16  ;;  %v4120_v58 = vpop.f32.mrb[69].mxu0 }
0x1441   :  { %v2724_v30 = vpop.f32.mrb[70].mxu0 }
0x1442   :  { %v4121_v31 = vpop.f32.mrb[71].mxu0  ;;  %4125 = vmatmul.mubr.msk.bf16.vlgmr.msra.gmra.mrb[76].mxu1 %vm302_vm2, %v2728_v28  ;;  %v3760_v30 = vld [vmem:[%s5237_s20] ss:$0 sm:$0xff] }
0x1443   :  { %4129 = vmatpush3.bf16.msra.mxu1 %v4219_v59  ;;  %4130 = vmatprep.mubr.msk.bf16.mxu1 %vm302_vm2, %v2277_v33 }
0x144e   :  { %4131 = vmatmul.mubr.msk.bf16.vlgmr.msra.gmra.mrb[76].mxu1 %vm302_vm2, %v2278_v36 }
0x1521   :  { %v4132_v41 = vpop.f32.mrb[76].mxu1 }
0x1522   :  { %v2836_v42 = vpop.f32.mrb[77].mxu1  ;;  %v2860_v43 = vadd.f32 %v4132_v41, %v3758_v40 }
0x1523   :  { %v2858_v44 = vadd.f32 %v3758_v40, %v2836_v42  ;;  %v4133_v45 = vpop.f32.mrb[78].mxu1 }
0x1524   :  { %v2839_v46 = vpop.f32.mrb[79].mxu1  ;;  %v2861_v17 = vadd.f32 %v4133_v45, %v3758_v40  ;;  %v2864_v33 = vadd.f32 %v2860_v43, %v4884_v4 }
0x1525   :  { %v2859_v27 = vadd.f32 %v3758_v40, %v2839_v46  ;;  %v2862_v47 = vadd.f32 %v2858_v44, %v4877_v54 }
0x1526   :  { %v2865_v35 = vadd.f32 %v2861_v17, %v4886_v6  ;;  %v2874_v36 = vsel %vm137_vm0, %v2864_v33, 0.0 }
0x1527   :  { %v2863_v14 = vadd.f32 %v2859_v27, %v4879_v2  ;;  %v2868_v18 = vsel %vm137_vm0, %v2862_v47, 0.0 }
0x1528   :  { %2869 = vadd.xlane.f32.xlu0 %v2868_v18  ;;  %v2877_v15 = vsel %vm137_vm0, %v2865_v35, 0.0  ;;  %v4222_v18 = vld [vmem:[%s5238_s15] sm:$0xff]  }
0x1529   :  { %v2871_v29 = vsel %vm137_vm0, %v2863_v14, 0.0  ;;  %4142 = vmatprep.subr.bf16.mxu0 %v4222_v18 }
0x152a   :  { %2872 = vadd.xlane.f32.xlu1 %v2871_v29  ;;  %v4224_v29 = vld [vmem:[%s5238_s15 + $0x10] sm:$0xff]  }
0x152c   :  { %2875 = vadd.xlane.f32.xlu0 %v2874_v36  ;;  %v3761_v36 = vld [vmem:[%s5239_s16] ss:$0 sm:$0xff] }
0x1530   :  { %2878 = vadd.xlane.f32.xlu0 %v2877_v15 }
0x15b5   :  { %v2870_v54 = vpop.xlane.xlu0 %2869 }
0x15b6   :  { %v2880_v48 = vmul.f32 0.03125, %v2870_v54 }
0x15b7   :  { %v2873_v49 = vpop.xlane.xlu1 %2872 }
0x15b8   :  { %v2884_v2 = vsub.f32 %v2862_v47, %v2880_v48  ;;  %v2881_v50 = vmul.f32 0.03125, %v2873_v49 }
0x15b9   :  { %v2876_v8 = vpop.xlane.xlu0 %2875 }
0x15ba   :  { %v2885_v51 = vsub.f32 %v2863_v14, %v2881_v50  ;;  %v2882_v4 = vmul.f32 0.03125, %v2876_v8  ;;  %v2888_v55 = vmul.f32 %v2884_v2, %v2884_v2 }
0x15bc   :  { %v2886_v19 = vsub.f32 %v2864_v33, %v2882_v4  ;;  %v2892_v56 = vsel %vm137_vm0, %v2888_v55, 0.0  ;;  %v2889_v6 = vmul.f32 %v2885_v51, %v2885_v51  ;;  %v4223_v33 = vld [vmem:[%s5238_s15 + $0x8] sm:$0xff]  }
0x15bd   :  { %2893 = vadd.xlane.f32.xlu0 %v2892_v56  ;;  %v2879_v57 = vpop.xlane.xlu0 %2878 }
0x15be   :  { %v2883_v21 = vmul.f32 0.03125, %v2879_v57  ;;  %v2895_v25 = vsel %vm137_vm0, %v2889_v6, 0.0  ;;  %v2890_v37 = vmul.f32 %v2886_v19, %v2886_v19 }
0x15bf   :  { %2896 = vadd.xlane.f32.xlu1 %v2895_v25 }
0x15c0   :  { %v2887_v39 = vsub.f32 %v2865_v35, %v2883_v21  ;;  %v2898_v61 = vsel %vm137_vm0, %v2890_v37, 0.0  ;;  %v4225_v35 = vld [vmem:[%s5238_s15 + $0x18] sm:$0xff]  }
0x15c1   :  { %2899 = vadd.xlane.f32.xlu0 %v2898_v61 }
0x15c2   :  { %v2891_v53 = vmul.f32 %v2887_v39, %v2887_v39 }
0x15c4   :  { %v2901_v63 = vsel %vm137_vm0, %v2891_v53, 0.0 }
0x15c5   :  { %2902 = vadd.xlane.f32.xlu1 %v2901_v63 }
0x164a   :  { %v2894_v1 = vpop.xlane.xlu0 %2893 }
0x164b   :  { %v2904_v34 = vmul.f32 0.03125, %v2894_v1 }
0x164c   :  { %v2897_v59 = vpop.xlane.xlu1 %2896 }
0x164d   :  { %v2908_v3 = vadd.f32 1e-12, %v2904_v34  ;;  %v2905_v7 = vmul.f32 0.03125, %v2897_v59 }
0x164e   :  { %v2900_v38 = vpop.xlane.xlu0 %2899 }
0x164f   :  { %4322 = vrsqrt.f32 %v2908_v3  ;;  %v2909_v60 = vadd.f32 1e-12, %v2905_v7  ;;  %v2906_v10 = vmul.f32 0.03125, %v2900_v38 }
0x1651   :  { %4324 = vrsqrt.f32 %v2909_v60  ;;  %v2910_v12 = vadd.f32 1e-12, %v2906_v10 }
0x1652   :  { %v2903_v9 = vpop.xlane.xlu1 %2902 }
0x1653   :  { %4326 = vrsqrt.f32 %v2910_v12  ;;  %v2907_v13 = vmul.f32 0.03125, %v2903_v9 }
0x1655   :  { %v2911_v5 = vadd.f32 1e-12, %v2907_v13 }
0x1657   :  { %4328 = vrsqrt.f32 %v2911_v5 }
0x1659   :  { %v4323_v16 = vpop.eup %4322 }
0x165a   :  { %v2916_v52 = vmul.f32 %v4323_v16, %v2884_v2 }
0x165b   :  { %v4325_v23 = vpop.eup %4324 }
0x165c   :  { %v2917_v24 = vmul.f32 %v4325_v23, %v2885_v51  ;;  %v2926_v28 = vmul.f32 %v3759_v20, %v2916_v52 }
0x165d   :  { %v4327_v58 = vpop.eup %4326 }
0x165e   :  { %v2918_v31 = vmul.f32 %v4327_v58, %v2886_v19  ;;  %v2927_v40 = vmul.f32 %v3759_v20, %v2917_v24  ;;  %v5085_v41 = vadd.f32 %v3760_v30, %v2926_v28 }
0x1660   :  { %v5087_v42 = vadd.f32 %v3760_v30, %v2927_v40  ;;  %v2928_v44 = vmul.f32 %v3759_v20, %v2918_v31 }
0x1661   :  { %v4329_v43 = vpop.eup %4328 }
0x1662   :  { %v2919_v45 = vmul.f32 %v4329_v43, %v2887_v39  ;;  %v2940_v46 = vpack.c.bf16 %v5087_v42, %v5085_v41  ;;  %v5092_v47 = vadd.f32 %v3760_v30, %v2928_v44  ;;  %v3766_v44 = vld [vmem:[%s4570_s13] ss:$0 sm:$0xff]  ;;  %s5241_s13 = sld [smem:[#allocation6_spill]] }
0x1664   :  { %v2929_v27 = vmul.f32 %v3759_v20, %v2919_v45  ;;  %4138 = vmatprep.mubr.msk.bf16.mxu0 %vm137_vm0, %v2940_v46 }
0x1666   :  { %v5094_v17 = vadd.f32 %v3760_v30, %v2929_v27 }
0x1668   :  { %v2941_v14 = vpack.c.bf16 %v5094_v17, %v5092_v47 }
0x166a   :  { %4139 = vmatmul.mubr.msk.bf16.vlgmr.msra.gmra.mrb[72].mxu0 %vm137_vm0, %v2941_v14 }
0x166b   :  { %4143 = vmatpush3.bf16.msra.mxu0 %v4222_v18 }
0x166c   :  { %4144 = vmatprep.subr.bf16.mxu0 %v4223_v33 }
0x166f   :  { %4145 = vmatpush3.bf16.msra.mxu0 %v4223_v33 }
0x1670   :  { %4146 = vmatprep.subr.bf16.mxu0 %v4224_v29 }
0x1673   :  { %4147 = vmatpush3.bf16.msra.mxu0 %v4224_v29 }
0x1674   :  { %4148 = vmatprep.subr.bf16.mxu0 %v4225_v35 }
0x1677   :  { %4149 = vmatpush3.bf16.msra.mxu0 %v4225_v35 }
0x173d   :  { %v4140_v15 = vpop.f32.mrb[72].mxu0 }
0x173e   :  { %v3014_v54 = vadd.f32 %v4140_v15, %v3761_v36  ;;  %v3005_v48 = vpop.f32.mrb[73].mxu0 }
0x173f   :  { %v3006_v49 = vadd.f32 %v3761_v36, %v3005_v48  ;;  %v4141_v2 = vpop.f32.mrb[74].mxu0 }
0x1740   :  { %v3026_v50 = vmul.f32 0.044715, %v3014_v54  ;;  %v3017_v8 = vadd.f32 %v4141_v2, %v3761_v36  ;;  %v3008_v51 = vpop.f32.mrb[75].mxu0  ;;  %v3022_v5 = vmul.f32 0.5, %v3014_v54 }
0x1741   :  { %v3024_v4 = vmul.f32 0.044715, %v3006_v49  ;;  %v3009_v55 = vadd.f32 %v3761_v36, %v3008_v51  ;;  %v3020_v52 = vmul.f32 0.5, %v3006_v49 }
0x1742   :  { %v3030_v19 = vmul.f32 %v3026_v50, %v3014_v54  ;;  %v3027_v56 = vmul.f32 0.044715, %v3017_v8  ;;  %v3023_v16 = vmul.f32 0.5, %v3017_v8 }
0x1743   :  { %v3028_v6 = vmul.f32 %v3024_v4, %v3006_v49  ;;  %v3025_v57 = vmul.f32 0.044715, %v3009_v55  ;;  %v3021_v23 = vmul.f32 0.5, %v3009_v55 }
0x1744   :  { %v3034_v21 = vmul.f32 %v3030_v19, %v3014_v54  ;;  %v3031_v25 = vmul.f32 %v3027_v56, %v3017_v8 }
0x1745   :  { %v3032_v37 = vmul.f32 %v3028_v6, %v3006_v49  ;;  %v3029_v39 = vmul.f32 %v3025_v57, %v3009_v55 }
0x1746   :  { %v3038_v61 = vadd.f32 %v3034_v21, %v3014_v54  ;;  %v3035_v53 = vmul.f32 %v3031_v25, %v3017_v8 }
0x1747   :  { %v3036_v63 = vadd.f32 %v3032_v37, %v3006_v49  ;;  %v3033_v0 = vmul.f32 %v3029_v39, %v3009_v55 }
0x1748   :  { %v3042_v11 = vmul.f32 0.7978846, %v3038_v61  ;;  %v3039_v1 = vadd.f32 %v3035_v53, %v3017_v8 }
0x1749   :  { %v3040_v34 = vmul.f32 0.7978846, %v3036_v63  ;;  %v3037_v59 = vadd.f32 %v3033_v0, %v3009_v55 }
0x174a   :  { %4330 = vtanh.f32 %v3042_v11  ;;  %v3043_v3 = vmul.f32 0.7978846, %v3039_v1  ;;  %v4362_v1 = vld [vmem:[%s4440_s9] sm:$0xf]  ;;  %s5240_s9 = sld [smem:[#allocation5_spill]] }
0x174b   :  { %4332 = vtanh.f32 %v3040_v34  ;;  %v3041_v7 = vmul.f32 0.7978846, %v3037_v59  ;;  %v3291_v34 = vsel %vm3290_vm6, %v4362_v1, 0.0  ;;  %v5121_v59 = vsub.s32 1, %v4666_v26 }
0x174c   :  { %4334 = vtanh.f32 %v3043_v3 }
0x174d   :  { %4336 = vtanh.f32 %v3041_v7  ;;  %v3240_v3 = vrot.slane %v4362_v1, %v5121_v59  ;;  %v3233_v7 = vrot.slane %v4362_v1, %v4670_v32 }
0x1754   :  { %v4331_v38 = vpop.eup %4330 }
0x1755   :  { %v4333_v60 = vpop.eup %4332  ;;  %v3050_v10 = vadd.f32 1.0, %v4331_v38  ;;  %v5126_v38 = vsub.s32 3, %v4666_v26 }
0x1756   :  { %v4335_v12 = vpop.eup %4334  ;;  %v3048_v9 = vadd.f32 1.0, %v4333_v60  ;;  %v5129_v60 = vsub.s32 2, %v4666_v26 }
0x1757   :  { %v4337_v13 = vpop.eup %4336  ;;  %v3051_v20 = vadd.f32 1.0, %v4335_v12  ;;  %v3054_v28 = vmul.f32 %v3050_v10, %v3022_v5  ;;  %v3254_v10 = vrot.slane %v4362_v1, %v5126_v38 }
0x1758   :  { %v3049_v24 = vadd.f32 1.0, %v4337_v13  ;;  %v3052_v30 = vmul.f32 %v3048_v9, %v3020_v52  ;;  %v3247_v12 = vrot.slane %v4362_v1, %v5129_v60 }
0x1759   :  { %v3055_v58 = vmul.f32 %v3051_v20, %v3023_v16 }
0x175a   :  { %v3053_v31 = vmul.f32 %v3049_v24, %v3021_v23 }
0x175b   :  { %v3057_v40 = vpack.c.bf16 %v3055_v58, %v3054_v28 }
0x175c   :  { %v3056_v43 = vpack.c.bf16 %v3053_v31, %v3052_v30 }
0x175e   :  { %4150 = vmatprep.mubr.msk.bf16.mxu0 %vm1611_vm5, %v3056_v43 }
0x175f   :  { %4151 = vmatmul.mubr.msk.bf16.vlgmr.msra.gmra.mrb[76].mxu0 %vm1611_vm5, %v3057_v40 }
0x1832   :  { %v4152_v45 = vpop.f32.mrb[76].mxu0 }
0x1833   :  { %v3146_v46 = vadd.f32 %v4152_v45, %v3766_v44  ;;  %v3137_v27 = vpop.f32.mrb[77].mxu0  ;;  %v3773_v45 = vld [vmem:[%s4575_s27] ss:$0 sm:$0xff]  ;;  %s4426_s27 = smov [#allocation2]  }
0x1834   :  { %v4153_v14 = vpop.f32.mrb[78].mxu0  ;;  %v3138_v35 = vadd.f32 %v3766_v44, %v3137_v27  ;;  %v3774_v27 = vld [vmem:[%s4580_s4] ss:$0 sm:$0xff]  ;;  %s3647_s4 = sshll.u32 %s4426_s27, 4  ;;  %s3648_s4 = int_to_ptr.vmem [resolvable:$true] %s3647_s4 }
0x1835   :  { %v3154_v18 = vadd.f32 %v3146_v46, %v5092_v47  ;;  %v3149_v33 = vadd.f32 %v4153_v14, %v3766_v44  ;;  %v3140_v29 = vpop.f32.mrb[79].mxu0  ;;  %s4363_s22 = scalar_lea.vmem %s3648_s4, 16  ;;  %s4367_s23 = scalar_lea.vmem %s3648_s4, 32 }
0x1836   :  { %v3141_v36 = vadd.f32 %v3766_v44, %v3140_v29  ;;  %v3152_v49 = vadd.f32 %v3138_v35, %v5085_v41  ;;  %p4364_p0 = scmp.ne.s32.totalorder %s3648_s4, %s4363_s22  ;;  %p4368_p1 = scmp.lt.s32.totalorder %s3648_s4, %s3648_s4 }
0x1837   :  { %v3155_v15 = vadd.f32 %v3149_v33, %v5094_v17  ;;  %v3164_v54 = vsel %vm137_vm0, %v3154_v18, 0.0  ;;  %p4369_p2 = scmp.lt.s32.totalorder %s4367_s23, %s4363_s22 }
0x1838   :  { %v3153_v48 = vadd.f32 %v3141_v36, %v5087_v42  ;;  %3165 = vadd.xlane.f32.xlu1 %v3164_v54  ;;  %v3158_v47 = vsel %vm137_vm0, %v3152_v49, 0.0 }
0x1839   :  { %v3167_v50 = vsel %vm137_vm0, %v3155_v15, 0.0  ;;  %p4370_p3 = por %p4369_p2, %p4368_p1 }
0x183a   :  { %v3161_v2 = vsel %vm137_vm0, %v3153_v48, 0.0 }
0x183b   :  { %3162 = vadd.xlane.f32.xlu0 %v3161_v2  ;;  %p4371_p4 = pnand %p4370_p3, %p4364_p0 }
0x183c   :  { %3168 = vadd.xlane.f32.xlu1 %v3167_v50 }
0x183f   :  { %3159 = vadd.xlane.f32.xlu0 %v3158_v47 }
0x18c5   :  { %v3166_v8 = vpop.xlane.xlu1 %3165 }
0x18c6   :  { %v3172_v51 = vmul.f32 0.03125, %v3166_v8 }
0x18c8   :  { %v3176_v4 = vsub.f32 %v3154_v18, %v3172_v51  ;;  %v3163_v17 = vpop.xlane.xlu0 %3162 }
0x18c9   :  { %v3171_v55 = vmul.f32 0.03125, %v3163_v17  ;;  %v3169_v19 = vpop.xlane.xlu1 %3168 }
0x18ca   :  { %v3173_v56 = vmul.f32 0.03125, %v3169_v19  ;;  %v3180_v42 = vmul.f32 %v3176_v4, %v3176_v4 }
0x18cb   :  { %v3175_v6 = vsub.f32 %v3153_v48, %v3171_v55 }
0x18cc   :  { %v3177_v57 = vsub.f32 %v3155_v15, %v3173_v56  ;;  %v3160_v41 = vpop.xlane.xlu0 %3159  ;;  %v3188_v21 = vsel %vm137_vm0, %v3180_v42, 0.0 }
0x18cd   :  { %v3170_v25 = vmul.f32 0.03125, %v3160_v41  ;;  %3189 = vadd.xlane.f32.xlu1 %v3188_v21  ;;  %v3179_v37 = vmul.f32 %v3175_v6, %v3175_v6 }
0x18ce   :  { %v3181_v39 = vmul.f32 %v3177_v57, %v3177_v57 }
0x18cf   :  { %v3174_v61 = vsub.f32 %v3152_v49, %v3170_v25  ;;  %v3185_v53 = vsel %vm137_vm0, %v3179_v37, 0.0 }
0x18d0   :  { %3186 = vadd.xlane.f32.xlu0 %v3185_v53  ;;  %v3191_v63 = vsel %vm137_vm0, %v3181_v39, 0.0 }
0x18d1   :  { %3192 = vadd.xlane.f32.xlu1 %v3191_v63  ;;  %v3178_v0 = vmul.f32 %v3174_v61, %v3174_v61 }
0x18d3   :  { %v3182_v11 = vsel %vm137_vm0, %v3178_v0, 0.0 }
0x18d4   :  { %3183 = vadd.xlane.f32.xlu0 %v3182_v11 }
0x18d8   :  { %3292 = vadd.xlane.f32.xlu0 %v3291_v34 }
0x18e2   :  { %3242 = vbcast.lane.b32.xlu1 %v3240_v3, 256 }
0x18e6   :  { %3235 = vbcast.lane.b32.xlu1 %v3233_v7, 256 }
0x18ea   :  { %3256 = vbcast.lane.b32.xlu1 %v3254_v10, 256 }
0x18ee   :  { %3249 = vbcast.lane.b32.xlu0 %v3247_v12, 256 }
0x195a   :  { %v3190_v9 = vpop.xlane.xlu1 %3189 }
0x195b   :  { %v3196_v13 = vmul.f32 0.03125, %v3190_v9 }
0x195d   :  { %v3200_v5 = vadd.f32 1e-12, %v3196_v13  ;;  %v3187_v16 = vpop.xlane.xlu0 %3186 }
0x195e   :  { %v3195_v20 = vmul.f32 0.03125, %v3187_v16  ;;  %v3193_v52 = vpop.xlane.xlu1 %3192 }
0x195f   :  { %4338 = vrsqrt.f32 %v3200_v5  ;;  %v3197_v23 = vmul.f32 0.03125, %v3193_v52 }
0x1960   :  { %v3199_v24 = vadd.f32 1e-12, %v3195_v20 }
0x1961   :  { %v3201_v28 = vadd.f32 1e-12, %v3197_v23  ;;  %v3184_v58 = vpop.xlane.xlu0 %3183 }
0x1962   :  { %4340 = vrsqrt.f32 %v3199_v24  ;;  %v3194_v30 = vmul.f32 0.03125, %v3184_v58  ;;  %v3243_v40 = vpop.permute.xlu1 %3242 }
0x1963   :  { %4342 = vrsqrt.f32 %v3201_v28 }
0x1964   :  { %v3198_v31 = vadd.f32 1e-12, %v3194_v30 }
0x1965   :  { %v3293_v43 = vpop.xlane.xlu0 %3292 }
0x1966   :  { %4344 = vrsqrt.f32 %v3198_v31  ;;  %v3236_v14 = vpop.permute.xlu1 %3235  ;;  %v3294_v33 = vmax.f32 %v3293_v43, 1e-09 }
0x1968   :  { %4346 = vrcp.f32 %v3294_v33 }
0x1969   :  { %v4339_v44 = vpop.eup %4338  ;;  %v3250_v15 = vpop.permute.xlu0 %3249 }
0x196a   :  { %v3208_v46 = vmul.f32 %v4339_v44, %v3176_v4  ;;  %v3257_v17 = vpop.permute.xlu1 %3256 }
0x196c   :  { %v4341_v18 = vpop.eup %4340  ;;  %v3218_v29 = vmul.f32 %v3773_v45, %v3208_v46 }
0x196d   :  { %v4343_v35 = vpop.eup %4342  ;;  %v3207_v36 = vmul.f32 %v4341_v18, %v3175_v6 }
0x196e   :  { %v3228_v54 = vadd.f32 %v3774_v27, %v3218_v29  ;;  %v3209_v48 = vmul.f32 %v4343_v35, %v3177_v57 }
0x196f   :  { %v3217_v49 = vmul.f32 %v3773_v45, %v3207_v36 }
0x1970   :  { %v4345_v2 = vpop.eup %4344  ;;  %v3260_v50 = vmul.f32 %v3250_v15, %v3228_v54  ;;  %v3219_v47 = vmul.f32 %v3773_v45, %v3209_v48 }
0x1971   :  { %v3227_v8 = vadd.f32 %v3774_v27, %v3217_v49  ;;  %v3206_v51 = vmul.f32 %v4345_v2, %v3174_v61 }
0x1972   :  { %v3276_v4 = vsel %vm137_vm0, %v3260_v50, 0.0  ;;  %v3229_v55 = vadd.f32 %v3774_v27, %v3219_v47  ;;  %v4347_v34 = vpop.eup %4346 }
0x1973   :  { %v3259_v19 = vmul.f32 %v3243_v40, %v3227_v8  ;;  %v3216_v56 = vmul.f32 %v3773_v45, %v3206_v51  ;;  %v3277_v42 = vrot.slane %v3276_v4, 4  ;;  %v3298_v5 = vrot.slane %v4347_v34, 2 }
0x1974   :  { %v3261_v41 = vmul.f32 %v3257_v17, %v3229_v55  ;;  %v3297_v24 = vrot.slane %v4347_v34, 1  ;;  %v3299_v43 = vrot.slane %v4347_v34, 3 }
0x1975   :  { %v3269_v6 = vsel %vm137_vm0, %v3259_v19, 0.0  ;;  %v3226_v21 = vadd.f32 %v3774_v27, %v3216_v56  ;;  %v3278_v25 = vadd.f32 %v3277_v42, %v3276_v4 }
0x1976   :  { %v3270_v57 = vrot.slane %v3269_v6, 4  ;;  %v3283_v37 = vsel %vm137_vm0, %v3261_v41, 0.0 }
0x1977   :  { %v3258_v39 = vmul.f32 %v3236_v14, %v3226_v21  ;;  %v3279_v53 = vrot.slane %v3278_v25, 2  ;;  %v3284_v63 = vrot.slane %v3283_v37, 4 }
0x1978   :  { %v3271_v0 = vadd.f32 %v3270_v57, %v3269_v6 }
0x1979   :  { %v3262_v61 = vsel %vm137_vm0, %v3258_v39, 0.0  ;;  %v3280_v11 = vadd.f32 %v3279_v53, %v3278_v25  ;;  %v3285_v1 = vadd.f32 %v3284_v63, %v3283_v37 }
0x197a   :  { %v3272_v3 = vrot.slane %v3271_v0, 2  ;;  %v3263_v7 = vrot.slane %v3262_v61, 4 }
0x197b   :  { %v3281_v10 = vrot.slane %v3280_v11, 1  ;;  %v3286_v12 = vrot.slane %v3285_v1, 2 }
0x197c   :  { %v3273_v9 = vadd.f32 %v3272_v3, %v3271_v0  ;;  %v3264_v13 = vadd.f32 %v3263_v7, %v3262_v61 }
0x197d   :  { %v3282_v16 = vadd.f32 %v3281_v10, %v3280_v11  ;;  %v3287_v20 = vadd.f32 %v3286_v12, %v3285_v1 }
0x197e   :  { %v3274_v52 = vrot.slane %v3273_v9, 1  ;;  %v3265_v23 = vrot.slane %v3264_v13, 2 }
0x197f   :  { %v3288_v28 = vrot.slane %v3287_v20, 1  ;;  %v3306_v31 = vmul.f32 %v3298_v5, %v3282_v16 }
0x1980   :  { %v3275_v58 = vadd.f32 %v3274_v52, %v3273_v9  ;;  %v3266_v30 = vadd.f32 %v3265_v23, %v3264_v13  ;;  %v3396_v13 = vand.u32 127, %v504_v22 }
0x1981   :  { %v3289_v40 = vadd.f32 %v3288_v28, %v3287_v20  ;;  %v3310_v18 = vmul.f32 %v3306_v31, %v3306_v31 }
0x1982   :  { %v3267_v44 = vrot.slane %v3266_v30, 1  ;;  %v3305_v45 = vmul.f32 %v3297_v24, %v3275_v58  ;;  %vm3464_vm11 = vcmp.ne.s32.totalorder %v4666_v26, %v3396_v13  ;;  %v5166_v58 = vsub.s32 %v3396_v13, %v4666_v26 }
0x1983   :  { %v3307_v46 = vmul.f32 %v3299_v43, %v3289_v40  ;;  %v3319_v15 = vrot.slane %v3310_v18, 6  ;;  %v5157_v5 = vsel %vm3464_vm11, 1.0, %v4417_v62 }
0x1984   :  { %v3268_v27 = vadd.f32 %v3267_v44, %v3266_v30  ;;  %v3309_v14 = vmul.f32 %v3305_v45, %v3305_v45  ;;  %v3480_v16 = vrot.slane %v5157_v5, %v4670_v32  ;;  %v3494_v20 = vrot.slane %v5157_v5, %v5129_v60 }
0x1985   :  { %v3311_v29 = vmul.f32 %v3307_v46, %v3307_v46  ;;  %v3501_v52 = vrot.slane %v5157_v5, %v5126_v38 }
0x1986   :  { %v3304_v33 = vmul.f32 %v4347_v34, %v3268_v27  ;;  %v3316_v36 = vrot.slane %v3309_v14, 7 }
0x1987   :  { %v3322_v48 = vrot.slane %v3311_v29, 5  ;;  %v3487_v29 = vrot.slane %v5157_v5, %v5121_v59 }
0x1988   :  { %v3308_v35 = vmul.f32 %v3304_v33, %v3304_v33 }
0x198a   :  { %v3318_v54 = vsel %vm3317_vm7, %v3316_v36, %v3308_v35  ;;  %v4425_v35 = vmov 0  }
0x198b   :  { %v3321_v49 = vsel %vm3320_vm8, %v3319_v15, %v3318_v54  ;;  %4205 = vset.pattern.permute.xlu0 %v4425_v35  ;;  %4204 = vset.pattern.permute.xlu1 %v4425_v35 }
0x198c   :  { %v3324_v2 = vsel %vm3323_vm9, %v3322_v48, %v3321_v49 }
0x198d   :  { %v3327_v50 = vsel %vm3326_vm10, %v3324_v2, 0.0 }
0x198e   :  { %3328 = vadd.xlane.f32.xlu1 %v3327_v50 }
0x1a1b   :  { %v3329_v47 = vpop.xlane.xlu1 %3328 }
0x1a1c   :  { %v3330_v8 = vmax.f32 %v3329_v47, 1e-24 }
0x1a1e   :  { %4348 = vrsqrt.f32 %v3330_v8 }
0x1a28   :  { %v4349_v51 = vpop.eup %4348 }
0x1a29   :  { %v3333_v17 = vrot.slane %v4349_v51, 1  ;;  %v3334_v4 = vrot.slane %v4349_v51, 2  ;;  %v3335_v55 = vrot.slane %v4349_v51, 3  ;;  %v3340_v41 = vmul.f32 %v4349_v51, %v3304_v33 }
0x1a2b   :  { %v3341_v19 = vmul.f32 %v3333_v17, %v3305_v45  ;;  %v3342_v56 = vmul.f32 %v3334_v4, %v3306_v31  ;;  %v3343_v42 = vmul.f32 %v3335_v55, %v3307_v46  ;;  %v3347_v53 = vrot.slane %v3340_v41, %v4670_v32 }
0x1a2d   :  { %v3364_v6 = vrot.slane %v3341_v19, 7  ;;  %v3366_v21 = vrot.slane %v3342_v56, 6  ;;  %v3368_v57 = vrot.slane %v3343_v42, 5  ;;  %v3359_v37 = vrot.slane %v3343_v42, %v4670_v32 }
0x1a2e   :  { %v3351_v11 = vrot.slane %v3341_v19, %v4670_v32  ;;  %v3355_v7 = vrot.slane %v3342_v56, %v4670_v32 }
0x1a2f   :  { %v3365_v25 = vsel %vm3317_vm7, %v3364_v6, %v3340_v41 }
0x1a30   :  { %v3367_v39 = vsel %vm3320_vm8, %v3366_v21, %v3365_v25 }
0x1a31   :  { %v3369_v63 = vsel %vm3323_vm9, %v3368_v57, %v3367_v39 }
0x1a32   :  { %v3374_v0 = vmul.f32 %v3369_v63, %v3359_v37  ;;  %v3371_v61 = vmul.f32 %v3369_v63, %v3347_v53  ;;  %v3372_v3 = vmul.f32 %v3369_v63, %v3351_v11  ;;  %v3373_v12 = vmul.f32 %v3369_v63, %v3355_v7 }
0x1a34   :  { %v3384_v1 = vsel %vm3326_vm10, %v3374_v0, 0.0  ;;  %v3375_v34 = vsel %vm3326_vm10, %v3371_v61, 0.0  ;;  %v3378_v10 = vsel %vm3326_vm10, %v3372_v3, 0.0  ;;  %v3381_v9 = vsel %vm3326_vm10, %v3373_v12, 0.0  ;;  %v3446_v0 = vld [vmem:[%s5240_s9] sm:$0xf] }
0x1a35   :  { %3385 = vadd.xlane.f32.xlu1 %v3384_v1  ;;  %3376 = vadd.xlane.f32.xlu0 %v3375_v34 }
0x1a39   :  { %3379 = vadd.xlane.f32.xlu0 %v3378_v10 }
0x1a3d   :  { %3382 = vadd.xlane.f32.xlu0 %v3381_v9 }
0x1a46   :  { %3482 = vbcast.lane.b32.xlu1 %v3480_v16, 256 }
0x1a4a   :  { %3496 = vbcast.lane.b32.xlu1 %v3494_v20, 256 }
0x1a4e   :  { %3503 = vbcast.lane.b32.xlu1 %v3501_v52, 256 }
0x1ac2   :  { %v3377_v23 = vpop.xlane.xlu0 %3376  ;;  %v3386_v22 = vpop.xlane.xlu1 %3385 }
0x1ac3   :  { %v3387_v30 = vmul.f32 14.285714, %v3377_v23  ;;  %v3390_v31 = vmul.f32 14.285714, %v3386_v22 }
0x1ac5   :  { %v3400_v45 = vrot.slane %v3387_v30, %v5166_v58  ;;  %v3412_v27 = vrot.slane %v3390_v31, %v5166_v58 }
0x1ac6   :  { %v3380_v24 = vpop.xlane.xlu0 %3379  ;;  %v3483_v19 = vpop.permute.xlu1 %3482 }
0x1ac7   :  { %v3388_v28 = vmul.f32 14.285714, %v3380_v24 }
0x1ac9   :  { %v3404_v40 = vrot.slane %v3388_v28, %v5166_v58 }
0x1aca   :  { %v3383_v43 = vpop.xlane.xlu0 %3382  ;;  %v3497_v41 = vpop.permute.xlu1 %3496 }
0x1acb   :  { %v3389_v44 = vmul.f32 14.285714, %v3383_v43  ;;  %v3413_v14 = vsel %vm3317_vm7, %v3404_v40, %v3400_v45 }
0x1acd   :  { %v3408_v46 = vrot.slane %v3389_v44, %v5166_v58 }
0x1ace   :  { %v3504_v53 = vpop.permute.xlu1 %3503 }
0x1acf   :  { %v3414_v18 = vsel %vm3320_vm8, %v3408_v46, %v3413_v14  ;;  %v3775_v46 = vld [vmem:[%s5241_s13] ss:$0 sm:$0xff] }
0x1ad0   :  { %v3415_v26 = vsel %vm3323_vm9, %v3412_v27, %v3414_v18 }
0x1ad1   :  { %v3418_v33 = vsel %vm3417_vm12, %v3415_v26, -inf }
0x1ad2   :  { %3419 = vmax.xlane.f32.xlu0 %v3418_v33 }
0x1ae8   :  { %3489 = vbcast.lane.b32.xlu0 %v3487_v29, 256 }
0x1b5f   :  { %v3420_v36 = vpop.xlane.xlu0 %3419 }
0x1b60   :  { %v3425_v15 = vrot.slane %v3420_v36, %v4670_v32  ;;  %v3429_v54 = vrot.slane %v3420_v36, %v5121_v59  ;;  %v3433_v48 = vrot.slane %v3420_v36, %v5129_v60  ;;  %v3437_v49 = vrot.slane %v3420_v36, %v5126_v38 }
0x1b62   :  { %v3442_v2 = vsub.f32 %v3387_v30, %v3425_v15  ;;  %v3443_v50 = vsub.f32 %v3388_v28, %v3429_v54  ;;  %v3444_v47 = vsub.f32 %v3389_v44, %v3433_v48  ;;  %v3445_v8 = vsub.f32 %v3390_v31, %v3437_v49 }
0x1b63   :  { %v3490_v56 = vpop.permute.xlu0 %3489 }
0x1b64   :  { %v3468_v51 = vmul.f32 1.442695, %v3442_v2  ;;  %v3470_v17 = vmul.f32 1.442695, %v3443_v50  ;;  %v3472_v4 = vmul.f32 1.442695, %v3444_v47 }
0x1b65   :  { %v3474_v55 = vmul.f32 1.442695, %v3445_v8 }
0x1b66   :  { %4350 = vpow2.f32 %v3468_v51 }
0x1b67   :  { %4352 = vpow2.f32 %v3470_v17 }
0x1b68   :  { %4354 = vpow2.f32 %v3472_v4 }
0x1b69   :  { %4356 = vpow2.f32 %v3474_v55 }
0x1b70   :  { %v4351_v42 = vpop.eup %4350 }
0x1b71   :  { %v4353_v6 = vpop.eup %4352  ;;  %v3509_v21 = vmul.f32 %v4351_v42, %v3483_v19 }
0x1b72   :  { %v4355_v25 = vpop.eup %4354  ;;  %v3510_v57 = vmul.f32 %v4353_v6, %v3490_v56 }
0x1b73   :  { %3518 = vperm.xlu1 %4204, %v3509_v21   ;;  %v3511_v37 = vmul.f32 %v4355_v25, %v3497_v41  ;;  %v4357_v39 = vpop.eup %4356 }
0x1b74   :  { %3521 = vperm.xlu0 %4205, %v3510_v57   ;;  %v3512_v63 = vmul.f32 %v4357_v39, %v3504_v53 }
0x1b77   :  { %3524 = vperm.xlu1 %4204, %v3511_v37  }
0x1b7b   :  { %3527 = vperm.xlu1 %4204, %v3512_v63  }
0x1b7f   :  { %3450 = vperm.xlu1 %4204, %v3446_v0  }
0x1bf2   :  { %v3519_v61 = vpop.permute.xlu1 %3518 }
0x1bf3   :  { %v3522_v11 = vpop.permute.xlu0 %3521  ;;  %v3532_v34 = vrot.slane %v3519_v61, %v5166_v58 }
0x1bf4   :  { %v3536_v3 = vrot.slane %v3522_v11, %v5166_v58 }
0x1bf6   :  { %v3525_v1 = vpop.permute.xlu1 %3524  ;;  %v3545_v12 = vsel %vm3317_vm7, %v3536_v3, %v3532_v34 }
0x1bf7   :  { %v3540_v7 = vrot.slane %v3525_v1, %v5166_v58 }
0x1bf9   :  { %v3546_v13 = vsel %vm3320_vm8, %v3540_v7, %v3545_v12 }
0x1bfa   :  { %v3528_v10 = vpop.permute.xlu1 %3527 }
0x1bfb   :  { %v3544_v9 = vrot.slane %v3528_v10, %v5166_v58 }
0x1bfd   :  { %v3547_v16 = vsel %vm3323_vm9, %v3544_v9, %v3546_v13 }
0x1bfe   :  { %v3549_v20 = vsel %vm3417_vm12, %v3547_v16, 0.0  ;;  %v3451_v27 = vpop.permute.xlu1 %3450 }
0x1bff   :  { %3550 = vadd.xlane.f32.xlu0 %v3549_v20  ;;  %vm3459_vm13 = vcmp.eq.f32.partialorder %v3451_v27, %v3775_v46 }
0x1c00   :  { %v3776_v14 = vsel %vm3459_vm13, 1.0, %v4417_v62 }
0x1c8c   :  { %v3551_v52 = vpop.xlane.xlu0 %3550 }
0x1c8d   :  { %4358 = vlog2.f32 %v3551_v52 }
0x1c97   :  { %v4359_v23 = vpop.eup %4358 }
0x1c98   :  { %v3553_v24 = vmul.f32 0.6931472, %v4359_v23 }
0x1c9a   :  { %v3558_v22 = vrot.slane %v3553_v24, %v4670_v32  ;;  %v3562_v30 = vrot.slane %v3553_v24, %v5121_v59  ;;  %v3566_v40 = vrot.slane %v3553_v24, %v5129_v60  ;;  %v3570_v44 = vrot.slane %v3553_v24, %v5126_v38 }
0x1c9b   :  { %v3467_v32 = vmul.f32 %v5157_v5, %v3776_v14 }
0x1c9c   :  { %v3575_v28 = vsub.f32 %v3442_v2, %v3558_v22  ;;  %v3576_v31 = vsub.f32 %v3443_v50, %v3562_v30  ;;  %v3577_v43 = vsub.f32 %v3444_v47, %v3566_v40  ;;  %v3578_v45 = vsub.f32 %v3445_v8, %v3570_v44 }
0x1c9d   :  { %v3619_v59 = vsel %vm3417_vm12, %v3467_v32, 0.0 }
0x1c9e   :  { %3584 = vperm.xlu1 %4204, %v3575_v28  }
0x1ca2   :  { %3587 = vperm.xlu1 %4204, %v3576_v31  }
0x1ca6   :  { %3590 = vperm.xlu1 %4204, %v3577_v43  }
0x1caa   :  { %3593 = vperm.xlu1 %4204, %v3578_v45  }
0x1cce   :  { %3620 = vadd.xlane.f32.xlu1 %v3619_v59 }
0x1d1d   :  { %v3585_v18 = vpop.permute.xlu1 %3584 }
0x1d1e   :  { %v3598_v29 = vrot.slane %v3585_v18, %v5166_v58 }
0x1d21   :  { %v3588_v26 = vpop.permute.xlu1 %3587 }
0x1d22   :  { %v3602_v33 = vrot.slane %v3588_v26, %v5166_v58 }
0x1d24   :  { %v3611_v36 = vsel %vm3317_vm7, %v3602_v33, %v3598_v29 }
0x1d25   :  { %v3591_v60 = vpop.permute.xlu1 %3590 }
0x1d26   :  { %v3606_v38 = vrot.slane %v3591_v60, %v5166_v58 }
0x1d28   :  { %v3612_v62 = vsel %vm3320_vm8, %v3606_v38, %v3611_v36 }
0x1d29   :  { %v3594_v35 = vpop.permute.xlu1 %3593 }
0x1d2a   :  { %v3610_v15 = vrot.slane %v3594_v35, %v5166_v58 }
0x1d2c   :  { %v3613_v5 = vsel %vm3323_vm9, %v3610_v15, %v3612_v62 }
0x1d2d   :  { %v3615_v54 = vmul.f32 %v3613_v5, %v3467_v32 }
0x1d2f   :  { %v3616_v48 = vsel %vm3417_vm12, %v3615_v54, 0.0 }
0x1d30   :  { %3617 = vadd.xlane.f32.xlu0 %v3616_v48 }
0x1d5b   :  { %v3621_v49 = vpop.xlane.xlu1 %3620 }
0x1d5c   :  { %4360 = vrcp.f32 %v3621_v49 }
0x1d66   :  { %v4361_v2 = vpop.eup %4360 }
0x1dbd   :  { %v3618_v50 = vpop.xlane.xlu0 %3617 }
0x1dbe   :  { %v3623_v47 = vmul.f32 %v4361_v2, %v3618_v50 }
0x1dc0   :  { %v3624_v8 = vmul.f32 -1.0, %v3623_v47 }
0x1dc2   :  { %v3626_v51 = vsel %vm3625_vm14, %v3624_v8, 0.0 }
0x1dc3   :  { %3627 = vadd.xlane.f32.xlu0 %v3626_v51 }
0x1e50   :  { %v3628_v17 = vpop.xlane.xlu0 %3627 }
0x1e51   :  { %v3629_v4 = vrot.slane %v3628_v17, 4 }
0x1e53   :  { %v3630_v58 = vadd.f32 %v3629_v4, %v3628_v17 }
0x1e55   :  { %v3631_v55 = vrot.slane %v3630_v58, 2 }
0x1e57   :  { %v3632_v19 = vadd.f32 %v3631_v55, %v3630_v58 }
0x1e59   :  { %v3633_v56 = vrot.slane %v3632_v19, 1 }
0x1e5b   :  { %v3634_v42 = vadd.f32 %v3633_v56, %v3632_v19 }
0x1e5d   :  { %4162 = vpush %v3634_v42 }
0x1e8e   :  { %s4163_s18 = spop %4162 }
0x1e8f   :  { %v3636_v41 = vstv %s4163_s18 }
0x1e90   :  { %v3638_v6 = vmul.f32 0.25, %v3636_v41 }
0x1e92   :  { %3640 = vst.msk [vmem:[#allocation2] sm:$0x1] %vm3639_vm15, %v3638_v6 }
0x1e93   :  { %4374 = shalt.err (!%p4371_p4)
}
0x1e94   :  { %s4375_s26 = scalar_lea.hbm %s4585_s17, 16 }
0x1e95   :  { %p4376_p5 = scmp.ne.s32.totalorder %s4585_s17, %s4375_s26  ;;  %p4379_p6 = scmp.lt.u32.totalorder %s4375_s26, %s4585_s17 }
0x1e97   :  { %p4381_p7 = pnand %p4379_p6, %p4376_p5 }
0x1e99   :  { %4384 = shalt.err (!%p4381_p7)
}
0x1e9a   :  { %3650 = dma.vmem_to_hbm [thread:$0]  %s3648_s4, 16, %s4585_s17, [#allocation3]  }
0x1e9b   :  { %4385 = dma.done.wait [#allocation3], 16  }
0x1e9c   :  { %4386 = vsyncadd [#allocation3], 4294967280 }
0x1e9d   :  { %3654 = vsyncpa [#allocation3], 1 }

</bundles_post_ra>
